<compile_context>
chip_gen: v7x
topology: tpu7x:2x2x1
jax: 0.10.0
libtpu: 0.0.40
codegen_flags: <defaults>
</compile_context>

<pallas_src>
import math

import jax
import jax.numpy as jnp
from jax.experimental import pallas as pl
from jax.experimental.pallas import tpu as pltpu

H = 64            # LSTM hidden size (logical)
GP = 128          # per-gate / per-block padded lane width
NG = 4            # gates per LSTM cell
G4 = NG * GP      # 512
IN_SIZE = 2       # LSTM input size
FEAT_IN = 11      # feature vector size

F32 = jnp.float32
BF16 = jnp.bfloat16

_VMEM = pl.BlockSpec(memory_space=pltpu.MemorySpace.VMEM)
_ANY = pl.BlockSpec(memory_space=pl.ANY)
_HIGH = jax.lax.Precision.HIGHEST


# --------------------------------------------------------------------------
# Fused kernel: LSTM recurrence (layer-0 input proj precomputed) + feature MLP + heads
# --------------------------------------------------------------------------
def fused_kernel(xg0_ref,                         # (T, B, 512) f32 : x@Wih0 + b0, gate-padded
                 whh0_ref,                        # (128, 512) bf16 : layer-0 recurrent weight
                 wl1_ref,                         # (256, 512) bf16 : fused [Wih1 ; Whh1]
                 b1_ref,                          # (1, 512) f32
                 feat_ref,                        # (B, 11) f32
                 fw1_ref, fb1_ref, fb2_ref,       # feature MLP (fw2 arrives via overlapped DMA)
                 bh1_ref, br2_ref, bfin_ref,      # epilogue biases (f32)
                 fw2_hbm, wh1_hbm, wr2_hbm, wfin_hbm,   # epilogue weights in HBM (pl.ANY)
                 out_ref,                         # (B, 128) f32 packed risk|kpi|growth
                 fw2_v, wh1_v, wr2_v, wfin_v, dma_sem):
    T, B, _ = xg0_ref.shape

    # --- kick off epilogue-weight DMAs; they hide completely behind the serial recurrence ---
    copies = [pltpu.make_async_copy(fw2_hbm, fw2_v, dma_sem.at[0]),
              pltpu.make_async_copy(wh1_hbm, wh1_v, dma_sem.at[1]),
              pltpu.make_async_copy(wr2_hbm, wr2_v, dma_sem.at[2]),
              pltpu.make_async_copy(wfin_hbm, wfin_v, dma_sem.at[3])]
    for cp in copies:
        cp.start()

    # hoist the bias broadcast out of the unrolled loop (JAX does not CSE broadcast_in_dim)
    b1b = jnp.broadcast_to(b1_ref[...], (B, G4))

    def sigmoid(x):                      # exact: single EUP tanh per gate
        return 0.5 * jnp.tanh(0.5 * x) + 0.5

    def gates_to_hc(gates, c):
        # each gate occupies its own 128-lane block -> whole-vreg slices
        i = sigmoid(gates[:, 0 * GP:1 * GP])
        f = sigmoid(gates[:, 1 * GP:2 * GP])
        g = jnp.tanh(gates[:, 2 * GP:3 * GP])
        o = sigmoid(gates[:, 3 * GP:4 * GP])
        c_new = f * c + i * g
        # padded lanes: gate=0 -> i=f=o=0.5, g=0 -> c stays 0, h = 0.5*tanh(0) = 0 (exact in bf16)
        h_new = (o * jnp.tanh(c_new)).astype(BF16)   # h carried as bf16 MXU operand
        return h_new, c_new

    h0 = jnp.zeros((B, GP), BF16)
    c0 = jnp.zeros((B, GP), F32)
    h1 = jnp.zeros((B, GP), BF16)
    c1 = jnp.zeros((B, GP), F32)

    # T is small and static -> unrolled; weight refs are read inside the dots so no large
    # hoisted values span the unrolled iterations (weights stay VMEM-resident).
    for t in range(T):
        g0 = xg0_ref[t] + jnp.dot(h0, whh0_ref[...], preferred_element_type=F32)
        h0, c0 = gates_to_hc(g0, c0)
        # fused layer-1 recurrent matmul: [h0 | h1] is a vreg-aligned lane-block concat
        hcat = jnp.concatenate([h0, h1], axis=1)                       # (B, 256) bf16
        g1 = jnp.dot(hcat, wl1_ref[...], preferred_element_type=F32) + b1b
        h1, c1 = gates_to_hc(g1, c1)

    # --- epilogue: wait for overlapped weights, then feature MLP + fused heads ---
    for cp in copies:
        cp.wait()

    # feature_network: Linear(11,32) -> ReLU -> [Dropout=id] -> Linear(32,32), padded to 128 lanes
    featb = feat_ref[...].astype(BF16)
    f1 = jnp.maximum(
        jnp.dot(featb, fw1_ref[...], preferred_element_type=F32) + fb1_ref[...], 0.0)
    f2 = jnp.dot(f1.astype(BF16), fw2_v[...], preferred_element_type=F32) + fb2_ref[...]

    # fused first layer of risk/kpi/growth: one dot on [h1 | f2] (K=256), each head in its
    # own 128-lane block of the 384-lane output
    xcat = jnp.concatenate([h1, f2.astype(BF16)], axis=1)              # (B, 256) bf16
    a1 = jnp.maximum(
        jnp.dot(xcat, wh1_v[...], preferred_element_type=F32) + bh1_ref[...], 0.0)  # (B, 384)

    r1 = a1[:, 0 * GP:1 * GP]      # risk hidden-1   (real 0:64)
    k1 = a1[:, 1 * GP:2 * GP]      # kpi hidden      (real 0:32)
    g1h = a1[:, 2 * GP:3 * GP]     # growth hidden   (real 0:64)

    # risk second hidden layer: 64->32 (padded 128->128)
    r2 = jnp.maximum(
        jnp.dot(r1.astype(BF16), wr2_v[...], preferred_element_type=F32) + br2_ref[...], 0.0)

    # fused final layers: one dot on [r2 | k1 | g1h] (K=384) -> packed risk(3)|kpi(4)|growth(36)
    zcat = jnp.concatenate([r2.astype(BF16), k1.astype(BF16), g1h.astype(BF16)], axis=1)
    out_ref[...] = jnp.dot(zcat, wfin_v[...], preferred_element_type=F32) + bfin_ref[...]


# --------------------------------------------------------------------------
# Parameter init (deterministic, PyTorch-style uniform(-k, k)), logical layout
# --------------------------------------------------------------------------
def _uniform(key, shape, k):
    return jax.random.uniform(key, shape, F32, minval=-k, maxval=k)


def init_params(key):
    p = {}
    keys = iter(jax.random.split(key, 64))
    kl = 1.0 / math.sqrt(H)

    # LSTM layers, pre-transposed: (in, 4H) / (H, 4H); bias = b_ih + b_hh
    p["wih0"] = _uniform(next(keys), (IN_SIZE, 4 * H), kl)
    p["whh0"] = _uniform(next(keys), (H, 4 * H), kl)
    p["b0"] = _uniform(next(keys), (1, 4 * H), kl) + _uniform(next(keys), (1, 4 * H), kl)
    p["wih1"] = _uniform(next(keys), (H, 4 * H), kl)
    p["whh1"] = _uniform(next(keys), (H, 4 * H), kl)
    p["b1"] = _uniform(next(keys), (1, 4 * H), kl) + _uniform(next(keys), (1, 4 * H), kl)

    def linear(fan_in, fan_out):
        k = 1.0 / math.sqrt(fan_in)
        return (_uniform(next(keys), (fan_in, fan_out), k),     # pre-transposed (in, out)
                _uniform(next(keys), (1, fan_out), k))

    p["fw1"], p["fb1"] = linear(11, 32)
    p["fw2"], p["fb2"] = linear(32, 32)
    p["rw1"], p["rb1"] = linear(96, 64)
    p["rw2"], p["rb2"] = linear(64, 32)
    p["rw3"], p["rb3"] = linear(32, 3)
    p["kw1"], p["kb1"] = linear(96, 32)
    p["kw2"], p["kb2"] = linear(32, 4)
    p["gw1"], p["gb1"] = linear(96, 64)
    p["gw2"], p["gb2"] = linear(64, 36)
    return p


# --------------------------------------------------------------------------
# Pack logical params into the kernel's lane-aligned / zero-padded bf16 layout (runs once).
# All padded rows/columns are written as exact zeros -> the padded-lane invariant of the
# recurrence (h/c lanes 64:128 stay zero) holds by construction.
# --------------------------------------------------------------------------
def pack_params(p):
    def pad2(w, rows, cols, r0=0, c0=0, dtype=BF16):
        out = jnp.zeros((rows, cols), F32)
        out = out.at[r0:r0 + w.shape[0], c0:c0 + w.shape[1]].set(w)
        return out.astype(dtype)

    def pad_gates(w, rows, dtype=BF16):
        # (K, 4*H) -> (rows, 4*GP), each gate in its own 128-lane block
        out = jnp.zeros((rows, NG * GP), F32)
        for gi in range(NG):
            out = out.at[:w.shape[0], gi * GP:gi * GP + H].set(w[:, gi * H:(gi + 1) * H])
        return out.astype(dtype)

    kp = {}
    # layer-0 input projection + bias stay f32: used only in the hoisted XLA einsum
    kp["wih0_p"] = pad_gates(p["wih0"], IN_SIZE, dtype=F32)   # (2,   512)
    kp["b0_p"] = pad_gates(p["b0"], 1, dtype=F32)             # (1,   512)

    kp["whh0_p"] = pad_gates(p["whh0"], GP)                   # (128, 512) bf16
    # fused layer-1 weight: rows 0:128 multiply h0, rows 128:256 multiply h1
    kp["wl1_p"] = jnp.concatenate(
        [pad_gates(p["wih1"], GP, dtype=F32),
         pad_gates(p["whh1"], GP, dtype=F32)], axis=0).astype(BF16)   # (256, 512)
    kp["b1_p"] = pad_gates(p["b1"], 1, dtype=F32)             # (1, 512) f32

    kp["fw1_p"] = pad2(p["fw1"], FEAT_IN, GP)                 # (11, 128) bf16
    kp["fb1_p"] = pad2(p["fb1"], 1, GP, dtype=F32)
    kp["fw2_p"] = pad2(p["fw2"], GP, GP)                      # (128,128) bf16, real rows 0:32
    kp["fb2_p"] = pad2(p["fb2"], 1, GP, dtype=F32)

    # fused head layer-1: (256, 384). rows 0:64 = temporal part, rows 128:160 = feature part;
    # head column blocks at lane offsets 0 / 128 / 256
    wh1 = jnp.zeros((2 * GP, 3 * GP), F32)
    bh1 = jnp.zeros((1, 3 * GP), F32)
    for ci, (w1, b1_) in enumerate([(p["rw1"], p["rb1"]),
                                    (p["kw1"], p["kb1"]),
                                    (p["gw1"], p["gb1"])]):
        wh1 = wh1.at[0:H, ci * GP:ci * GP + w1.shape[1]].set(w1[0:H])            # temporal rows
        wh1 = wh1.at[GP:GP + 32, ci * GP:ci * GP + w1.shape[1]].set(w1[H:H + 32])  # feature rows
        bh1 = bh1.at[:, ci * GP:ci * GP + b1_.shape[1]].set(b1_)
    kp["wh1_p"] = wh1.astype(BF16)
    kp["bh1_p"] = bh1

    kp["wr2_p"] = pad2(p["rw2"], GP, GP)                      # (128,128) bf16, (64,32) top-left
    kp["br2_p"] = pad2(p["rb2"], 1, GP, dtype=F32)

    # fused final layer: (384, 128). rows 0:32 = rw3 -> cols 0:3, rows 128:160 = kw2 -> cols 3:7,
    # rows 256:320 = gw2 -> cols 7:43
    wfin = jnp.zeros((3 * GP, GP), F32)
    wfin = wfin.at[0:32, 0:3].set(p["rw3"])
    wfin = wfin.at[GP:GP + 32, 3:7].set(p["kw2"])
    wfin = wfin.at[2 * GP:2 * GP + 64, 7:43].set(p["gw2"])
    kp["wfin_p"] = wfin.astype(BF16)
    bfin = jnp.zeros((1, GP), F32)
    bfin = bfin.at[:, 0:3].set(p["rb3"])
    bfin = bfin.at[:, 3:7].set(p["kb2"])
    bfin = bfin.at[:, 7:43].set(p["gb2"])
    kp["bfin_p"] = bfin
    return kp


# --------------------------------------------------------------------------
# Wrapper: one fused pallas_call; layer-0 input projection hoisted into XLA
# --------------------------------------------------------------------------
@jax.jit
def business_model_forward(temporal_data, features, kp):
    B, T, _ = temporal_data.shape

    # Hoisted layer-0 input projection + bias, time-major so the kernel slices whole
    # (B, 512) tiles per step and never sees a lane-dim-2 tensor.  Default precision
    # (K=2, consumers are bf16-fed anyway).
    xg0 = jnp.einsum("btk,kg->tbg", temporal_data, kp["wih0_p"]) + kp["b0_p"]   # (T, B, 512) f32

    kernel_in = [xg0,
                 kp["whh0_p"], kp["wl1_p"], kp["b1_p"],
                 features,
                 kp["fw1_p"], kp["fb1_p"], kp["fb2_p"],
                 kp["bh1_p"], kp["br2_p"], kp["bfin_p"],
                 # epilogue weights: stay in HBM, DMA'd inside the kernel behind the recurrence
                 kp["fw2_p"], kp["wh1_p"], kp["wr2_p"], kp["wfin_p"]]

    packed = pl.pallas_call(
        fused_kernel,
        out_shape=jax.ShapeDtypeStruct((B, GP), jnp.float32),
        in_specs=[_VMEM] * 11 + [_ANY] * 4,
        out_specs=_VMEM,
        scratch_shapes=[pltpu.VMEM((GP, GP), BF16),           # fw2
                        pltpu.VMEM((2 * GP, 3 * GP), BF16),   # fused head layer-1
                        pltpu.VMEM((GP, GP), BF16),           # risk layer-2
                        pltpu.VMEM((3 * GP, GP), BF16),       # fused final
                        pltpu.SemaphoreType.DMA((4,))],
    )(*kernel_in)
    # TODO(synk): for large B (>=16-ish), add a batch grid with
    # dimension_semantics=("parallel",) to engage the second TensorCore on v7x; at B=2 a
    # grid is pure per-step overhead.

    risk = packed[:, 0:3]
    kpi = packed[:, 3:7]
    growth = packed[:, 7:43]
    return {
        "risk_analysis": risk,
        "kpi_metrics": kpi,
        "growth_predictions": {
            "absolute": growth[:, :12],
            "relative": growth[:, 12:24],
            "log": growth[:, 24:],
        },
    }


# --------------------------------------------------------------------------
# Pure-JAX reference (same logical params) for numerical validation
# --------------------------------------------------------------------------
def reference_forward(temporal_data, features, p):
    B = temporal_data.shape[0]
    T = temporal_data.shape[1]

    def mm(a, b):
        return jnp.dot(a, b, precision=_HIGH)

    def cell(x, h, c, wih, whh, b):
        gates = mm(x, wih) + mm(h, whh) + b
        i = jax.nn.sigmoid(gates[:, 0 * H:1 * H])
        f = jax.nn.sigmoid(gates[:, 1 * H:2 * H])
        g = jnp.tanh(gates[:, 2 * H:3 * H])
        o = jax.nn.sigmoid(gates[:, 3 * H:4 * H])
        c = f * c + i * g
        return o * jnp.tanh(c), c

    h0 = jnp.zeros((B, H)); c0 = jnp.zeros((B, H))
    h1 = jnp.zeros((B, H)); c1 = jnp.zeros((B, H))
    for t in range(T):
        h0, c0 = cell(temporal_data[:, t, :], h0, c0, p["wih0"], p["whh0"], p["b0"])
        h1, c1 = cell(h0, h1, c1, p["wih1"], p["whh1"], p["b1"])

    feat = mm(jnp.maximum(mm(features, p["fw1"]) + p["fb1"], 0.0), p["fw2"]) + p["fb2"]
    comb = jnp.concatenate([h1, feat], axis=1)
    r = jnp.maximum(mm(comb, p["rw1"]) + p["rb1"], 0.0)
    r = jnp.maximum(mm(r, p["rw2"]) + p["rb2"], 0.0)
    risk = mm(r, p["rw3"]) + p["rb3"]
    k = jnp.maximum(mm(comb, p["kw1"]) + p["kb1"], 0.0)
    kpi = mm(k, p["kw2"]) + p["kb2"]
    g = jnp.maximum(mm(comb, p["gw1"]) + p["gb1"], 0.0)
    growth = mm(g, p["gw2"]) + p["gb2"]
    return risk, kpi, growth


if __name__ == "__main__":
    key = jax.random.PRNGKey(0)
    k_params, k_temp, k_feat = jax.random.split(key, 3)

    B, T = 2, 8
    temporal_data = jax.random.normal(k_temp, (B, T, IN_SIZE), F32)
    features = jax.random.normal(k_feat, (B, FEAT_IN), F32)

    params = init_params(k_params)
    kparams = pack_params(params)

    out = business_model_forward(temporal_data, features, kparams)
    out = jax.block_until_ready(out)

    risk = out["risk_analysis"]
    kpi = out["kpi_metrics"]
    g_abs = out["growth_predictions"]["absolute"]
    g_rel = out["growth_predictions"]["relative"]
    g_log = out["growth_predictions"]["log"]

    assert risk.shape == (B, 3)
    assert kpi.shape == (B, 4)
    assert g_abs.shape == (B, 12)
    assert g_rel.shape == (B, 12)
    assert g_log.shape == (B, 12)
    assert all(bool(jnp.all(jnp.isfinite(v))) for v in (risk, kpi, g_abs, g_rel, g_log))

    # numerical check against pure-JAX (f32, HIGHEST) reference of the same module
    risk_r, kpi_r, growth_r = reference_forward(temporal_data, features, params)
    growth = jnp.concatenate([g_abs, g_rel, g_log], axis=1)
    assert bool(jnp.allclose(risk, risk_r, rtol=1e-2, atol=1e-2))
    assert bool(jnp.allclose(kpi, kpi_r, rtol=1e-2, atol=1e-2))
    assert bool(jnp.allclose(growth, growth_r, rtol=1e-2, atol=1e-2))

    print("KERNEL_OK")
</pallas_src>

<mosaic_0001>
module attributes {stable_mosaic.version = 11 : i64} {
  func.func @fused_kernel(%arg0: memref<8x2x512xf32, #tpu.memory_space<vmem>>, %arg1: memref<128x512xbf16, #tpu.memory_space<vmem>>, %arg2: memref<256x512xbf16, #tpu.memory_space<vmem>>, %arg3: memref<1x512xf32, #tpu.memory_space<vmem>>, %arg4: memref<2x11xf32, #tpu.memory_space<vmem>>, %arg5: memref<11x128xbf16, #tpu.memory_space<vmem>>, %arg6: memref<1x128xf32, #tpu.memory_space<vmem>>, %arg7: memref<1x128xf32, #tpu.memory_space<vmem>>, %arg8: memref<1x384xf32, #tpu.memory_space<vmem>>, %arg9: memref<1x128xf32, #tpu.memory_space<vmem>>, %arg10: memref<1x128xf32, #tpu.memory_space<vmem>>, %arg11: memref<128x128xbf16, #tpu.memory_space<any>>, %arg12: memref<256x384xbf16, #tpu.memory_space<any>>, %arg13: memref<128x128xbf16, #tpu.memory_space<any>>, %arg14: memref<384x128xbf16, #tpu.memory_space<any>>, %arg15: memref<2x128xf32, #tpu.memory_space<vmem>>, %arg16: memref<128x128xbf16, #tpu.memory_space<vmem>>, %arg17: memref<256x384xbf16, #tpu.memory_space<vmem>>, %arg18: memref<128x128xbf16, #tpu.memory_space<vmem>>, %arg19: memref<384x128xbf16, #tpu.memory_space<vmem>>, %arg20: memref<4x!tpu.dma_semaphore, #tpu.memory_space<semaphore_mem>>) attributes {dimension_semantics = [], scalar_prefetch = 0 : i64, scratch_operands = 5 : i64, tpu.core_type = #tpu.core_type<tc>} {
    %c0_i32 = arith.constant 0 : i32
    %0 = tpu.memref_slice %arg20[%c0_i32] : memref<4x!tpu.dma_semaphore, #tpu.memory_space<semaphore_mem>> -> memref<1x!tpu.dma_semaphore, #tpu.memory_space<semaphore_mem>>
    %1 = tpu.memref_squeeze %0 : memref<1x!tpu.dma_semaphore, #tpu.memory_space<semaphore_mem>> -> memref<!tpu.dma_semaphore, #tpu.memory_space<semaphore_mem>>
    tpu.enqueue_dma source(%arg11 : memref<128x128xbf16, #tpu.memory_space<any>>) target(%arg16 : memref<128x128xbf16, #tpu.memory_space<vmem>>) target_semaphore(%1 : memref<!tpu.dma_semaphore, #tpu.memory_space<semaphore_mem>>)
    %c1_i32 = arith.constant 1 : i32
    %2 = tpu.memref_slice %arg20[%c1_i32] : memref<4x!tpu.dma_semaphore, #tpu.memory_space<semaphore_mem>> -> memref<1x!tpu.dma_semaphore, #tpu.memory_space<semaphore_mem>>
    %3 = tpu.memref_squeeze %2 : memref<1x!tpu.dma_semaphore, #tpu.memory_space<semaphore_mem>> -> memref<!tpu.dma_semaphore, #tpu.memory_space<semaphore_mem>>
    tpu.enqueue_dma source(%arg12 : memref<256x384xbf16, #tpu.memory_space<any>>) target(%arg17 : memref<256x384xbf16, #tpu.memory_space<vmem>>) target_semaphore(%3 : memref<!tpu.dma_semaphore, #tpu.memory_space<semaphore_mem>>)
    %c2_i32 = arith.constant 2 : i32
    %4 = tpu.memref_slice %arg20[%c2_i32] : memref<4x!tpu.dma_semaphore, #tpu.memory_space<semaphore_mem>> -> memref<1x!tpu.dma_semaphore, #tpu.memory_space<semaphore_mem>>
    %5 = tpu.memref_squeeze %4 : memref<1x!tpu.dma_semaphore, #tpu.memory_space<semaphore_mem>> -> memref<!tpu.dma_semaphore, #tpu.memory_space<semaphore_mem>>
    tpu.enqueue_dma source(%arg13 : memref<128x128xbf16, #tpu.memory_space<any>>) target(%arg18 : memref<128x128xbf16, #tpu.memory_space<vmem>>) target_semaphore(%5 : memref<!tpu.dma_semaphore, #tpu.memory_space<semaphore_mem>>)
    %c3_i32 = arith.constant 3 : i32
    %6 = tpu.memref_slice %arg20[%c3_i32] : memref<4x!tpu.dma_semaphore, #tpu.memory_space<semaphore_mem>> -> memref<1x!tpu.dma_semaphore, #tpu.memory_space<semaphore_mem>>
    %7 = tpu.memref_squeeze %6 : memref<1x!tpu.dma_semaphore, #tpu.memory_space<semaphore_mem>> -> memref<!tpu.dma_semaphore, #tpu.memory_space<semaphore_mem>>
    tpu.enqueue_dma source(%arg14 : memref<384x128xbf16, #tpu.memory_space<any>>) target(%arg19 : memref<384x128xbf16, #tpu.memory_space<vmem>>) target_semaphore(%7 : memref<!tpu.dma_semaphore, #tpu.memory_space<semaphore_mem>>)
    %c0 = arith.constant 0 : index
    %c0_0 = arith.constant 0 : index
    %8 = vector.load %arg3[%c0, %c0_0] : memref<1x512xf32, #tpu.memory_space<vmem>>, vector<1x512xf32>
    %9 = vector.shape_cast %8 : vector<1x512xf32> to vector<1x512xf32>
    %10 = vector.broadcast %9 : vector<1x512xf32> to vector<2x512xf32>
    %cst = arith.constant 0.000000e+00 : bf16
    %11 = vector.broadcast %cst : bf16 to vector<2x128xbf16>
    %cst_1 = arith.constant 0.000000e+00 : f32
    %12 = vector.broadcast %cst_1 : f32 to vector<2x128xf32>
    %cst_2 = arith.constant 0.000000e+00 : bf16
    %13 = vector.broadcast %cst_2 : bf16 to vector<2x128xbf16>
    %cst_3 = arith.constant 0.000000e+00 : f32
    %14 = vector.broadcast %cst_3 : f32 to vector<2x128xf32>
    %c0_4 = arith.constant 0 : index
    %c0_5 = arith.constant 0 : index
    %c0_6 = arith.constant 0 : index
    %15 = vector.load %arg0[%c0_4, %c0_5, %c0_6] : memref<8x2x512xf32, #tpu.memory_space<vmem>>, vector<1x2x512xf32>
    %16 = vector.shape_cast %15 : vector<1x2x512xf32> to vector<2x512xf32>
    %c0_7 = arith.constant 0 : index
    %c0_8 = arith.constant 0 : index
    %17 = vector.load %arg1[%c0_7, %c0_8] : memref<128x512xbf16, #tpu.memory_space<vmem>>, vector<128x512xbf16>
    %cst_9 = arith.constant dense<0.000000e+00> : vector<2x512xf32>
    %18 = tpu.matmul %11, %17, %cst_9 {dimension_numbers = #tpu.dot_dimension_numbers<[1], [0], [0], [1], [0, 0, 1, 1], [], []>} : vector<2x128xbf16>, vector<128x512xbf16>, vector<2x512xf32> -> vector<2x512xf32>
    %19 = arith.addf %16, %18 : vector<2x512xf32>
    %20 = vector.extract_strided_slice %19 {offsets = [0, 0], sizes = [2, 128], strides = [1, 1]} : vector<2x512xf32> to vector<2x128xf32>
    %cst_10 = arith.constant 5.000000e-01 : f32
    %21 = vector.broadcast %cst_10 : f32 to vector<2x128xf32>
    %22 = arith.mulf %21, %20 : vector<2x128xf32>
    %23 = math.tanh %22 : vector<2x128xf32>
    %cst_11 = arith.constant 5.000000e-01 : f32
    %24 = vector.broadcast %cst_11 : f32 to vector<2x128xf32>
    %25 = arith.mulf %24, %23 : vector<2x128xf32>
    %cst_12 = arith.constant 5.000000e-01 : f32
    %26 = vector.broadcast %cst_12 : f32 to vector<2x128xf32>
    %27 = arith.addf %25, %26 : vector<2x128xf32>
    %28 = vector.extract_strided_slice %19 {offsets = [0, 128], sizes = [2, 128], strides = [1, 1]} : vector<2x512xf32> to vector<2x128xf32>
    %cst_13 = arith.constant 5.000000e-01 : f32
    %29 = vector.broadcast %cst_13 : f32 to vector<2x128xf32>
    %30 = arith.mulf %29, %28 : vector<2x128xf32>
    %31 = math.tanh %30 : vector<2x128xf32>
    %cst_14 = arith.constant 5.000000e-01 : f32
    %32 = vector.broadcast %cst_14 : f32 to vector<2x128xf32>
    %33 = arith.mulf %32, %31 : vector<2x128xf32>
    %cst_15 = arith.constant 5.000000e-01 : f32
    %34 = vector.broadcast %cst_15 : f32 to vector<2x128xf32>
    %35 = arith.addf %33, %34 : vector<2x128xf32>
    %36 = vector.extract_strided_slice %19 {offsets = [0, 256], sizes = [2, 128], strides = [1, 1]} : vector<2x512xf32> to vector<2x128xf32>
    %37 = math.tanh %36 : vector<2x128xf32>
    %38 = vector.extract_strided_slice %19 {offsets = [0, 384], sizes = [2, 128], strides = [1, 1]} : vector<2x512xf32> to vector<2x128xf32>
    %cst_16 = arith.constant 5.000000e-01 : f32
    %39 = vector.broadcast %cst_16 : f32 to vector<2x128xf32>
    %40 = arith.mulf %39, %38 : vector<2x128xf32>
    %41 = math.tanh %40 : vector<2x128xf32>
    %cst_17 = arith.constant 5.000000e-01 : f32
    %42 = vector.broadcast %cst_17 : f32 to vector<2x128xf32>
    %43 = arith.mulf %42, %41 : vector<2x128xf32>
    %cst_18 = arith.constant 5.000000e-01 : f32
    %44 = vector.broadcast %cst_18 : f32 to vector<2x128xf32>
    %45 = arith.addf %43, %44 : vector<2x128xf32>
    %46 = arith.mulf %35, %12 : vector<2x128xf32>
    %47 = arith.mulf %27, %37 : vector<2x128xf32>
    %48 = arith.addf %46, %47 : vector<2x128xf32>
    %49 = math.tanh %48 : vector<2x128xf32>
    %50 = arith.mulf %45, %49 : vector<2x128xf32>
    %51 = arith.truncf %50 : vector<2x128xf32> to vector<2x128xbf16>
    %52 = tpu.concatenate %51, %13 in 1 : vector<2x128xbf16>, vector<2x128xbf16> -> vector<2x256xbf16>
    %c0_19 = arith.constant 0 : index
    %c0_20 = arith.constant 0 : index
    %53 = vector.load %arg2[%c0_19, %c0_20] : memref<256x512xbf16, #tpu.memory_space<vmem>>, vector<256x512xbf16>
    %cst_21 = arith.constant dense<0.000000e+00> : vector<2x512xf32>
    %54 = tpu.matmul %52, %53, %cst_21 {dimension_numbers = #tpu.dot_dimension_numbers<[1], [0], [0], [1], [0, 0, 1, 1], [], []>} : vector<2x256xbf16>, vector<256x512xbf16>, vector<2x512xf32> -> vector<2x512xf32>
    %55 = arith.addf %54, %10 : vector<2x512xf32>
    %56 = vector.extract_strided_slice %55 {offsets = [0, 0], sizes = [2, 128], strides = [1, 1]} : vector<2x512xf32> to vector<2x128xf32>
    %cst_22 = arith.constant 5.000000e-01 : f32
    %57 = vector.broadcast %cst_22 : f32 to vector<2x128xf32>
    %58 = arith.mulf %57, %56 : vector<2x128xf32>
    %59 = math.tanh %58 : vector<2x128xf32>
    %cst_23 = arith.constant 5.000000e-01 : f32
    %60 = vector.broadcast %cst_23 : f32 to vector<2x128xf32>
    %61 = arith.mulf %60, %59 : vector<2x128xf32>
    %cst_24 = arith.constant 5.000000e-01 : f32
    %62 = vector.broadcast %cst_24 : f32 to vector<2x128xf32>
    %63 = arith.addf %61, %62 : vector<2x128xf32>
    %64 = vector.extract_strided_slice %55 {offsets = [0, 128], sizes = [2, 128], strides = [1, 1]} : vector<2x512xf32> to vector<2x128xf32>
    %cst_25 = arith.constant 5.000000e-01 : f32
    %65 = vector.broadcast %cst_25 : f32 to vector<2x128xf32>
    %66 = arith.mulf %65, %64 : vector<2x128xf32>
    %67 = math.tanh %66 : vector<2x128xf32>
    %cst_26 = arith.constant 5.000000e-01 : f32
    %68 = vector.broadcast %cst_26 : f32 to vector<2x128xf32>
    %69 = arith.mulf %68, %67 : vector<2x128xf32>
    %cst_27 = arith.constant 5.000000e-01 : f32
    %70 = vector.broadcast %cst_27 : f32 to vector<2x128xf32>
    %71 = arith.addf %69, %70 : vector<2x128xf32>
    %72 = vector.extract_strided_slice %55 {offsets = [0, 256], sizes = [2, 128], strides = [1, 1]} : vector<2x512xf32> to vector<2x128xf32>
    %73 = math.tanh %72 : vector<2x128xf32>
    %74 = vector.extract_strided_slice %55 {offsets = [0, 384], sizes = [2, 128], strides = [1, 1]} : vector<2x512xf32> to vector<2x128xf32>
    %cst_28 = arith.constant 5.000000e-01 : f32
    %75 = vector.broadcast %cst_28 : f32 to vector<2x128xf32>
    %76 = arith.mulf %75, %74 : vector<2x128xf32>
    %77 = math.tanh %76 : vector<2x128xf32>
    %cst_29 = arith.constant 5.000000e-01 : f32
    %78 = vector.broadcast %cst_29 : f32 to vector<2x128xf32>
    %79 = arith.mulf %78, %77 : vector<2x128xf32>
    %cst_30 = arith.constant 5.000000e-01 : f32
    %80 = vector.broadcast %cst_30 : f32 to vector<2x128xf32>
    %81 = arith.addf %79, %80 : vector<2x128xf32>
    %82 = arith.mulf %71, %14 : vector<2x128xf32>
    %83 = arith.mulf %63, %73 : vector<2x128xf32>
    %84 = arith.addf %82, %83 : vector<2x128xf32>
    %85 = math.tanh %84 : vector<2x128xf32>
    %86 = arith.mulf %81, %85 : vector<2x128xf32>
    %87 = arith.truncf %86 : vector<2x128xf32> to vector<2x128xbf16>
    %c1 = arith.constant 1 : index
    %c0_31 = arith.constant 0 : index
    %c0_32 = arith.constant 0 : index
    %88 = vector.load %arg0[%c1, %c0_31, %c0_32] : memref<8x2x512xf32, #tpu.memory_space<vmem>>, vector<1x2x512xf32>
    %89 = vector.shape_cast %88 : vector<1x2x512xf32> to vector<2x512xf32>
    %c0_33 = arith.constant 0 : index
    %c0_34 = arith.constant 0 : index
    %90 = vector.load %arg1[%c0_33, %c0_34] : memref<128x512xbf16, #tpu.memory_space<vmem>>, vector<128x512xbf16>
    %cst_35 = arith.constant dense<0.000000e+00> : vector<2x512xf32>
    %91 = tpu.matmul %51, %90, %cst_35 {dimension_numbers = #tpu.dot_dimension_numbers<[1], [0], [0], [1], [0, 0, 1, 1], [], []>} : vector<2x128xbf16>, vector<128x512xbf16>, vector<2x512xf32> -> vector<2x512xf32>
    %92 = arith.addf %89, %91 : vector<2x512xf32>
    %93 = vector.extract_strided_slice %92 {offsets = [0, 0], sizes = [2, 128], strides = [1, 1]} : vector<2x512xf32> to vector<2x128xf32>
    %cst_36 = arith.constant 5.000000e-01 : f32
    %94 = vector.broadcast %cst_36 : f32 to vector<2x128xf32>
    %95 = arith.mulf %94, %93 : vector<2x128xf32>
    %96 = math.tanh %95 : vector<2x128xf32>
    %cst_37 = arith.constant 5.000000e-01 : f32
    %97 = vector.broadcast %cst_37 : f32 to vector<2x128xf32>
    %98 = arith.mulf %97, %96 : vector<2x128xf32>
    %cst_38 = arith.constant 5.000000e-01 : f32
    %99 = vector.broadcast %cst_38 : f32 to vector<2x128xf32>
    %100 = arith.addf %98, %99 : vector<2x128xf32>
    %101 = vector.extract_strided_slice %92 {offsets = [0, 128], sizes = [2, 128], strides = [1, 1]} : vector<2x512xf32> to vector<2x128xf32>
    %cst_39 = arith.constant 5.000000e-01 : f32
    %102 = vector.broadcast %cst_39 : f32 to vector<2x128xf32>
    %103 = arith.mulf %102, %101 : vector<2x128xf32>
    %104 = math.tanh %103 : vector<2x128xf32>
    %cst_40 = arith.constant 5.000000e-01 : f32
    %105 = vector.broadcast %cst_40 : f32 to vector<2x128xf32>
    %106 = arith.mulf %105, %104 : vector<2x128xf32>
    %cst_41 = arith.constant 5.000000e-01 : f32
    %107 = vector.broadcast %cst_41 : f32 to vector<2x128xf32>
    %108 = arith.addf %106, %107 : vector<2x128xf32>
    %109 = vector.extract_strided_slice %92 {offsets = [0, 256], sizes = [2, 128], strides = [1, 1]} : vector<2x512xf32> to vector<2x128xf32>
    %110 = math.tanh %109 : vector<2x128xf32>
    %111 = vector.extract_strided_slice %92 {offsets = [0, 384], sizes = [2, 128], strides = [1, 1]} : vector<2x512xf32> to vector<2x128xf32>
    %cst_42 = arith.constant 5.000000e-01 : f32
    %112 = vector.broadcast %cst_42 : f32 to vector<2x128xf32>
    %113 = arith.mulf %112, %111 : vector<2x128xf32>
    %114 = math.tanh %113 : vector<2x128xf32>
    %cst_43 = arith.constant 5.000000e-01 : f32
    %115 = vector.broadcast %cst_43 : f32 to vector<2x128xf32>
    %116 = arith.mulf %115, %114 : vector<2x128xf32>
    %cst_44 = arith.constant 5.000000e-01 : f32
    %117 = vector.broadcast %cst_44 : f32 to vector<2x128xf32>
    %118 = arith.addf %116, %117 : vector<2x128xf32>
    %119 = arith.mulf %108, %48 : vector<2x128xf32>
    %120 = arith.mulf %100, %110 : vector<2x128xf32>
    %121 = arith.addf %119, %120 : vector<2x128xf32>
    %122 = math.tanh %121 : vector<2x128xf32>
    %123 = arith.mulf %118, %122 : vector<2x128xf32>
    %124 = arith.truncf %123 : vector<2x128xf32> to vector<2x128xbf16>
    %125 = tpu.concatenate %124, %87 in 1 : vector<2x128xbf16>, vector<2x128xbf16> -> vector<2x256xbf16>
    %c0_45 = arith.constant 0 : index
    %c0_46 = arith.constant 0 : index
    %126 = vector.load %arg2[%c0_45, %c0_46] : memref<256x512xbf16, #tpu.memory_space<vmem>>, vector<256x512xbf16>
    %cst_47 = arith.constant dense<0.000000e+00> : vector<2x512xf32>
    %127 = tpu.matmul %125, %126, %cst_47 {dimension_numbers = #tpu.dot_dimension_numbers<[1], [0], [0], [1], [0, 0, 1, 1], [], []>} : vector<2x256xbf16>, vector<256x512xbf16>, vector<2x512xf32> -> vector<2x512xf32>
    %128 = arith.addf %127, %10 : vector<2x512xf32>
    %129 = vector.extract_strided_slice %128 {offsets = [0, 0], sizes = [2, 128], strides = [1, 1]} : vector<2x512xf32> to vector<2x128xf32>
    %cst_48 = arith.constant 5.000000e-01 : f32
    %130 = vector.broadcast %cst_48 : f32 to vector<2x128xf32>
    %131 = arith.mulf %130, %129 : vector<2x128xf32>
    %132 = math.tanh %131 : vector<2x128xf32>
    %cst_49 = arith.constant 5.000000e-01 : f32
    %133 = vector.broadcast %cst_49 : f32 to vector<2x128xf32>
    %134 = arith.mulf %133, %132 : vector<2x128xf32>
    %cst_50 = arith.constant 5.000000e-01 : f32
    %135 = vector.broadcast %cst_50 : f32 to vector<2x128xf32>
    %136 = arith.addf %134, %135 : vector<2x128xf32>
    %137 = vector.extract_strided_slice %128 {offsets = [0, 128], sizes = [2, 128], strides = [1, 1]} : vector<2x512xf32> to vector<2x128xf32>
    %cst_51 = arith.constant 5.000000e-01 : f32
    %138 = vector.broadcast %cst_51 : f32 to vector<2x128xf32>
    %139 = arith.mulf %138, %137 : vector<2x128xf32>
    %140 = math.tanh %139 : vector<2x128xf32>
    %cst_52 = arith.constant 5.000000e-01 : f32
    %141 = vector.broadcast %cst_52 : f32 to vector<2x128xf32>
    %142 = arith.mulf %141, %140 : vector<2x128xf32>
    %cst_53 = arith.constant 5.000000e-01 : f32
    %143 = vector.broadcast %cst_53 : f32 to vector<2x128xf32>
    %144 = arith.addf %142, %143 : vector<2x128xf32>
    %145 = vector.extract_strided_slice %128 {offsets = [0, 256], sizes = [2, 128], strides = [1, 1]} : vector<2x512xf32> to vector<2x128xf32>
    %146 = math.tanh %145 : vector<2x128xf32>
    %147 = vector.extract_strided_slice %128 {offsets = [0, 384], sizes = [2, 128], strides = [1, 1]} : vector<2x512xf32> to vector<2x128xf32>
    %cst_54 = arith.constant 5.000000e-01 : f32
    %148 = vector.broadcast %cst_54 : f32 to vector<2x128xf32>
    %149 = arith.mulf %148, %147 : vector<2x128xf32>
    %150 = math.tanh %149 : vector<2x128xf32>
    %cst_55 = arith.constant 5.000000e-01 : f32
    %151 = vector.broadcast %cst_55 : f32 to vector<2x128xf32>
    %152 = arith.mulf %151, %150 : vector<2x128xf32>
    %cst_56 = arith.constant 5.000000e-01 : f32
    %153 = vector.broadcast %cst_56 : f32 to vector<2x128xf32>
    %154 = arith.addf %152, %153 : vector<2x128xf32>
    %155 = arith.mulf %144, %84 : vector<2x128xf32>
    %156 = arith.mulf %136, %146 : vector<2x128xf32>
    %157 = arith.addf %155, %156 : vector<2x128xf32>
    %158 = math.tanh %157 : vector<2x128xf32>
    %159 = arith.mulf %154, %158 : vector<2x128xf32>
    %160 = arith.truncf %159 : vector<2x128xf32> to vector<2x128xbf16>
    %c2 = arith.constant 2 : index
    %c0_57 = arith.constant 0 : index
    %c0_58 = arith.constant 0 : index
    %161 = vector.load %arg0[%c2, %c0_57, %c0_58] : memref<8x2x512xf32, #tpu.memory_space<vmem>>, vector<1x2x512xf32>
    %162 = vector.shape_cast %161 : vector<1x2x512xf32> to vector<2x512xf32>
    %c0_59 = arith.constant 0 : index
    %c0_60 = arith.constant 0 : index
    %163 = vector.load %arg1[%c0_59, %c0_60] : memref<128x512xbf16, #tpu.memory_space<vmem>>, vector<128x512xbf16>
    %cst_61 = arith.constant dense<0.000000e+00> : vector<2x512xf32>
    %164 = tpu.matmul %124, %163, %cst_61 {dimension_numbers = #tpu.dot_dimension_numbers<[1], [0], [0], [1], [0, 0, 1, 1], [], []>} : vector<2x128xbf16>, vector<128x512xbf16>, vector<2x512xf32> -> vector<2x512xf32>
    %165 = arith.addf %162, %164 : vector<2x512xf32>
    %166 = vector.extract_strided_slice %165 {offsets = [0, 0], sizes = [2, 128], strides = [1, 1]} : vector<2x512xf32> to vector<2x128xf32>
    %cst_62 = arith.constant 5.000000e-01 : f32
    %167 = vector.broadcast %cst_62 : f32 to vector<2x128xf32>
    %168 = arith.mulf %167, %166 : vector<2x128xf32>
    %169 = math.tanh %168 : vector<2x128xf32>
    %cst_63 = arith.constant 5.000000e-01 : f32
    %170 = vector.broadcast %cst_63 : f32 to vector<2x128xf32>
    %171 = arith.mulf %170, %169 : vector<2x128xf32>
    %cst_64 = arith.constant 5.000000e-01 : f32
    %172 = vector.broadcast %cst_64 : f32 to vector<2x128xf32>
    %173 = arith.addf %171, %172 : vector<2x128xf32>
    %174 = vector.extract_strided_slice %165 {offsets = [0, 128], sizes = [2, 128], strides = [1, 1]} : vector<2x512xf32> to vector<2x128xf32>
    %cst_65 = arith.constant 5.000000e-01 : f32
    %175 = vector.broadcast %cst_65 : f32 to vector<2x128xf32>
    %176 = arith.mulf %175, %174 : vector<2x128xf32>
    %177 = math.tanh %176 : vector<2x128xf32>
    %cst_66 = arith.constant 5.000000e-01 : f32
    %178 = vector.broadcast %cst_66 : f32 to vector<2x128xf32>
    %179 = arith.mulf %178, %177 : vector<2x128xf32>
    %cst_67 = arith.constant 5.000000e-01 : f32
    %180 = vector.broadcast %cst_67 : f32 to vector<2x128xf32>
    %181 = arith.addf %179, %180 : vector<2x128xf32>
    %182 = vector.extract_strided_slice %165 {offsets = [0, 256], sizes = [2, 128], strides = [1, 1]} : vector<2x512xf32> to vector<2x128xf32>
    %183 = math.tanh %182 : vector<2x128xf32>
    %184 = vector.extract_strided_slice %165 {offsets = [0, 384], sizes = [2, 128], strides = [1, 1]} : vector<2x512xf32> to vector<2x128xf32>
    %cst_68 = arith.constant 5.000000e-01 : f32
    %185 = vector.broadcast %cst_68 : f32 to vector<2x128xf32>
    %186 = arith.mulf %185, %184 : vector<2x128xf32>
    %187 = math.tanh %186 : vector<2x128xf32>
    %cst_69 = arith.constant 5.000000e-01 : f32
    %188 = vector.broadcast %cst_69 : f32 to vector<2x128xf32>
    %189 = arith.mulf %188, %187 : vector<2x128xf32>
    %cst_70 = arith.constant 5.000000e-01 : f32
    %190 = vector.broadcast %cst_70 : f32 to vector<2x128xf32>
    %191 = arith.addf %189, %190 : vector<2x128xf32>
    %192 = arith.mulf %181, %121 : vector<2x128xf32>
    %193 = arith.mulf %173, %183 : vector<2x128xf32>
    %194 = arith.addf %192, %193 : vector<2x128xf32>
    %195 = math.tanh %194 : vector<2x128xf32>
    %196 = arith.mulf %191, %195 : vector<2x128xf32>
    %197 = arith.truncf %196 : vector<2x128xf32> to vector<2x128xbf16>
    %198 = tpu.concatenate %197, %160 in 1 : vector<2x128xbf16>, vector<2x128xbf16> -> vector<2x256xbf16>
    %c0_71 = arith.constant 0 : index
    %c0_72 = arith.constant 0 : index
    %199 = vector.load %arg2[%c0_71, %c0_72] : memref<256x512xbf16, #tpu.memory_space<vmem>>, vector<256x512xbf16>
    %cst_73 = arith.constant dense<0.000000e+00> : vector<2x512xf32>
    %200 = tpu.matmul %198, %199, %cst_73 {dimension_numbers = #tpu.dot_dimension_numbers<[1], [0], [0], [1], [0, 0, 1, 1], [], []>} : vector<2x256xbf16>, vector<256x512xbf16>, vector<2x512xf32> -> vector<2x512xf32>
    %201 = arith.addf %200, %10 : vector<2x512xf32>
    %202 = vector.extract_strided_slice %201 {offsets = [0, 0], sizes = [2, 128], strides = [1, 1]} : vector<2x512xf32> to vector<2x128xf32>
    %cst_74 = arith.constant 5.000000e-01 : f32
    %203 = vector.broadcast %cst_74 : f32 to vector<2x128xf32>
    %204 = arith.mulf %203, %202 : vector<2x128xf32>
    %205 = math.tanh %204 : vector<2x128xf32>
    %cst_75 = arith.constant 5.000000e-01 : f32
    %206 = vector.broadcast %cst_75 : f32 to vector<2x128xf32>
    %207 = arith.mulf %206, %205 : vector<2x128xf32>
    %cst_76 = arith.constant 5.000000e-01 : f32
    %208 = vector.broadcast %cst_76 : f32 to vector<2x128xf32>
    %209 = arith.addf %207, %208 : vector<2x128xf32>
    %210 = vector.extract_strided_slice %201 {offsets = [0, 128], sizes = [2, 128], strides = [1, 1]} : vector<2x512xf32> to vector<2x128xf32>
    %cst_77 = arith.constant 5.000000e-01 : f32
    %211 = vector.broadcast %cst_77 : f32 to vector<2x128xf32>
    %212 = arith.mulf %211, %210 : vector<2x128xf32>
    %213 = math.tanh %212 : vector<2x128xf32>
    %cst_78 = arith.constant 5.000000e-01 : f32
    %214 = vector.broadcast %cst_78 : f32 to vector<2x128xf32>
    %215 = arith.mulf %214, %213 : vector<2x128xf32>
    %cst_79 = arith.constant 5.000000e-01 : f32
    %216 = vector.broadcast %cst_79 : f32 to vector<2x128xf32>
    %217 = arith.addf %215, %216 : vector<2x128xf32>
    %218 = vector.extract_strided_slice %201 {offsets = [0, 256], sizes = [2, 128], strides = [1, 1]} : vector<2x512xf32> to vector<2x128xf32>
    %219 = math.tanh %218 : vector<2x128xf32>
    %220 = vector.extract_strided_slice %201 {offsets = [0, 384], sizes = [2, 128], strides = [1, 1]} : vector<2x512xf32> to vector<2x128xf32>
    %cst_80 = arith.constant 5.000000e-01 : f32
    %221 = vector.broadcast %cst_80 : f32 to vector<2x128xf32>
    %222 = arith.mulf %221, %220 : vector<2x128xf32>
    %223 = math.tanh %222 : vector<2x128xf32>
    %cst_81 = arith.constant 5.000000e-01 : f32
    %224 = vector.broadcast %cst_81 : f32 to vector<2x128xf32>
    %225 = arith.mulf %224, %223 : vector<2x128xf32>
    %cst_82 = arith.constant 5.000000e-01 : f32
    %226 = vector.broadcast %cst_82 : f32 to vector<2x128xf32>
    %227 = arith.addf %225, %226 : vector<2x128xf32>
    %228 = arith.mulf %217, %157 : vector<2x128xf32>
    %229 = arith.mulf %209, %219 : vector<2x128xf32>
    %230 = arith.addf %228, %229 : vector<2x128xf32>
    %231 = math.tanh %230 : vector<2x128xf32>
    %232 = arith.mulf %227, %231 : vector<2x128xf32>
    %233 = arith.truncf %232 : vector<2x128xf32> to vector<2x128xbf16>
    %c3 = arith.constant 3 : index
    %c0_83 = arith.constant 0 : index
    %c0_84 = arith.constant 0 : index
    %234 = vector.load %arg0[%c3, %c0_83, %c0_84] : memref<8x2x512xf32, #tpu.memory_space<vmem>>, vector<1x2x512xf32>
    %235 = vector.shape_cast %234 : vector<1x2x512xf32> to vector<2x512xf32>
    %c0_85 = arith.constant 0 : index
    %c0_86 = arith.constant 0 : index
    %236 = vector.load %arg1[%c0_85, %c0_86] : memref<128x512xbf16, #tpu.memory_space<vmem>>, vector<128x512xbf16>
    %cst_87 = arith.constant dense<0.000000e+00> : vector<2x512xf32>
    %237 = tpu.matmul %197, %236, %cst_87 {dimension_numbers = #tpu.dot_dimension_numbers<[1], [0], [0], [1], [0, 0, 1, 1], [], []>} : vector<2x128xbf16>, vector<128x512xbf16>, vector<2x512xf32> -> vector<2x512xf32>
    %238 = arith.addf %235, %237 : vector<2x512xf32>
    %239 = vector.extract_strided_slice %238 {offsets = [0, 0], sizes = [2, 128], strides = [1, 1]} : vector<2x512xf32> to vector<2x128xf32>
    %cst_88 = arith.constant 5.000000e-01 : f32
    %240 = vector.broadcast %cst_88 : f32 to vector<2x128xf32>
    %241 = arith.mulf %240, %239 : vector<2x128xf32>
    %242 = math.tanh %241 : vector<2x128xf32>
    %cst_89 = arith.constant 5.000000e-01 : f32
    %243 = vector.broadcast %cst_89 : f32 to vector<2x128xf32>
    %244 = arith.mulf %243, %242 : vector<2x128xf32>
    %cst_90 = arith.constant 5.000000e-01 : f32
    %245 = vector.broadcast %cst_90 : f32 to vector<2x128xf32>
    %246 = arith.addf %244, %245 : vector<2x128xf32>
    %247 = vector.extract_strided_slice %238 {offsets = [0, 128], sizes = [2, 128], strides = [1, 1]} : vector<2x512xf32> to vector<2x128xf32>
    %cst_91 = arith.constant 5.000000e-01 : f32
    %248 = vector.broadcast %cst_91 : f32 to vector<2x128xf32>
    %249 = arith.mulf %248, %247 : vector<2x128xf32>
    %250 = math.tanh %249 : vector<2x128xf32>
    %cst_92 = arith.constant 5.000000e-01 : f32
    %251 = vector.broadcast %cst_92 : f32 to vector<2x128xf32>
    %252 = arith.mulf %251, %250 : vector<2x128xf32>
    %cst_93 = arith.constant 5.000000e-01 : f32
    %253 = vector.broadcast %cst_93 : f32 to vector<2x128xf32>
    %254 = arith.addf %252, %253 : vector<2x128xf32>
    %255 = vector.extract_strided_slice %238 {offsets = [0, 256], sizes = [2, 128], strides = [1, 1]} : vector<2x512xf32> to vector<2x128xf32>
    %256 = math.tanh %255 : vector<2x128xf32>
    %257 = vector.extract_strided_slice %238 {offsets = [0, 384], sizes = [2, 128], strides = [1, 1]} : vector<2x512xf32> to vector<2x128xf32>
    %cst_94 = arith.constant 5.000000e-01 : f32
    %258 = vector.broadcast %cst_94 : f32 to vector<2x128xf32>
    %259 = arith.mulf %258, %257 : vector<2x128xf32>
    %260 = math.tanh %259 : vector<2x128xf32>
    %cst_95 = arith.constant 5.000000e-01 : f32
    %261 = vector.broadcast %cst_95 : f32 to vector<2x128xf32>
    %262 = arith.mulf %261, %260 : vector<2x128xf32>
    %cst_96 = arith.constant 5.000000e-01 : f32
    %263 = vector.broadcast %cst_96 : f32 to vector<2x128xf32>
    %264 = arith.addf %262, %263 : vector<2x128xf32>
    %265 = arith.mulf %254, %194 : vector<2x128xf32>
    %266 = arith.mulf %246, %256 : vector<2x128xf32>
    %267 = arith.addf %265, %266 : vector<2x128xf32>
    %268 = math.tanh %267 : vector<2x128xf32>
    %269 = arith.mulf %264, %268 : vector<2x128xf32>
    %270 = arith.truncf %269 : vector<2x128xf32> to vector<2x128xbf16>
    %271 = tpu.concatenate %270, %233 in 1 : vector<2x128xbf16>, vector<2x128xbf16> -> vector<2x256xbf16>
    %c0_97 = arith.constant 0 : index
    %c0_98 = arith.constant 0 : index
    %272 = vector.load %arg2[%c0_97, %c0_98] : memref<256x512xbf16, #tpu.memory_space<vmem>>, vector<256x512xbf16>
    %cst_99 = arith.constant dense<0.000000e+00> : vector<2x512xf32>
    %273 = tpu.matmul %271, %272, %cst_99 {dimension_numbers = #tpu.dot_dimension_numbers<[1], [0], [0], [1], [0, 0, 1, 1], [], []>} : vector<2x256xbf16>, vector<256x512xbf16>, vector<2x512xf32> -> vector<2x512xf32>
    %274 = arith.addf %273, %10 : vector<2x512xf32>
    %275 = vector.extract_strided_slice %274 {offsets = [0, 0], sizes = [2, 128], strides = [1, 1]} : vector<2x512xf32> to vector<2x128xf32>
    %cst_100 = arith.constant 5.000000e-01 : f32
    %276 = vector.broadcast %cst_100 : f32 to vector<2x128xf32>
    %277 = arith.mulf %276, %275 : vector<2x128xf32>
    %278 = math.tanh %277 : vector<2x128xf32>
    %cst_101 = arith.constant 5.000000e-01 : f32
    %279 = vector.broadcast %cst_101 : f32 to vector<2x128xf32>
    %280 = arith.mulf %279, %278 : vector<2x128xf32>
    %cst_102 = arith.constant 5.000000e-01 : f32
    %281 = vector.broadcast %cst_102 : f32 to vector<2x128xf32>
    %282 = arith.addf %280, %281 : vector<2x128xf32>
    %283 = vector.extract_strided_slice %274 {offsets = [0, 128], sizes = [2, 128], strides = [1, 1]} : vector<2x512xf32> to vector<2x128xf32>
    %cst_103 = arith.constant 5.000000e-01 : f32
    %284 = vector.broadcast %cst_103 : f32 to vector<2x128xf32>
    %285 = arith.mulf %284, %283 : vector<2x128xf32>
    %286 = math.tanh %285 : vector<2x128xf32>
    %cst_104 = arith.constant 5.000000e-01 : f32
    %287 = vector.broadcast %cst_104 : f32 to vector<2x128xf32>
    %288 = arith.mulf %287, %286 : vector<2x128xf32>
    %cst_105 = arith.constant 5.000000e-01 : f32
    %289 = vector.broadcast %cst_105 : f32 to vector<2x128xf32>
    %290 = arith.addf %288, %289 : vector<2x128xf32>
    %291 = vector.extract_strided_slice %274 {offsets = [0, 256], sizes = [2, 128], strides = [1, 1]} : vector<2x512xf32> to vector<2x128xf32>
    %292 = math.tanh %291 : vector<2x128xf32>
    %293 = vector.extract_strided_slice %274 {offsets = [0, 384], sizes = [2, 128], strides = [1, 1]} : vector<2x512xf32> to vector<2x128xf32>
    %cst_106 = arith.constant 5.000000e-01 : f32
    %294 = vector.broadcast %cst_106 : f32 to vector<2x128xf32>
    %295 = arith.mulf %294, %293 : vector<2x128xf32>
    %296 = math.tanh %295 : vector<2x128xf32>
    %cst_107 = arith.constant 5.000000e-01 : f32
    %297 = vector.broadcast %cst_107 : f32 to vector<2x128xf32>
    %298 = arith.mulf %297, %296 : vector<2x128xf32>
    %cst_108 = arith.constant 5.000000e-01 : f32
    %299 = vector.broadcast %cst_108 : f32 to vector<2x128xf32>
    %300 = arith.addf %298, %299 : vector<2x128xf32>
    %301 = arith.mulf %290, %230 : vector<2x128xf32>
    %302 = arith.mulf %282, %292 : vector<2x128xf32>
    %303 = arith.addf %301, %302 : vector<2x128xf32>
    %304 = math.tanh %303 : vector<2x128xf32>
    %305 = arith.mulf %300, %304 : vector<2x128xf32>
    %306 = arith.truncf %305 : vector<2x128xf32> to vector<2x128xbf16>
    %c4 = arith.constant 4 : index
    %c0_109 = arith.constant 0 : index
    %c0_110 = arith.constant 0 : index
    %307 = vector.load %arg0[%c4, %c0_109, %c0_110] : memref<8x2x512xf32, #tpu.memory_space<vmem>>, vector<1x2x512xf32>
    %308 = vector.shape_cast %307 : vector<1x2x512xf32> to vector<2x512xf32>
    %c0_111 = arith.constant 0 : index
    %c0_112 = arith.constant 0 : index
    %309 = vector.load %arg1[%c0_111, %c0_112] : memref<128x512xbf16, #tpu.memory_space<vmem>>, vector<128x512xbf16>
    %cst_113 = arith.constant dense<0.000000e+00> : vector<2x512xf32>
    %310 = tpu.matmul %270, %309, %cst_113 {dimension_numbers = #tpu.dot_dimension_numbers<[1], [0], [0], [1], [0, 0, 1, 1], [], []>} : vector<2x128xbf16>, vector<128x512xbf16>, vector<2x512xf32> -> vector<2x512xf32>
    %311 = arith.addf %308, %310 : vector<2x512xf32>
    %312 = vector.extract_strided_slice %311 {offsets = [0, 0], sizes = [2, 128], strides = [1, 1]} : vector<2x512xf32> to vector<2x128xf32>
    %cst_114 = arith.constant 5.000000e-01 : f32
    %313 = vector.broadcast %cst_114 : f32 to vector<2x128xf32>
    %314 = arith.mulf %313, %312 : vector<2x128xf32>
    %315 = math.tanh %314 : vector<2x128xf32>
    %cst_115 = arith.constant 5.000000e-01 : f32
    %316 = vector.broadcast %cst_115 : f32 to vector<2x128xf32>
    %317 = arith.mulf %316, %315 : vector<2x128xf32>
    %cst_116 = arith.constant 5.000000e-01 : f32
    %318 = vector.broadcast %cst_116 : f32 to vector<2x128xf32>
    %319 = arith.addf %317, %318 : vector<2x128xf32>
    %320 = vector.extract_strided_slice %311 {offsets = [0, 128], sizes = [2, 128], strides = [1, 1]} : vector<2x512xf32> to vector<2x128xf32>
    %cst_117 = arith.constant 5.000000e-01 : f32
    %321 = vector.broadcast %cst_117 : f32 to vector<2x128xf32>
    %322 = arith.mulf %321, %320 : vector<2x128xf32>
    %323 = math.tanh %322 : vector<2x128xf32>
    %cst_118 = arith.constant 5.000000e-01 : f32
    %324 = vector.broadcast %cst_118 : f32 to vector<2x128xf32>
    %325 = arith.mulf %324, %323 : vector<2x128xf32>
    %cst_119 = arith.constant 5.000000e-01 : f32
    %326 = vector.broadcast %cst_119 : f32 to vector<2x128xf32>
    %327 = arith.addf %325, %326 : vector<2x128xf32>
    %328 = vector.extract_strided_slice %311 {offsets = [0, 256], sizes = [2, 128], strides = [1, 1]} : vector<2x512xf32> to vector<2x128xf32>
    %329 = math.tanh %328 : vector<2x128xf32>
    %330 = vector.extract_strided_slice %311 {offsets = [0, 384], sizes = [2, 128], strides = [1, 1]} : vector<2x512xf32> to vector<2x128xf32>
    %cst_120 = arith.constant 5.000000e-01 : f32
    %331 = vector.broadcast %cst_120 : f32 to vector<2x128xf32>
    %332 = arith.mulf %331, %330 : vector<2x128xf32>
    %333 = math.tanh %332 : vector<2x128xf32>
    %cst_121 = arith.constant 5.000000e-01 : f32
    %334 = vector.broadcast %cst_121 : f32 to vector<2x128xf32>
    %335 = arith.mulf %334, %333 : vector<2x128xf32>
    %cst_122 = arith.constant 5.000000e-01 : f32
    %336 = vector.broadcast %cst_122 : f32 to vector<2x128xf32>
    %337 = arith.addf %335, %336 : vector<2x128xf32>
    %338 = arith.mulf %327, %267 : vector<2x128xf32>
    %339 = arith.mulf %319, %329 : vector<2x128xf32>
    %340 = arith.addf %338, %339 : vector<2x128xf32>
    %341 = math.tanh %340 : vector<2x128xf32>
    %342 = arith.mulf %337, %341 : vector<2x128xf32>
    %343 = arith.truncf %342 : vector<2x128xf32> to vector<2x128xbf16>
    %344 = tpu.concatenate %343, %306 in 1 : vector<2x128xbf16>, vector<2x128xbf16> -> vector<2x256xbf16>
    %c0_123 = arith.constant 0 : index
    %c0_124 = arith.constant 0 : index
    %345 = vector.load %arg2[%c0_123, %c0_124] : memref<256x512xbf16, #tpu.memory_space<vmem>>, vector<256x512xbf16>
    %cst_125 = arith.constant dense<0.000000e+00> : vector<2x512xf32>
    %346 = tpu.matmul %344, %345, %cst_125 {dimension_numbers = #tpu.dot_dimension_numbers<[1], [0], [0], [1], [0, 0, 1, 1], [], []>} : vector<2x256xbf16>, vector<256x512xbf16>, vector<2x512xf32> -> vector<2x512xf32>
    %347 = arith.addf %346, %10 : vector<2x512xf32>
    %348 = vector.extract_strided_slice %347 {offsets = [0, 0], sizes = [2, 128], strides = [1, 1]} : vector<2x512xf32> to vector<2x128xf32>
    %cst_126 = arith.constant 5.000000e-01 : f32
    %349 = vector.broadcast %cst_126 : f32 to vector<2x128xf32>
    %350 = arith.mulf %349, %348 : vector<2x128xf32>
    %351 = math.tanh %350 : vector<2x128xf32>
    %cst_127 = arith.constant 5.000000e-01 : f32
    %352 = vector.broadcast %cst_127 : f32 to vector<2x128xf32>
    %353 = arith.mulf %352, %351 : vector<2x128xf32>
    %cst_128 = arith.constant 5.000000e-01 : f32
    %354 = vector.broadcast %cst_128 : f32 to vector<2x128xf32>
    %355 = arith.addf %353, %354 : vector<2x128xf32>
    %356 = vector.extract_strided_slice %347 {offsets = [0, 128], sizes = [2, 128], strides = [1, 1]} : vector<2x512xf32> to vector<2x128xf32>
    %cst_129 = arith.constant 5.000000e-01 : f32
    %357 = vector.broadcast %cst_129 : f32 to vector<2x128xf32>
    %358 = arith.mulf %357, %356 : vector<2x128xf32>
    %359 = math.tanh %358 : vector<2x128xf32>
    %cst_130 = arith.constant 5.000000e-01 : f32
    %360 = vector.broadcast %cst_130 : f32 to vector<2x128xf32>
    %361 = arith.mulf %360, %359 : vector<2x128xf32>
    %cst_131 = arith.constant 5.000000e-01 : f32
    %362 = vector.broadcast %cst_131 : f32 to vector<2x128xf32>
    %363 = arith.addf %361, %362 : vector<2x128xf32>
    %364 = vector.extract_strided_slice %347 {offsets = [0, 256], sizes = [2, 128], strides = [1, 1]} : vector<2x512xf32> to vector<2x128xf32>
    %365 = math.tanh %364 : vector<2x128xf32>
    %366 = vector.extract_strided_slice %347 {offsets = [0, 384], sizes = [2, 128], strides = [1, 1]} : vector<2x512xf32> to vector<2x128xf32>
    %cst_132 = arith.constant 5.000000e-01 : f32
    %367 = vector.broadcast %cst_132 : f32 to vector<2x128xf32>
    %368 = arith.mulf %367, %366 : vector<2x128xf32>
    %369 = math.tanh %368 : vector<2x128xf32>
    %cst_133 = arith.constant 5.000000e-01 : f32
    %370 = vector.broadcast %cst_133 : f32 to vector<2x128xf32>
    %371 = arith.mulf %370, %369 : vector<2x128xf32>
    %cst_134 = arith.constant 5.000000e-01 : f32
    %372 = vector.broadcast %cst_134 : f32 to vector<2x128xf32>
    %373 = arith.addf %371, %372 : vector<2x128xf32>
    %374 = arith.mulf %363, %303 : vector<2x128xf32>
    %375 = arith.mulf %355, %365 : vector<2x128xf32>
    %376 = arith.addf %374, %375 : vector<2x128xf32>
    %377 = math.tanh %376 : vector<2x128xf32>
    %378 = arith.mulf %373, %377 : vector<2x128xf32>
    %379 = arith.truncf %378 : vector<2x128xf32> to vector<2x128xbf16>
    %c5 = arith.constant 5 : index
    %c0_135 = arith.constant 0 : index
    %c0_136 = arith.constant 0 : index
    %380 = vector.load %arg0[%c5, %c0_135, %c0_136] : memref<8x2x512xf32, #tpu.memory_space<vmem>>, vector<1x2x512xf32>
    %381 = vector.shape_cast %380 : vector<1x2x512xf32> to vector<2x512xf32>
    %c0_137 = arith.constant 0 : index
    %c0_138 = arith.constant 0 : index
    %382 = vector.load %arg1[%c0_137, %c0_138] : memref<128x512xbf16, #tpu.memory_space<vmem>>, vector<128x512xbf16>
    %cst_139 = arith.constant dense<0.000000e+00> : vector<2x512xf32>
    %383 = tpu.matmul %343, %382, %cst_139 {dimension_numbers = #tpu.dot_dimension_numbers<[1], [0], [0], [1], [0, 0, 1, 1], [], []>} : vector<2x128xbf16>, vector<128x512xbf16>, vector<2x512xf32> -> vector<2x512xf32>
    %384 = arith.addf %381, %383 : vector<2x512xf32>
    %385 = vector.extract_strided_slice %384 {offsets = [0, 0], sizes = [2, 128], strides = [1, 1]} : vector<2x512xf32> to vector<2x128xf32>
    %cst_140 = arith.constant 5.000000e-01 : f32
    %386 = vector.broadcast %cst_140 : f32 to vector<2x128xf32>
    %387 = arith.mulf %386, %385 : vector<2x128xf32>
    %388 = math.tanh %387 : vector<2x128xf32>
    %cst_141 = arith.constant 5.000000e-01 : f32
    %389 = vector.broadcast %cst_141 : f32 to vector<2x128xf32>
    %390 = arith.mulf %389, %388 : vector<2x128xf32>
    %cst_142 = arith.constant 5.000000e-01 : f32
    %391 = vector.broadcast %cst_142 : f32 to vector<2x128xf32>
    %392 = arith.addf %390, %391 : vector<2x128xf32>
    %393 = vector.extract_strided_slice %384 {offsets = [0, 128], sizes = [2, 128], strides = [1, 1]} : vector<2x512xf32> to vector<2x128xf32>
    %cst_143 = arith.constant 5.000000e-01 : f32
    %394 = vector.broadcast %cst_143 : f32 to vector<2x128xf32>
    %395 = arith.mulf %394, %393 : vector<2x128xf32>
    %396 = math.tanh %395 : vector<2x128xf32>
    %cst_144 = arith.constant 5.000000e-01 : f32
    %397 = vector.broadcast %cst_144 : f32 to vector<2x128xf32>
    %398 = arith.mulf %397, %396 : vector<2x128xf32>
    %cst_145 = arith.constant 5.000000e-01 : f32
    %399 = vector.broadcast %cst_145 : f32 to vector<2x128xf32>
    %400 = arith.addf %398, %399 : vector<2x128xf32>
    %401 = vector.extract_strided_slice %384 {offsets = [0, 256], sizes = [2, 128], strides = [1, 1]} : vector<2x512xf32> to vector<2x128xf32>
    %402 = math.tanh %401 : vector<2x128xf32>
    %403 = vector.extract_strided_slice %384 {offsets = [0, 384], sizes = [2, 128], strides = [1, 1]} : vector<2x512xf32> to vector<2x128xf32>
    %cst_146 = arith.constant 5.000000e-01 : f32
    %404 = vector.broadcast %cst_146 : f32 to vector<2x128xf32>
    %405 = arith.mulf %404, %403 : vector<2x128xf32>
    %406 = math.tanh %405 : vector<2x128xf32>
    %cst_147 = arith.constant 5.000000e-01 : f32
    %407 = vector.broadcast %cst_147 : f32 to vector<2x128xf32>
    %408 = arith.mulf %407, %406 : vector<2x128xf32>
    %cst_148 = arith.constant 5.000000e-01 : f32
    %409 = vector.broadcast %cst_148 : f32 to vector<2x128xf32>
    %410 = arith.addf %408, %409 : vector<2x128xf32>
    %411 = arith.mulf %400, %340 : vector<2x128xf32>
    %412 = arith.mulf %392, %402 : vector<2x128xf32>
    %413 = arith.addf %411, %412 : vector<2x128xf32>
    %414 = math.tanh %413 : vector<2x128xf32>
    %415 = arith.mulf %410, %414 : vector<2x128xf32>
    %416 = arith.truncf %415 : vector<2x128xf32> to vector<2x128xbf16>
    %417 = tpu.concatenate %416, %379 in 1 : vector<2x128xbf16>, vector<2x128xbf16> -> vector<2x256xbf16>
    %c0_149 = arith.constant 0 : index
    %c0_150 = arith.constant 0 : index
    %418 = vector.load %arg2[%c0_149, %c0_150] : memref<256x512xbf16, #tpu.memory_space<vmem>>, vector<256x512xbf16>
    %cst_151 = arith.constant dense<0.000000e+00> : vector<2x512xf32>
    %419 = tpu.matmul %417, %418, %cst_151 {dimension_numbers = #tpu.dot_dimension_numbers<[1], [0], [0], [1], [0, 0, 1, 1], [], []>} : vector<2x256xbf16>, vector<256x512xbf16>, vector<2x512xf32> -> vector<2x512xf32>
    %420 = arith.addf %419, %10 : vector<2x512xf32>
    %421 = vector.extract_strided_slice %420 {offsets = [0, 0], sizes = [2, 128], strides = [1, 1]} : vector<2x512xf32> to vector<2x128xf32>
    %cst_152 = arith.constant 5.000000e-01 : f32
    %422 = vector.broadcast %cst_152 : f32 to vector<2x128xf32>
    %423 = arith.mulf %422, %421 : vector<2x128xf32>
    %424 = math.tanh %423 : vector<2x128xf32>
    %cst_153 = arith.constant 5.000000e-01 : f32
    %425 = vector.broadcast %cst_153 : f32 to vector<2x128xf32>
    %426 = arith.mulf %425, %424 : vector<2x128xf32>
    %cst_154 = arith.constant 5.000000e-01 : f32
    %427 = vector.broadcast %cst_154 : f32 to vector<2x128xf32>
    %428 = arith.addf %426, %427 : vector<2x128xf32>
    %429 = vector.extract_strided_slice %420 {offsets = [0, 128], sizes = [2, 128], strides = [1, 1]} : vector<2x512xf32> to vector<2x128xf32>
    %cst_155 = arith.constant 5.000000e-01 : f32
    %430 = vector.broadcast %cst_155 : f32 to vector<2x128xf32>
    %431 = arith.mulf %430, %429 : vector<2x128xf32>
    %432 = math.tanh %431 : vector<2x128xf32>
    %cst_156 = arith.constant 5.000000e-01 : f32
    %433 = vector.broadcast %cst_156 : f32 to vector<2x128xf32>
    %434 = arith.mulf %433, %432 : vector<2x128xf32>
    %cst_157 = arith.constant 5.000000e-01 : f32
    %435 = vector.broadcast %cst_157 : f32 to vector<2x128xf32>
    %436 = arith.addf %434, %435 : vector<2x128xf32>
    %437 = vector.extract_strided_slice %420 {offsets = [0, 256], sizes = [2, 128], strides = [1, 1]} : vector<2x512xf32> to vector<2x128xf32>
    %438 = math.tanh %437 : vector<2x128xf32>
    %439 = vector.extract_strided_slice %420 {offsets = [0, 384], sizes = [2, 128], strides = [1, 1]} : vector<2x512xf32> to vector<2x128xf32>
    %cst_158 = arith.constant 5.000000e-01 : f32
    %440 = vector.broadcast %cst_158 : f32 to vector<2x128xf32>
    %441 = arith.mulf %440, %439 : vector<2x128xf32>
    %442 = math.tanh %441 : vector<2x128xf32>
    %cst_159 = arith.constant 5.000000e-01 : f32
    %443 = vector.broadcast %cst_159 : f32 to vector<2x128xf32>
    %444 = arith.mulf %443, %442 : vector<2x128xf32>
    %cst_160 = arith.constant 5.000000e-01 : f32
    %445 = vector.broadcast %cst_160 : f32 to vector<2x128xf32>
    %446 = arith.addf %444, %445 : vector<2x128xf32>
    %447 = arith.mulf %436, %376 : vector<2x128xf32>
    %448 = arith.mulf %428, %438 : vector<2x128xf32>
    %449 = arith.addf %447, %448 : vector<2x128xf32>
    %450 = math.tanh %449 : vector<2x128xf32>
    %451 = arith.mulf %446, %450 : vector<2x128xf32>
    %452 = arith.truncf %451 : vector<2x128xf32> to vector<2x128xbf16>
    %c6 = arith.constant 6 : index
    %c0_161 = arith.constant 0 : index
    %c0_162 = arith.constant 0 : index
    %453 = vector.load %arg0[%c6, %c0_161, %c0_162] : memref<8x2x512xf32, #tpu.memory_space<vmem>>, vector<1x2x512xf32>
    %454 = vector.shape_cast %453 : vector<1x2x512xf32> to vector<2x512xf32>
    %c0_163 = arith.constant 0 : index
    %c0_164 = arith.constant 0 : index
    %455 = vector.load %arg1[%c0_163, %c0_164] : memref<128x512xbf16, #tpu.memory_space<vmem>>, vector<128x512xbf16>
    %cst_165 = arith.constant dense<0.000000e+00> : vector<2x512xf32>
    %456 = tpu.matmul %416, %455, %cst_165 {dimension_numbers = #tpu.dot_dimension_numbers<[1], [0], [0], [1], [0, 0, 1, 1], [], []>} : vector<2x128xbf16>, vector<128x512xbf16>, vector<2x512xf32> -> vector<2x512xf32>
    %457 = arith.addf %454, %456 : vector<2x512xf32>
    %458 = vector.extract_strided_slice %457 {offsets = [0, 0], sizes = [2, 128], strides = [1, 1]} : vector<2x512xf32> to vector<2x128xf32>
    %cst_166 = arith.constant 5.000000e-01 : f32
    %459 = vector.broadcast %cst_166 : f32 to vector<2x128xf32>
    %460 = arith.mulf %459, %458 : vector<2x128xf32>
    %461 = math.tanh %460 : vector<2x128xf32>
    %cst_167 = arith.constant 5.000000e-01 : f32
    %462 = vector.broadcast %cst_167 : f32 to vector<2x128xf32>
    %463 = arith.mulf %462, %461 : vector<2x128xf32>
    %cst_168 = arith.constant 5.000000e-01 : f32
    %464 = vector.broadcast %cst_168 : f32 to vector<2x128xf32>
    %465 = arith.addf %463, %464 : vector<2x128xf32>
    %466 = vector.extract_strided_slice %457 {offsets = [0, 128], sizes = [2, 128], strides = [1, 1]} : vector<2x512xf32> to vector<2x128xf32>
    %cst_169 = arith.constant 5.000000e-01 : f32
    %467 = vector.broadcast %cst_169 : f32 to vector<2x128xf32>
    %468 = arith.mulf %467, %466 : vector<2x128xf32>
    %469 = math.tanh %468 : vector<2x128xf32>
    %cst_170 = arith.constant 5.000000e-01 : f32
    %470 = vector.broadcast %cst_170 : f32 to vector<2x128xf32>
    %471 = arith.mulf %470, %469 : vector<2x128xf32>
    %cst_171 = arith.constant 5.000000e-01 : f32
    %472 = vector.broadcast %cst_171 : f32 to vector<2x128xf32>
    %473 = arith.addf %471, %472 : vector<2x128xf32>
    %474 = vector.extract_strided_slice %457 {offsets = [0, 256], sizes = [2, 128], strides = [1, 1]} : vector<2x512xf32> to vector<2x128xf32>
    %475 = math.tanh %474 : vector<2x128xf32>
    %476 = vector.extract_strided_slice %457 {offsets = [0, 384], sizes = [2, 128], strides = [1, 1]} : vector<2x512xf32> to vector<2x128xf32>
    %cst_172 = arith.constant 5.000000e-01 : f32
    %477 = vector.broadcast %cst_172 : f32 to vector<2x128xf32>
    %478 = arith.mulf %477, %476 : vector<2x128xf32>
    %479 = math.tanh %478 : vector<2x128xf32>
    %cst_173 = arith.constant 5.000000e-01 : f32
    %480 = vector.broadcast %cst_173 : f32 to vector<2x128xf32>
    %481 = arith.mulf %480, %479 : vector<2x128xf32>
    %cst_174 = arith.constant 5.000000e-01 : f32
    %482 = vector.broadcast %cst_174 : f32 to vector<2x128xf32>
    %483 = arith.addf %481, %482 : vector<2x128xf32>
    %484 = arith.mulf %473, %413 : vector<2x128xf32>
    %485 = arith.mulf %465, %475 : vector<2x128xf32>
    %486 = arith.addf %484, %485 : vector<2x128xf32>
    %487 = math.tanh %486 : vector<2x128xf32>
    %488 = arith.mulf %483, %487 : vector<2x128xf32>
    %489 = arith.truncf %488 : vector<2x128xf32> to vector<2x128xbf16>
    %490 = tpu.concatenate %489, %452 in 1 : vector<2x128xbf16>, vector<2x128xbf16> -> vector<2x256xbf16>
    %c0_175 = arith.constant 0 : index
    %c0_176 = arith.constant 0 : index
    %491 = vector.load %arg2[%c0_175, %c0_176] : memref<256x512xbf16, #tpu.memory_space<vmem>>, vector<256x512xbf16>
    %cst_177 = arith.constant dense<0.000000e+00> : vector<2x512xf32>
    %492 = tpu.matmul %490, %491, %cst_177 {dimension_numbers = #tpu.dot_dimension_numbers<[1], [0], [0], [1], [0, 0, 1, 1], [], []>} : vector<2x256xbf16>, vector<256x512xbf16>, vector<2x512xf32> -> vector<2x512xf32>
    %493 = arith.addf %492, %10 : vector<2x512xf32>
    %494 = vector.extract_strided_slice %493 {offsets = [0, 0], sizes = [2, 128], strides = [1, 1]} : vector<2x512xf32> to vector<2x128xf32>
    %cst_178 = arith.constant 5.000000e-01 : f32
    %495 = vector.broadcast %cst_178 : f32 to vector<2x128xf32>
    %496 = arith.mulf %495, %494 : vector<2x128xf32>
    %497 = math.tanh %496 : vector<2x128xf32>
    %cst_179 = arith.constant 5.000000e-01 : f32
    %498 = vector.broadcast %cst_179 : f32 to vector<2x128xf32>
    %499 = arith.mulf %498, %497 : vector<2x128xf32>
    %cst_180 = arith.constant 5.000000e-01 : f32
    %500 = vector.broadcast %cst_180 : f32 to vector<2x128xf32>
    %501 = arith.addf %499, %500 : vector<2x128xf32>
    %502 = vector.extract_strided_slice %493 {offsets = [0, 128], sizes = [2, 128], strides = [1, 1]} : vector<2x512xf32> to vector<2x128xf32>
    %cst_181 = arith.constant 5.000000e-01 : f32
    %503 = vector.broadcast %cst_181 : f32 to vector<2x128xf32>
    %504 = arith.mulf %503, %502 : vector<2x128xf32>
    %505 = math.tanh %504 : vector<2x128xf32>
    %cst_182 = arith.constant 5.000000e-01 : f32
    %506 = vector.broadcast %cst_182 : f32 to vector<2x128xf32>
    %507 = arith.mulf %506, %505 : vector<2x128xf32>
    %cst_183 = arith.constant 5.000000e-01 : f32
    %508 = vector.broadcast %cst_183 : f32 to vector<2x128xf32>
    %509 = arith.addf %507, %508 : vector<2x128xf32>
    %510 = vector.extract_strided_slice %493 {offsets = [0, 256], sizes = [2, 128], strides = [1, 1]} : vector<2x512xf32> to vector<2x128xf32>
    %511 = math.tanh %510 : vector<2x128xf32>
    %512 = vector.extract_strided_slice %493 {offsets = [0, 384], sizes = [2, 128], strides = [1, 1]} : vector<2x512xf32> to vector<2x128xf32>
    %cst_184 = arith.constant 5.000000e-01 : f32
    %513 = vector.broadcast %cst_184 : f32 to vector<2x128xf32>
    %514 = arith.mulf %513, %512 : vector<2x128xf32>
    %515 = math.tanh %514 : vector<2x128xf32>
    %cst_185 = arith.constant 5.000000e-01 : f32
    %516 = vector.broadcast %cst_185 : f32 to vector<2x128xf32>
    %517 = arith.mulf %516, %515 : vector<2x128xf32>
    %cst_186 = arith.constant 5.000000e-01 : f32
    %518 = vector.broadcast %cst_186 : f32 to vector<2x128xf32>
    %519 = arith.addf %517, %518 : vector<2x128xf32>
    %520 = arith.mulf %509, %449 : vector<2x128xf32>
    %521 = arith.mulf %501, %511 : vector<2x128xf32>
    %522 = arith.addf %520, %521 : vector<2x128xf32>
    %523 = math.tanh %522 : vector<2x128xf32>
    %524 = arith.mulf %519, %523 : vector<2x128xf32>
    %525 = arith.truncf %524 : vector<2x128xf32> to vector<2x128xbf16>
    %c7 = arith.constant 7 : index
    %c0_187 = arith.constant 0 : index
    %c0_188 = arith.constant 0 : index
    %526 = vector.load %arg0[%c7, %c0_187, %c0_188] : memref<8x2x512xf32, #tpu.memory_space<vmem>>, vector<1x2x512xf32>
    %527 = vector.shape_cast %526 : vector<1x2x512xf32> to vector<2x512xf32>
    %c0_189 = arith.constant 0 : index
    %c0_190 = arith.constant 0 : index
    %528 = vector.load %arg1[%c0_189, %c0_190] : memref<128x512xbf16, #tpu.memory_space<vmem>>, vector<128x512xbf16>
    %cst_191 = arith.constant dense<0.000000e+00> : vector<2x512xf32>
    %529 = tpu.matmul %489, %528, %cst_191 {dimension_numbers = #tpu.dot_dimension_numbers<[1], [0], [0], [1], [0, 0, 1, 1], [], []>} : vector<2x128xbf16>, vector<128x512xbf16>, vector<2x512xf32> -> vector<2x512xf32>
    %530 = arith.addf %527, %529 : vector<2x512xf32>
    %531 = vector.extract_strided_slice %530 {offsets = [0, 0], sizes = [2, 128], strides = [1, 1]} : vector<2x512xf32> to vector<2x128xf32>
    %cst_192 = arith.constant 5.000000e-01 : f32
    %532 = vector.broadcast %cst_192 : f32 to vector<2x128xf32>
    %533 = arith.mulf %532, %531 : vector<2x128xf32>
    %534 = math.tanh %533 : vector<2x128xf32>
    %cst_193 = arith.constant 5.000000e-01 : f32
    %535 = vector.broadcast %cst_193 : f32 to vector<2x128xf32>
    %536 = arith.mulf %535, %534 : vector<2x128xf32>
    %cst_194 = arith.constant 5.000000e-01 : f32
    %537 = vector.broadcast %cst_194 : f32 to vector<2x128xf32>
    %538 = arith.addf %536, %537 : vector<2x128xf32>
    %539 = vector.extract_strided_slice %530 {offsets = [0, 128], sizes = [2, 128], strides = [1, 1]} : vector<2x512xf32> to vector<2x128xf32>
    %cst_195 = arith.constant 5.000000e-01 : f32
    %540 = vector.broadcast %cst_195 : f32 to vector<2x128xf32>
    %541 = arith.mulf %540, %539 : vector<2x128xf32>
    %542 = math.tanh %541 : vector<2x128xf32>
    %cst_196 = arith.constant 5.000000e-01 : f32
    %543 = vector.broadcast %cst_196 : f32 to vector<2x128xf32>
    %544 = arith.mulf %543, %542 : vector<2x128xf32>
    %cst_197 = arith.constant 5.000000e-01 : f32
    %545 = vector.broadcast %cst_197 : f32 to vector<2x128xf32>
    %546 = arith.addf %544, %545 : vector<2x128xf32>
    %547 = vector.extract_strided_slice %530 {offsets = [0, 256], sizes = [2, 128], strides = [1, 1]} : vector<2x512xf32> to vector<2x128xf32>
    %548 = math.tanh %547 : vector<2x128xf32>
    %549 = vector.extract_strided_slice %530 {offsets = [0, 384], sizes = [2, 128], strides = [1, 1]} : vector<2x512xf32> to vector<2x128xf32>
    %cst_198 = arith.constant 5.000000e-01 : f32
    %550 = vector.broadcast %cst_198 : f32 to vector<2x128xf32>
    %551 = arith.mulf %550, %549 : vector<2x128xf32>
    %552 = math.tanh %551 : vector<2x128xf32>
    %cst_199 = arith.constant 5.000000e-01 : f32
    %553 = vector.broadcast %cst_199 : f32 to vector<2x128xf32>
    %554 = arith.mulf %553, %552 : vector<2x128xf32>
    %cst_200 = arith.constant 5.000000e-01 : f32
    %555 = vector.broadcast %cst_200 : f32 to vector<2x128xf32>
    %556 = arith.addf %554, %555 : vector<2x128xf32>
    %557 = arith.mulf %546, %486 : vector<2x128xf32>
    %558 = arith.mulf %538, %548 : vector<2x128xf32>
    %559 = arith.addf %557, %558 : vector<2x128xf32>
    %560 = math.tanh %559 : vector<2x128xf32>
    %561 = arith.mulf %556, %560 : vector<2x128xf32>
    %562 = arith.truncf %561 : vector<2x128xf32> to vector<2x128xbf16>
    %563 = tpu.concatenate %562, %525 in 1 : vector<2x128xbf16>, vector<2x128xbf16> -> vector<2x256xbf16>
    %c0_201 = arith.constant 0 : index
    %c0_202 = arith.constant 0 : index
    %564 = vector.load %arg2[%c0_201, %c0_202] : memref<256x512xbf16, #tpu.memory_space<vmem>>, vector<256x512xbf16>
    %cst_203 = arith.constant dense<0.000000e+00> : vector<2x512xf32>
    %565 = tpu.matmul %563, %564, %cst_203 {dimension_numbers = #tpu.dot_dimension_numbers<[1], [0], [0], [1], [0, 0, 1, 1], [], []>} : vector<2x256xbf16>, vector<256x512xbf16>, vector<2x512xf32> -> vector<2x512xf32>
    %566 = arith.addf %565, %10 : vector<2x512xf32>
    %567 = vector.extract_strided_slice %566 {offsets = [0, 0], sizes = [2, 128], strides = [1, 1]} : vector<2x512xf32> to vector<2x128xf32>
    %cst_204 = arith.constant 5.000000e-01 : f32
    %568 = vector.broadcast %cst_204 : f32 to vector<2x128xf32>
    %569 = arith.mulf %568, %567 : vector<2x128xf32>
    %570 = math.tanh %569 : vector<2x128xf32>
    %cst_205 = arith.constant 5.000000e-01 : f32
    %571 = vector.broadcast %cst_205 : f32 to vector<2x128xf32>
    %572 = arith.mulf %571, %570 : vector<2x128xf32>
    %cst_206 = arith.constant 5.000000e-01 : f32
    %573 = vector.broadcast %cst_206 : f32 to vector<2x128xf32>
    %574 = arith.addf %572, %573 : vector<2x128xf32>
    %575 = vector.extract_strided_slice %566 {offsets = [0, 128], sizes = [2, 128], strides = [1, 1]} : vector<2x512xf32> to vector<2x128xf32>
    %cst_207 = arith.constant 5.000000e-01 : f32
    %576 = vector.broadcast %cst_207 : f32 to vector<2x128xf32>
    %577 = arith.mulf %576, %575 : vector<2x128xf32>
    %578 = math.tanh %577 : vector<2x128xf32>
    %cst_208 = arith.constant 5.000000e-01 : f32
    %579 = vector.broadcast %cst_208 : f32 to vector<2x128xf32>
    %580 = arith.mulf %579, %578 : vector<2x128xf32>
    %cst_209 = arith.constant 5.000000e-01 : f32
    %581 = vector.broadcast %cst_209 : f32 to vector<2x128xf32>
    %582 = arith.addf %580, %581 : vector<2x128xf32>
    %583 = vector.extract_strided_slice %566 {offsets = [0, 256], sizes = [2, 128], strides = [1, 1]} : vector<2x512xf32> to vector<2x128xf32>
    %584 = math.tanh %583 : vector<2x128xf32>
    %585 = vector.extract_strided_slice %566 {offsets = [0, 384], sizes = [2, 128], strides = [1, 1]} : vector<2x512xf32> to vector<2x128xf32>
    %cst_210 = arith.constant 5.000000e-01 : f32
    %586 = vector.broadcast %cst_210 : f32 to vector<2x128xf32>
    %587 = arith.mulf %586, %585 : vector<2x128xf32>
    %588 = math.tanh %587 : vector<2x128xf32>
    %cst_211 = arith.constant 5.000000e-01 : f32
    %589 = vector.broadcast %cst_211 : f32 to vector<2x128xf32>
    %590 = arith.mulf %589, %588 : vector<2x128xf32>
    %cst_212 = arith.constant 5.000000e-01 : f32
    %591 = vector.broadcast %cst_212 : f32 to vector<2x128xf32>
    %592 = arith.addf %590, %591 : vector<2x128xf32>
    %593 = arith.mulf %582, %522 : vector<2x128xf32>
    %594 = arith.mulf %574, %584 : vector<2x128xf32>
    %595 = arith.addf %593, %594 : vector<2x128xf32>
    %596 = math.tanh %595 : vector<2x128xf32>
    %597 = arith.mulf %592, %596 : vector<2x128xf32>
    %598 = arith.truncf %597 : vector<2x128xf32> to vector<2x128xbf16>
    %c0_i32_213 = arith.constant 0 : i32
    %599 = tpu.memref_slice %arg20[%c0_i32_213] : memref<4x!tpu.dma_semaphore, #tpu.memory_space<semaphore_mem>> -> memref<1x!tpu.dma_semaphore, #tpu.memory_space<semaphore_mem>>
    %600 = tpu.memref_squeeze %599 : memref<1x!tpu.dma_semaphore, #tpu.memory_space<semaphore_mem>> -> memref<!tpu.dma_semaphore, #tpu.memory_space<semaphore_mem>>
    tpu.wait_dma2 semaphore(%600 : memref<!tpu.dma_semaphore, #tpu.memory_space<semaphore_mem>>) src(%arg11 : memref<128x128xbf16, #tpu.memory_space<any>>) dst(%arg16 : memref<128x128xbf16, #tpu.memory_space<vmem>>)
    %c1_i32_214 = arith.constant 1 : i32
    %601 = tpu.memref_slice %arg20[%c1_i32_214] : memref<4x!tpu.dma_semaphore, #tpu.memory_space<semaphore_mem>> -> memref<1x!tpu.dma_semaphore, #tpu.memory_space<semaphore_mem>>
    %602 = tpu.memref_squeeze %601 : memref<1x!tpu.dma_semaphore, #tpu.memory_space<semaphore_mem>> -> memref<!tpu.dma_semaphore, #tpu.memory_space<semaphore_mem>>
    tpu.wait_dma2 semaphore(%602 : memref<!tpu.dma_semaphore, #tpu.memory_space<semaphore_mem>>) src(%arg12 : memref<256x384xbf16, #tpu.memory_space<any>>) dst(%arg17 : memref<256x384xbf16, #tpu.memory_space<vmem>>)
    %c2_i32_215 = arith.constant 2 : i32
    %603 = tpu.memref_slice %arg20[%c2_i32_215] : memref<4x!tpu.dma_semaphore, #tpu.memory_space<semaphore_mem>> -> memref<1x!tpu.dma_semaphore, #tpu.memory_space<semaphore_mem>>
    %604 = tpu.memref_squeeze %603 : memref<1x!tpu.dma_semaphore, #tpu.memory_space<semaphore_mem>> -> memref<!tpu.dma_semaphore, #tpu.memory_space<semaphore_mem>>
    tpu.wait_dma2 semaphore(%604 : memref<!tpu.dma_semaphore, #tpu.memory_space<semaphore_mem>>) src(%arg13 : memref<128x128xbf16, #tpu.memory_space<any>>) dst(%arg18 : memref<128x128xbf16, #tpu.memory_space<vmem>>)
    %c3_i32_216 = arith.constant 3 : i32
    %605 = tpu.memref_slice %arg20[%c3_i32_216] : memref<4x!tpu.dma_semaphore, #tpu.memory_space<semaphore_mem>> -> memref<1x!tpu.dma_semaphore, #tpu.memory_space<semaphore_mem>>
    %606 = tpu.memref_squeeze %605 : memref<1x!tpu.dma_semaphore, #tpu.memory_space<semaphore_mem>> -> memref<!tpu.dma_semaphore, #tpu.memory_space<semaphore_mem>>
    tpu.wait_dma2 semaphore(%606 : memref<!tpu.dma_semaphore, #tpu.memory_space<semaphore_mem>>) src(%arg14 : memref<384x128xbf16, #tpu.memory_space<any>>) dst(%arg19 : memref<384x128xbf16, #tpu.memory_space<vmem>>)
    %c0_217 = arith.constant 0 : index
    %c0_218 = arith.constant 0 : index
    %607 = vector.load %arg4[%c0_217, %c0_218] : memref<2x11xf32, #tpu.memory_space<vmem>>, vector<2x11xf32>
    %608 = arith.truncf %607 : vector<2x11xf32> to vector<2x11xbf16>
    %c0_219 = arith.constant 0 : index
    %c0_220 = arith.constant 0 : index
    %609 = vector.load %arg5[%c0_219, %c0_220] : memref<11x128xbf16, #tpu.memory_space<vmem>>, vector<11x128xbf16>
    %cst_221 = arith.constant dense<0.000000e+00> : vector<2x128xf32>
    %610 = tpu.matmul %608, %609, %cst_221 {dimension_numbers = #tpu.dot_dimension_numbers<[1], [0], [0], [1], [0, 0, 1, 1], [], []>} : vector<2x11xbf16>, vector<11x128xbf16>, vector<2x128xf32> -> vector<2x128xf32>
    %c0_222 = arith.constant 0 : index
    %c0_223 = arith.constant 0 : index
    %611 = vector.load %arg6[%c0_222, %c0_223] : memref<1x128xf32, #tpu.memory_space<vmem>>, vector<1x128xf32>
    %612 = vector.broadcast %611 : vector<1x128xf32> to vector<2x128xf32>
    %613 = arith.addf %610, %612 : vector<2x128xf32>
    %cst_224 = arith.constant 0.000000e+00 : f32
    %614 = vector.broadcast %cst_224 : f32 to vector<2x128xf32>
    %615 = arith.maximumf %613, %614 : vector<2x128xf32>
    %616 = arith.truncf %615 : vector<2x128xf32> to vector<2x128xbf16>
    %c0_225 = arith.constant 0 : index
    %c0_226 = arith.constant 0 : index
    %617 = vector.load %arg16[%c0_225, %c0_226] : memref<128x128xbf16, #tpu.memory_space<vmem>>, vector<128x128xbf16>
    %cst_227 = arith.constant dense<0.000000e+00> : vector<2x128xf32>
    %618 = tpu.matmul %616, %617, %cst_227 {dimension_numbers = #tpu.dot_dimension_numbers<[1], [0], [0], [1], [0, 0, 1, 1], [], []>} : vector<2x128xbf16>, vector<128x128xbf16>, vector<2x128xf32> -> vector<2x128xf32>
    %c0_228 = arith.constant 0 : index
    %c0_229 = arith.constant 0 : index
    %619 = vector.load %arg7[%c0_228, %c0_229] : memref<1x128xf32, #tpu.memory_space<vmem>>, vector<1x128xf32>
    %620 = vector.broadcast %619 : vector<1x128xf32> to vector<2x128xf32>
    %621 = arith.addf %618, %620 : vector<2x128xf32>
    %622 = arith.truncf %621 : vector<2x128xf32> to vector<2x128xbf16>
    %623 = tpu.concatenate %598, %622 in 1 : vector<2x128xbf16>, vector<2x128xbf16> -> vector<2x256xbf16>
    %c0_230 = arith.constant 0 : index
    %c0_231 = arith.constant 0 : index
    %624 = vector.load %arg17[%c0_230, %c0_231] : memref<256x384xbf16, #tpu.memory_space<vmem>>, vector<256x384xbf16>
    %cst_232 = arith.constant dense<0.000000e+00> : vector<2x384xf32>
    %625 = tpu.matmul %623, %624, %cst_232 {dimension_numbers = #tpu.dot_dimension_numbers<[1], [0], [0], [1], [0, 0, 1, 1], [], []>} : vector<2x256xbf16>, vector<256x384xbf16>, vector<2x384xf32> -> vector<2x384xf32>
    %c0_233 = arith.constant 0 : index
    %c0_234 = arith.constant 0 : index
    %626 = vector.load %arg8[%c0_233, %c0_234] : memref<1x384xf32, #tpu.memory_space<vmem>>, vector<1x384xf32>
    %627 = vector.broadcast %626 : vector<1x384xf32> to vector<2x384xf32>
    %628 = arith.addf %625, %627 : vector<2x384xf32>
    %cst_235 = arith.constant 0.000000e+00 : f32
    %629 = vector.broadcast %cst_235 : f32 to vector<2x384xf32>
    %630 = arith.maximumf %628, %629 : vector<2x384xf32>
    %631 = vector.extract_strided_slice %630 {offsets = [0, 0], sizes = [2, 128], strides = [1, 1]} : vector<2x384xf32> to vector<2x128xf32>
    %632 = vector.extract_strided_slice %630 {offsets = [0, 128], sizes = [2, 128], strides = [1, 1]} : vector<2x384xf32> to vector<2x128xf32>
    %633 = vector.extract_strided_slice %630 {offsets = [0, 256], sizes = [2, 128], strides = [1, 1]} : vector<2x384xf32> to vector<2x128xf32>
    %634 = arith.truncf %631 : vector<2x128xf32> to vector<2x128xbf16>
    %c0_236 = arith.constant 0 : index
    %c0_237 = arith.constant 0 : index
    %635 = vector.load %arg18[%c0_236, %c0_237] : memref<128x128xbf16, #tpu.memory_space<vmem>>, vector<128x128xbf16>
    %cst_238 = arith.constant dense<0.000000e+00> : vector<2x128xf32>
    %636 = tpu.matmul %634, %635, %cst_238 {dimension_numbers = #tpu.dot_dimension_numbers<[1], [0], [0], [1], [0, 0, 1, 1], [], []>} : vector<2x128xbf16>, vector<128x128xbf16>, vector<2x128xf32> -> vector<2x128xf32>
    %c0_239 = arith.constant 0 : index
    %c0_240 = arith.constant 0 : index
    %637 = vector.load %arg9[%c0_239, %c0_240] : memref<1x128xf32, #tpu.memory_space<vmem>>, vector<1x128xf32>
    %638 = vector.broadcast %637 : vector<1x128xf32> to vector<2x128xf32>
    %639 = arith.addf %636, %638 : vector<2x128xf32>
    %cst_241 = arith.constant 0.000000e+00 : f32
    %640 = vector.broadcast %cst_241 : f32 to vector<2x128xf32>
    %641 = arith.maximumf %639, %640 : vector<2x128xf32>
    %642 = arith.truncf %641 : vector<2x128xf32> to vector<2x128xbf16>
    %643 = arith.truncf %632 : vector<2x128xf32> to vector<2x128xbf16>
    %644 = arith.truncf %633 : vector<2x128xf32> to vector<2x128xbf16>
    %645 = tpu.concatenate %642, %643, %644 in 1 : vector<2x128xbf16>, vector<2x128xbf16>, vector<2x128xbf16> -> vector<2x384xbf16>
    %c0_242 = arith.constant 0 : index
    %c0_243 = arith.constant 0 : index
    %646 = vector.load %arg19[%c0_242, %c0_243] : memref<384x128xbf16, #tpu.memory_space<vmem>>, vector<384x128xbf16>
    %cst_244 = arith.constant dense<0.000000e+00> : vector<2x128xf32>
    %647 = tpu.matmul %645, %646, %cst_244 {dimension_numbers = #tpu.dot_dimension_numbers<[1], [0], [0], [1], [0, 0, 1, 1], [], []>} : vector<2x384xbf16>, vector<384x128xbf16>, vector<2x128xf32> -> vector<2x128xf32>
    %c0_245 = arith.constant 0 : index
    %c0_246 = arith.constant 0 : index
    %648 = vector.load %arg10[%c0_245, %c0_246] : memref<1x128xf32, #tpu.memory_space<vmem>>, vector<1x128xf32>
    %649 = vector.broadcast %648 : vector<1x128xf32> to vector<2x128xf32>
    %650 = arith.addf %647, %649 : vector<2x128xf32>
    %c0_247 = arith.constant 0 : index
    %c0_248 = arith.constant 0 : index
    %651 = vector.load %arg15[%c0_247, %c0_248] : memref<2x128xf32, #tpu.memory_space<vmem>>, vector<2x128xf32>
    tpu.vector_store %arg15[%c0_247, %c0_248], %650 {strides = array<i32>} : memref<2x128xf32, #tpu.memory_space<vmem>>, vector<2x128xf32>,
    return
  }
}

</mosaic_0001>

<bundles_post_ra>
// kernel: business_model_forward.1
= control target key start
LH: loop header
LB: loop body
LE: loop exit
PB: predicated region body
PF: predicated region fallthrough
CT: control target
= control target key end

     0   :  { %20 = vsyncpa [#allocation8], 0  ;;  %s3959_s18 = smov [#allocation7]   ;;  %s5984_s0 = inlined_call_operand.vmem [shape: f32[8,2,512], index: 0, kind: input, shape index: {}]   ;;  %s5985_s1 = inlined_call_operand.vmem [shape: bf16[128,512], index: 1, kind: input, shape index: {}]   ;;  %s5986_s2 = inlined_call_operand.hbm [shape: bf16[256,512], index: 2, kind: input, shape index: {}]   ;;  %s5987_s3 = inlined_call_operand.vmem [shape: f32[1,512], index: 3, kind: input, shape index: {}]   ;;  %s5988_s4 = inlined_call_operand.vmem [shape: f32[2,11], index: 4, kind: input, shape index: {}]   ;;  %s5989_s5 = inlined_call_operand.vmem [shape: bf16[11,128], index: 5, kind: input, shape index: {}]   ;;  %s5990_s6 = inlined_call_operand.vmem [shape: f32[1,128], index: 6, kind: input, shape index: {}]   ;;  %s5991_s7 = inlined_call_operand.vmem [shape: f32[1,128], index: 7, kind: input, shape index: {}]   ;;  %s5992_s8 = inlined_call_operand.vmem [shape: f32[1,384], index: 8, kind: input, shape index: {}]   ;;  %s5993_s9 = inlined_call_operand.vmem [shape: f32[1,128], index: 9, kind: input, shape index: {}]   ;;  %s5994_s10 = inlined_call_operand.vmem [shape: f32[1,128], index: 10, kind: input, shape index: {}]   ;;  %s5995_s11 = inlined_call_operand.hbm [shape: bf16[128,128], index: 11, kind: input, shape index: {}]   ;;  %s5996_s12 = inlined_call_operand.hbm [shape: bf16[256,384], index: 12, kind: input, shape index: {}]   ;;  %s5997_s13 = inlined_call_operand.hbm [shape: bf16[128,128], index: 13, kind: input, shape index: {}]   ;;  %s5998_s14 = inlined_call_operand.hbm [shape: bf16[384,128], index: 14, kind: input, shape index: {}]   ;;  %s5999_s15 = inlined_call_operand.vmem [shape: f32[2,128], index: 15, kind: output, shape index: {}]  }
   0x1   :  { %s30_s19 = sshll.u32 %s3959_s18, 4  ;;  %s3861_s22 = scalar_lea.hbm %s5986_s2, 8192  ;;  %s31_s19 = int_to_ptr.vmem [resolvable:$true] %s30_s19 }
   0x2   :  { %p3862_p0 = scmp.ne.s32.totalorder %s5986_s2, %s3861_s22  ;;  %p3865_p1 = scmp.lt.u32.totalorder %s3861_s22, %s5986_s2 }
   0x4   :  { %p3867_p2 = pnand %p3865_p1, %p3862_p0 }
   0x6   :  { %3870 = shalt.err (!%p3867_p2)
}
   0x7   :  { %s3871_s27 = scalar_lea.vmem %s31_s19, 8192  ;;  %p3876_p4 = scmp.lt.s32.totalorder %s31_s19, %s31_s19 }
   0x8   :  { %p3872_p3 = scmp.ne.s32.totalorder %s31_s19, %s3871_s27  ;;  %p3877_p5 = scmp.lt.s32.totalorder %s3871_s27, %s3871_s27 }
   0xa   :  { %p3878_p6 = por %p3877_p5, %p3876_p4 }
   0xc   :  { %p3879_p7 = pnand %p3878_p6, %p3872_p3 }
   0xe   :  { %3882 = shalt.err (!%p3879_p7)
}
   0xf   :  { %s3960_s28 = smov 256   ;;  %s3961_s29 = smov 16  }
  0x10   :  { %36 = dma.hbm_to_vmem [thread:$0]  %s5986_s2, 8192, %s31_s19, [#allocation8], %s3960_s28, %s3960_s28, %s3961_s29  }
  0x11   :  { %3949 = dma.done.wait [#allocation8], 8192  }
  0x12   :  { %3950 = vsyncadd [#allocation8], 4294959104  ;;  %s73_s17 = sld [smem:[#allocation0]]   ;;  %s3962_s18 = smov 384   ;;  %v6000_v0 = vmov 0  }
  0x13   :  { %85 = sst [smem:[#allocation14]] %s3962_s18  ;;  %375 = vmatprep.mubr.bf16.mxu0 %v6000_v0  ;;  %416 = vmatprep.mubr.bf16.mxu1 %v6000_v0  ;;  %s3964_s20 = smov 3  }
  0x14   :  { %87 = sst [smem:[#allocation14 + $0x1]] %s3962_s18  ;;  %s3965_s21 = smov 64  }
  0x15   :  { %89 = sst [smem:[#allocation14 + $0x2]] %s3964_s20  ;;  %s3966_s22 = smov 128  }
  0x16   :  { %91 = sst [smem:[#allocation14 + $0x3]] %s3965_s21  ;;  %s3967_s23 = smov 2  }
  0x17   :  { %93 = sst [smem:[#allocation14 + $0x4]] %s3966_s22  ;;  %s3968_s19 = smov 192  }
  0x18   :  { %95 = sst [smem:[#allocation14 + $0x5]] %s3967_s23  ;;  %s3089_s2 = sshll.u32 %s73_s17, 26 }
  0x19   :  { %97 = sst [smem:[#allocation14 + $0x6]] %s3968_s19  ;;  %s3090_s24 = sadd.s32 134217728, %s3089_s2 }
  0x1a   :  { %99 = sst [smem:[#allocation14 + $0x7]] %s3965_s21  ;;  %s3969_s25 = smov 4  }
  0x1b   :  { %101 = sst [smem:[#allocation14 + $0x8]] %s3969_s25  ;;  %s3970_s26 = smov [#allocation2]  }
  0x1c   :  { %s64_s27 = sshll.u32 %s3970_s26, 4  ;;  %s3971_s28 = smov [#allocation3]   ;;  %s65_s27 = int_to_ptr.vmem [resolvable:$true] %s64_s27 }
  0x1d   :  { %s81_s29 = sshll.u32 %s3971_s28, 4  ;;  %s3883_s18 = scalar_lea.hbm %s5995_s11, 1024  ;;  %s82_s29 = int_to_ptr.vmem [resolvable:$true] %s81_s29 }
  0x1e   :  { %p3884_p8 = scmp.ne.s32.totalorder %s5995_s11, %s3883_s18  ;;  %p3887_p9 = scmp.lt.u32.totalorder %s3883_s18, %s5995_s11 }
  0x20   :  { %p3889_p10 = pnand %p3887_p9, %p3884_p8 }
  0x22   :  { %3892 = shalt.err (!%p3889_p10)  }
  0x23   :  { %s3893_s21 = scalar_lea.vmem %s65_s27, 1024  ;;  %p3898_p12 = scmp.lt.s32.totalorder %s65_s27, %s65_s27 }
  0x24   :  { %p3894_p11 = scmp.ne.s32.totalorder %s65_s27, %s3893_s21  ;;  %p3899_p13 = scmp.lt.s32.totalorder %s3893_s21, %s3893_s21 }
  0x26   :  { %p3900_p0 = por %p3899_p13, %p3898_p12 }
  0x28   :  { %p3901_p1 = pnand %p3900_p0, %p3894_p11 }
  0x2a   :  { %3904 = shalt.err (!%p3901_p1)  }
  0x2b   :  { %67 = dma.hbm_to_vmem [thread:$0]  %s5995_s11, 1024, %s65_s27, [#allocation6] }
  0x2c   :  { %s3972_s25 = smov [#allocation6 + $0x1]   ;;  %s3973_s26 = smov [#allocation13]  }
  0x2d   :  { %103 = dma.general %s5996_s12, 6144, %s82_s29, %s3972_s25, %s3973_s26, [#allocation14], %s3090_s24, 0  }
  0x2e   :  { %v4092_v1 = vld [vmem:[%s5985_s1 + $0x4] ss:$16 sps:$4 sm:$0xff]   ;;  %v4097_v2 = vld [vmem:[%s5985_s1 + $0xc] ss:$16 sps:$4 sm:$0xff]   ;;  %v4103_v3 = vld [vmem:[%s5985_s1] ss:$16 sps:$4 sm:$0xff]  }
  0x2f   :  { %6292 = vst [vmem:[#allocation24_spill] sm:$0xff] %v4092_v1  ;;  %6293 = vst [vmem:[#allocation25_spill] sm:$0xff] %v4097_v2  ;;  %343 = vmatprep.subr.bf16.mxu0 %v4092_v1  ;;  %v4108_v4 = vld [vmem:[%s5985_s1 + $0x8] ss:$16 sps:$4 sm:$0xff]   ;;  %384 = vmatprep.subr.bf16.mxu1 %v4097_v2  ;;  %v4114_v5 = vld [vmem:[%s5985_s1 + $0x24] ss:$16 sps:$4 sm:$0xff]  }
  0x30   :  { %344 = vmatpush1.bf16.msra.mxu0 %v4103_v3  ;;  %385 = vmatpush1.bf16.msra.mxu1 %v4108_v4  ;;  %v4121_v6 = vld [vmem:[%s5985_s1 + $0x2c] ss:$16 sps:$4 sm:$0xff]   ;;  %v4126_v7 = vld [vmem:[%s5985_s1 + $0x20] ss:$16 sps:$4 sm:$0xff]   ;;  %v4132_v8 = vld [vmem:[%s5985_s1 + $0x28] ss:$16 sps:$4 sm:$0xff]  }
  0x31   :  { %345 = vmatprep.subr.bf16.mxu0 %v4114_v5  ;;  %386 = vmatprep.subr.bf16.mxu1 %v4121_v6  ;;  %v4138_v9 = vld [vmem:[%s5985_s1 + $0x44] ss:$16 sps:$4 sm:$0xff]   ;;  %v4143_v10 = vld [vmem:[%s5985_s1 + $0x4c] ss:$16 sps:$4 sm:$0xff]   ;;  %v4148_v11 = vld [vmem:[%s5985_s1 + $0x40] ss:$16 sps:$4 sm:$0xff]  }
  0x32   :  { %v4153_v12 = vld [vmem:[%s5985_s1 + $0x48] ss:$16 sps:$4 sm:$0xff]   ;;  %v4160_v13 = vld [vmem:[%s5985_s1 + $0x64] ss:$16 sps:$4 sm:$0xff]   ;;  %v4167_v14 = vld [vmem:[%s5985_s1 + $0x6c] ss:$16 sps:$4 sm:$0xff]  }
  0x33   :  { %v4172_v15 = vld [vmem:[%s5985_s1 + $0x60] ss:$16 sps:$4 sm:$0xff]   ;;  %v4179_v16 = vld [vmem:[%s5985_s1 + $0x68] ss:$16 sps:$4 sm:$0xff]   ;;  %v4184_v17 = vld [vmem:[%s5985_s1 + $0x84] ss:$16 sps:$4 sm:$0xff]  }
  0x34   :  { %346 = vmatpush1.bf16.msra.mxu0 %v4126_v7  ;;  %387 = vmatpush1.bf16.msra.mxu1 %v4132_v8  ;;  %v4191_v18 = vld [vmem:[%s5985_s1 + $0x8c] ss:$16 sps:$4 sm:$0xff]   ;;  %v4196_v19 = vld [vmem:[%s5985_s1 + $0x80] ss:$16 sps:$4 sm:$0xff]   ;;  %v4201_v20 = vld [vmem:[%s5985_s1 + $0x88] ss:$16 sps:$4 sm:$0xff]  }
  0x35   :  { %347 = vmatprep.subr.bf16.mxu0 %v4138_v9  ;;  %388 = vmatprep.subr.bf16.mxu1 %v4143_v10  ;;  %v4208_v21 = vld [vmem:[%s5985_s1 + $0xa4] ss:$16 sps:$4 sm:$0xff]   ;;  %v4215_v22 = vld [vmem:[%s5985_s1 + $0xac] ss:$16 sps:$4 sm:$0xff]   ;;  %v4220_v23 = vld [vmem:[%s5985_s1 + $0xa0] ss:$16 sps:$4 sm:$0xff]  }
  0x36   :  { %v4227_v24 = vld [vmem:[%s5985_s1 + $0xa8] ss:$16 sps:$4 sm:$0xff]   ;;  %v4232_v25 = vld [vmem:[%s5985_s1 + $0xc4] ss:$16 sps:$4 sm:$0xff]   ;;  %v4239_v26 = vld [vmem:[%s5985_s1 + $0xcc] ss:$16 sps:$4 sm:$0xff]  }
  0x37   :  { %v4244_v27 = vld [vmem:[%s5985_s1 + $0xc0] ss:$16 sps:$4 sm:$0xff]   ;;  %v4249_v28 = vld [vmem:[%s5985_s1 + $0xc8] ss:$16 sps:$4 sm:$0xff]   ;;  %v4256_v29 = vld [vmem:[%s5985_s1 + $0xe4] ss:$16 sps:$4 sm:$0xff]  }
  0x38   :  { %348 = vmatpush1.bf16.msra.mxu0 %v4148_v11  ;;  %389 = vmatpush1.bf16.msra.mxu1 %v4153_v12  ;;  %v4263_v30 = vld [vmem:[%s5985_s1 + $0xec] ss:$16 sps:$4 sm:$0xff]   ;;  %v4268_v31 = vld [vmem:[%s5985_s1 + $0xe0] ss:$16 sps:$4 sm:$0xff]   ;;  %v4275_v32 = vld [vmem:[%s5985_s1 + $0xe8] ss:$16 sps:$4 sm:$0xff]  }
  0x39   :  { %349 = vmatprep.subr.bf16.mxu0 %v4160_v13  ;;  %390 = vmatprep.subr.bf16.mxu1 %v4167_v14  ;;  %v4277_v33 = vld [vmem:[#allocation7 + $0x4] ss:$16 sps:$4 sm:$0xff]   ;;  %v4281_v34 = vld [vmem:[#allocation7 + $0xc] ss:$16 sps:$4 sm:$0xff]   ;;  %v4283_v35 = vld [vmem:[#allocation7] ss:$16 sps:$4 sm:$0xff]  }
  0x3a   :  { %v4285_v36 = vld [vmem:[#allocation7 + $0x8] ss:$16 sps:$4 sm:$0xff]   ;;  %v4289_v37 = vld [vmem:[#allocation7 + $0x24] ss:$16 sps:$4 sm:$0xff]   ;;  %v4293_v38 = vld [vmem:[#allocation7 + $0x2c] ss:$16 sps:$4 sm:$0xff]  }
  0x3b   :  { %v4295_v39 = vld [vmem:[#allocation7 + $0x20] ss:$16 sps:$4 sm:$0xff]   ;;  %v4297_v40 = vld [vmem:[#allocation7 + $0x28] ss:$16 sps:$4 sm:$0xff]   ;;  %v4301_v41 = vld [vmem:[#allocation7 + $0x44] ss:$16 sps:$4 sm:$0xff]  }
  0x3c   :  { %350 = vmatpush1.bf16.msra.mxu0 %v4172_v15  ;;  %391 = vmatpush1.bf16.msra.mxu1 %v4179_v16  ;;  %v4303_v42 = vld [vmem:[#allocation7 + $0x4c] ss:$16 sps:$4 sm:$0xff]   ;;  %v4309_v43 = vld [vmem:[#allocation7 + $0x40] ss:$16 sps:$4 sm:$0xff]   ;;  %v4311_v44 = vld [vmem:[#allocation7 + $0x48] ss:$16 sps:$4 sm:$0xff]  }
  0x3d   :  { %351 = vmatprep.subr.bf16.mxu0 %v4184_v17  ;;  %392 = vmatprep.subr.bf16.mxu1 %v4191_v18  ;;  %v4315_v45 = vld [vmem:[#allocation7 + $0x64] ss:$16 sps:$4 sm:$0xff]   ;;  %v4317_v46 = vld [vmem:[#allocation7 + $0x6c] ss:$16 sps:$4 sm:$0xff]   ;;  %v4323_v47 = vld [vmem:[#allocation7 + $0x60] ss:$16 sps:$4 sm:$0xff]  }
  0x3e   :  { %v4325_v48 = vld [vmem:[#allocation7 + $0x68] ss:$16 sps:$4 sm:$0xff]   ;;  %v4327_v49 = vld [vmem:[#allocation7 + $0x84] ss:$16 sps:$4 sm:$0xff]   ;;  %v4329_v50 = vld [vmem:[#allocation7 + $0x8c] ss:$16 sps:$4 sm:$0xff]  }
  0x3f   :  { %6294 = vst [vmem:[#allocation26_spill] sm:$0xff] %v4325_v48  ;;  %6295 = vst [vmem:[#allocation27_spill] sm:$0xff] %v4327_v49  ;;  %v4339_v51 = vld [vmem:[#allocation7 + $0x80] ss:$16 sps:$4 sm:$0xff]   ;;  %v4341_v52 = vld [vmem:[#allocation7 + $0x88] ss:$16 sps:$4 sm:$0xff]  }
  0x40   :  { %352 = vmatpush1.bf16.msra.mxu0 %v4196_v19  ;;  %393 = vmatpush1.bf16.msra.mxu1 %v4201_v20  ;;  %6296 = vst [vmem:[#allocation28_spill] sm:$0xff] %v4329_v50  ;;  %6297 = vst [vmem:[#allocation29_spill] sm:$0xff] %v4339_v51  ;;  %v4345_v53 = vld [vmem:[#allocation7 + $0xa4] ss:$16 sps:$4 sm:$0xff]   ;;  %v4347_v54 = vld [vmem:[#allocation7 + $0xac] ss:$16 sps:$4 sm:$0xff]  }
  0x41   :  { %353 = vmatprep.subr.bf16.mxu0 %v4208_v21  ;;  %394 = vmatprep.subr.bf16.mxu1 %v4215_v22  ;;  %6298 = vst [vmem:[#allocation30_spill] sm:$0xff] %v4341_v52  ;;  %6299 = vst [vmem:[#allocation31_spill] sm:$0xff] %v4345_v53  ;;  %v4349_v55 = vld [vmem:[#allocation7 + $0xa0] ss:$16 sps:$4 sm:$0xff]   ;;  %v4351_v56 = vld [vmem:[#allocation7 + $0xa8] ss:$16 sps:$4 sm:$0xff]  }
  0x42   :  { %6300 = vst [vmem:[#allocation32_spill] sm:$0xff] %v4347_v54  ;;  %6301 = vst [vmem:[#allocation33_spill] sm:$0xff] %v4349_v55  ;;  %v4357_v57 = vld [vmem:[#allocation7 + $0xc4] ss:$16 sps:$4 sm:$0xff]   ;;  %v4359_v58 = vld [vmem:[#allocation7 + $0xcc] ss:$16 sps:$4 sm:$0xff]  }
  0x43   :  { %6302 = vst [vmem:[#allocation34_spill] sm:$0xff] %v4351_v56  ;;  %6303 = vst [vmem:[#allocation35_spill] sm:$0xff] %v4357_v57  ;;  %v4361_v59 = vld [vmem:[#allocation7 + $0xc0] ss:$16 sps:$4 sm:$0xff]   ;;  %v4363_v60 = vld [vmem:[#allocation7 + $0xc8] ss:$16 sps:$4 sm:$0xff]  }
  0x44   :  { %354 = vmatpush1.bf16.msra.mxu0 %v4220_v23  ;;  %395 = vmatpush1.bf16.msra.mxu1 %v4227_v24  ;;  %6304 = vst [vmem:[#allocation36_spill] sm:$0xff] %v4359_v58  ;;  %6305 = vst [vmem:[#allocation37_spill] sm:$0xff] %v4361_v59  ;;  %v4369_v61 = vld [vmem:[#allocation7 + $0xe4] ss:$16 sps:$4 sm:$0xff]   ;;  %v4371_v62 = vld [vmem:[#allocation7 + $0xec] ss:$16 sps:$4 sm:$0xff]  }
  0x45   :  { %355 = vmatprep.subr.bf16.mxu0 %v4232_v25  ;;  %396 = vmatprep.subr.bf16.mxu1 %v4239_v26  ;;  %6306 = vst [vmem:[#allocation38_spill] sm:$0xff] %v4363_v60  ;;  %6307 = vst [vmem:[#allocation39_spill] sm:$0xff] %v4369_v61  ;;  %v4373_v63 = vld [vmem:[#allocation7 + $0xe0] ss:$16 sps:$4 sm:$0xff]   ;;  %s3976_s11 = smov [#allocation5]   ;;  %s3905_s12 = scalar_lea.hbm %s5997_s13, 1024 }
  0x46   :  { %6308 = vst [vmem:[#allocation40_spill] sm:$0xff] %v4371_v62  ;;  %6309 = vst [vmem:[#allocation41_spill] sm:$0xff] %v4373_v63  ;;  %s124_s27 = sshll.u32 %s3976_s11, 4  ;;  %p3906_p2 = scmp.ne.s32.totalorder %s5997_s13, %s3905_s12  ;;  %s125_s27 = int_to_ptr.vmem [resolvable:$true] %s124_s27 }
  0x47   :  { %p3909_p3 = scmp.lt.u32.totalorder %s3905_s12, %s5997_s13 }
  0x48   :  { %356 = vmatpush1.bf16.msra.mxu0 %v4244_v27  ;;  %397 = vmatpush1.bf16.msra.mxu1 %v4249_v28 }
  0x49   :  { %357 = vmatprep.subr.bf16.mxu0 %v4256_v29  ;;  %398 = vmatprep.subr.bf16.mxu1 %v4263_v30  ;;  %p3911_p4 = pnand %p3909_p3, %p3906_p2 }
  0x4c   :  { %358 = vmatpush1.bf16.msra.mxu0 %v4268_v31  ;;  %399 = vmatpush1.bf16.msra.mxu1 %v4275_v32 }
  0x4d   :  { %858 = vmatprep.subr.bf16.mxu0 %v4277_v33  ;;  %899 = vmatprep.subr.bf16.mxu1 %v4281_v34 }
  0x4f   :  { %376 = vmatmul.mubr.bf16.vlgmr.msra.gmra.mrb[0].mxu0 %v6000_v0  ;;  %417 = vmatmul.mubr.bf16.vlgmr.msra.gmra.mrb[0].mxu1 %v6000_v0 }
  0x50   :  { %859 = vmatpush1.bf16.msra.mxu0 %v4283_v35  ;;  %900 = vmatpush1.bf16.msra.mxu1 %v4285_v36 }
  0x51   :  { %860 = vmatprep.subr.bf16.mxu0 %v4289_v37  ;;  %901 = vmatprep.subr.bf16.mxu1 %v4293_v38 }
  0x52   :  { %890 = vmatprep.mubr.bf16.mxu0 %v6000_v0  ;;  %931 = vmatprep.mubr.bf16.mxu1 %v6000_v0  ;;  %v4375_v0 = vld [vmem:[#allocation7 + $0xe8] ss:$16 sps:$4 sm:$0xff]  }
  0x53   :  { %6310 = vst [vmem:[#allocation42_spill] sm:$0xff] %v4375_v0 }
  0x54   :  { %861 = vmatpush1.bf16.msra.mxu0 %v4295_v39  ;;  %902 = vmatpush1.bf16.msra.mxu1 %v4297_v40 }
  0x55   :  { %862 = vmatprep.subr.bf16.mxu0 %v4301_v41  ;;  %903 = vmatprep.subr.bf16.mxu1 %v4303_v42 }
  0x58   :  { %863 = vmatpush1.bf16.msra.mxu0 %v4309_v43  ;;  %904 = vmatpush1.bf16.msra.mxu1 %v4311_v44 }
  0x59   :  { %864 = vmatprep.subr.bf16.mxu0 %v4315_v45  ;;  %905 = vmatprep.subr.bf16.mxu1 %v4317_v46 }
  0x5c   :  { %865 = vmatpush1.bf16.msra.mxu0 %v4323_v47  ;;  %906 = vmatpush1.bf16.msra.mxu1 %v4325_v48 }
  0x5d   :  { %866 = vmatprep.subr.bf16.mxu0 %v4327_v49  ;;  %907 = vmatprep.subr.bf16.mxu1 %v4329_v50 }
  0x60   :  { %867 = vmatpush1.bf16.msra.mxu0 %v4339_v51  ;;  %908 = vmatpush1.bf16.msra.mxu1 %v4341_v52 }
  0x61   :  { %868 = vmatprep.subr.bf16.mxu0 %v4345_v53  ;;  %909 = vmatprep.subr.bf16.mxu1 %v4347_v54 }
  0x64   :  { %869 = vmatpush1.bf16.msra.mxu0 %v4349_v55  ;;  %910 = vmatpush1.bf16.msra.mxu1 %v4351_v56  ;;  %v4437_v56 = vld [vmem:[#allocation7 + $0x1a4] ss:$16 sps:$4 sm:$0xff]   ;;  %v4439_v55 = vld [vmem:[#allocation7 + $0x1ac] ss:$16 sps:$4 sm:$0xff]  }
  0x65   :  { %870 = vmatprep.subr.bf16.mxu0 %v4357_v57  ;;  %911 = vmatprep.subr.bf16.mxu1 %v4359_v58  ;;  %v4381_v58 = vld [vmem:[#allocation7 + $0x104] ss:$16 sps:$4 sm:$0xff]   ;;  %v4387_v57 = vld [vmem:[#allocation7 + $0x108] ss:$16 sps:$4 sm:$0xff]   ;;  %6331 = vst [vmem:[#allocation63_spill] sm:$0xff] %v4437_v56  ;;  %6332 = vst [vmem:[#allocation64_spill] sm:$0xff] %v4439_v55 }
  0x66   :  { %6311 = vst [vmem:[#allocation43_spill] sm:$0xff] %v4381_v58  ;;  %6314 = vst [vmem:[#allocation46_spill] sm:$0xff] %v4387_v57 }
  0x68   :  { %871 = vmatpush1.bf16.msra.mxu0 %v4361_v59  ;;  %912 = vmatpush1.bf16.msra.mxu1 %v4363_v60  ;;  %v4383_v59 = vld [vmem:[#allocation7 + $0x10c] ss:$16 sps:$4 sm:$0xff]   ;;  %v4385_v60 = vld [vmem:[#allocation7 + $0x100] ss:$16 sps:$4 sm:$0xff]  }
  0x69   :  { %872 = vmatprep.subr.bf16.mxu0 %v4369_v61  ;;  %913 = vmatprep.subr.bf16.mxu1 %v4371_v62  ;;  %6312 = vst [vmem:[#allocation44_spill] sm:$0xff] %v4383_v59  ;;  %6313 = vst [vmem:[#allocation45_spill] sm:$0xff] %v4385_v60  ;;  %v4393_v62 = vld [vmem:[#allocation7 + $0x124] ss:$16 sps:$4 sm:$0xff]   ;;  %v4399_v61 = vld [vmem:[#allocation7 + $0x128] ss:$16 sps:$4 sm:$0xff]  }
  0x6a   :  { %6315 = vst [vmem:[#allocation47_spill] sm:$0xff] %v4393_v62  ;;  %6318 = vst [vmem:[#allocation50_spill] sm:$0xff] %v4399_v61 }
  0x6c   :  { %873 = vmatpush1.bf16.msra.mxu0 %v4373_v63  ;;  %914 = vmatpush1.bf16.msra.mxu1 %v4375_v0  ;;  %v4395_v63 = vld [vmem:[#allocation7 + $0x12c] ss:$16 sps:$4 sm:$0xff]   ;;  %v4397_v0 = vld [vmem:[#allocation7 + $0x120] ss:$16 sps:$4 sm:$0xff]  }
  0x6d   :  { %874 = vmatprep.subr.bf16.mxu0 %v4381_v58  ;;  %915 = vmatprep.subr.bf16.mxu1 %v4383_v59  ;;  %6316 = vst [vmem:[#allocation48_spill] sm:$0xff] %v4395_v63  ;;  %6317 = vst [vmem:[#allocation49_spill] sm:$0xff] %v4397_v0  ;;  %v4405_v59 = vld [vmem:[#allocation7 + $0x144] ss:$16 sps:$4 sm:$0xff]   ;;  %v4411_v58 = vld [vmem:[#allocation7 + $0x148] ss:$16 sps:$4 sm:$0xff]  }
  0x6e   :  { %6319 = vst [vmem:[#allocation51_spill] sm:$0xff] %v4405_v59  ;;  %6322 = vst [vmem:[#allocation54_spill] sm:$0xff] %v4411_v58 }
  0x70   :  { %875 = vmatpush1.bf16.msra.mxu0 %v4385_v60  ;;  %916 = vmatpush1.bf16.msra.mxu1 %v4387_v57  ;;  %v4407_v60 = vld [vmem:[#allocation7 + $0x14c] ss:$16 sps:$4 sm:$0xff]   ;;  %v4409_v57 = vld [vmem:[#allocation7 + $0x140] ss:$16 sps:$4 sm:$0xff]  }
  0x71   :  { %876 = vmatprep.subr.bf16.mxu0 %v4393_v62  ;;  %917 = vmatprep.subr.bf16.mxu1 %v4395_v63  ;;  %6320 = vst [vmem:[#allocation52_spill] sm:$0xff] %v4407_v60  ;;  %6321 = vst [vmem:[#allocation53_spill] sm:$0xff] %v4409_v57  ;;  %v4417_v63 = vld [vmem:[#allocation7 + $0x164] ss:$16 sps:$4 sm:$0xff]   ;;  %v4423_v62 = vld [vmem:[#allocation7 + $0x168] ss:$16 sps:$4 sm:$0xff]  }
  0x72   :  { %6323 = vst [vmem:[#allocation55_spill] sm:$0xff] %v4417_v63  ;;  %6326 = vst [vmem:[#allocation58_spill] sm:$0xff] %v4423_v62 }
  0x74   :  { %877 = vmatpush1.bf16.msra.mxu0 %v4397_v0  ;;  %918 = vmatpush1.bf16.msra.mxu1 %v4399_v61  ;;  %v4419_v0 = vld [vmem:[#allocation7 + $0x16c] ss:$16 sps:$4 sm:$0xff]   ;;  %v4421_v61 = vld [vmem:[#allocation7 + $0x160] ss:$16 sps:$4 sm:$0xff]  }
  0x75   :  { %878 = vmatprep.subr.bf16.mxu0 %v4405_v59  ;;  %919 = vmatprep.subr.bf16.mxu1 %v4407_v60  ;;  %6324 = vst [vmem:[#allocation56_spill] sm:$0xff] %v4419_v0  ;;  %6325 = vst [vmem:[#allocation57_spill] sm:$0xff] %v4421_v61  ;;  %v4429_v60 = vld [vmem:[#allocation7 + $0x184] ss:$16 sps:$4 sm:$0xff]   ;;  %v4435_v59 = vld [vmem:[#allocation7 + $0x188] ss:$16 sps:$4 sm:$0xff]  }
  0x76   :  { %6327 = vst [vmem:[#allocation59_spill] sm:$0xff] %v4429_v60  ;;  %6330 = vst [vmem:[#allocation62_spill] sm:$0xff] %v4435_v59 }
  0x78   :  { %879 = vmatpush1.bf16.msra.mxu0 %v4409_v57  ;;  %920 = vmatpush1.bf16.msra.mxu1 %v4411_v58  ;;  %v4431_v57 = vld [vmem:[#allocation7 + $0x18c] ss:$16 sps:$4 sm:$0xff]   ;;  %v4433_v58 = vld [vmem:[#allocation7 + $0x180] ss:$16 sps:$4 sm:$0xff]  }
  0x79   :  { %880 = vmatprep.subr.bf16.mxu0 %v4417_v63  ;;  %921 = vmatprep.subr.bf16.mxu1 %v4419_v0  ;;  %6328 = vst [vmem:[#allocation60_spill] sm:$0xff] %v4431_v57  ;;  %6329 = vst [vmem:[#allocation61_spill] sm:$0xff] %v4433_v58  ;;  %v4451_v0 = vld [vmem:[#allocation7 + $0x1c4] ss:$16 sps:$4 sm:$0xff]   ;;  %v4453_v63 = vld [vmem:[#allocation7 + $0x1cc] ss:$16 sps:$4 sm:$0xff]  }
  0x7a   :  { %6335 = vst [vmem:[#allocation67_spill] sm:$0xff] %v4451_v0  ;;  %6336 = vst [vmem:[#allocation68_spill] sm:$0xff] %v4453_v63 }
  0x7c   :  { %881 = vmatpush1.bf16.msra.mxu0 %v4421_v61  ;;  %922 = vmatpush1.bf16.msra.mxu1 %v4423_v62  ;;  %v4445_v62 = vld [vmem:[#allocation7 + $0x1a0] ss:$16 sps:$4 sm:$0xff]   ;;  %v4447_v61 = vld [vmem:[#allocation7 + $0x1a8] ss:$16 sps:$4 sm:$0xff]  }
  0x7d   :  { %882 = vmatprep.subr.bf16.mxu0 %v4429_v60  ;;  %923 = vmatprep.subr.bf16.mxu1 %v4431_v57  ;;  %6333 = vst [vmem:[#allocation65_spill] sm:$0xff] %v4445_v62  ;;  %6334 = vst [vmem:[#allocation66_spill] sm:$0xff] %v4447_v61  ;;  %v4457_v57 = vld [vmem:[#allocation7 + $0x1c0] ss:$16 sps:$4 sm:$0xff]  }
  0x7e   :  { %6337 = vst [vmem:[#allocation69_spill] sm:$0xff] %v4457_v57 }
  0x80   :  { %883 = vmatpush1.bf16.msra.mxu0 %v4433_v58  ;;  %924 = vmatpush1.bf16.msra.mxu1 %v4435_v59  ;;  %v4459_v58 = vld [vmem:[#allocation7 + $0x1c8] ss:$16 sps:$4 sm:$0xff]   ;;  %v4463_v59 = vld [vmem:[#allocation7 + $0x1e4] ss:$16 sps:$4 sm:$0xff]  }
  0x81   :  { %884 = vmatprep.subr.bf16.mxu0 %v4437_v56  ;;  %925 = vmatprep.subr.bf16.mxu1 %v4439_v55  ;;  %6338 = vst [vmem:[#allocation70_spill] sm:$0xff] %v4459_v58  ;;  %6339 = vst [vmem:[#allocation71_spill] sm:$0xff] %v4463_v59  ;;  %v4465_v56 = vld [vmem:[#allocation7 + $0x1ec] ss:$16 sps:$4 sm:$0xff]   ;;  %v4469_v55 = vld [vmem:[#allocation7 + $0x1e0] ss:$16 sps:$4 sm:$0xff]  }
  0x82   :  { %6340 = vst [vmem:[#allocation72_spill] sm:$0xff] %v4465_v56  ;;  %6341 = vst [vmem:[#allocation73_spill] sm:$0xff] %v4469_v55 }
  0x84   :  { %885 = vmatpush1.bf16.msra.mxu0 %v4445_v62  ;;  %926 = vmatpush1.bf16.msra.mxu1 %v4447_v61  ;;  %v4471_v62 = vld [vmem:[#allocation7 + $0x1e8] ss:$16 sps:$4 sm:$0xff]  }
  0x85   :  { %886 = vmatprep.subr.bf16.mxu0 %v4451_v0  ;;  %927 = vmatprep.subr.bf16.mxu1 %v4453_v63  ;;  %6342 = vst [vmem:[#allocation74_spill] sm:$0xff] %v4471_v62  ;;  %v130_v63 = vlaneseq }
  0x88   :  { %887 = vmatpush1.bf16.msra.mxu0 %v4457_v57  ;;  %928 = vmatpush1.bf16.msra.mxu1 %v4459_v58  ;;  %v3974_v57 = vmov 1983009808   ;;  %v4479_v58 = vshrl.u32 %v130_v63, 7 }
  0x89   :  { %888 = vmatprep.subr.bf16.mxu0 %v4463_v59  ;;  %929 = vmatprep.subr.bf16.mxu1 %v4465_v56  ;;  %v432_v0 = vunpack.c.l.s4 %v3974_v57 }
  0x8a   :  { %6343 = vst [vmem:[#allocation75_spill] sm:$0xff] %v4479_v58 }
  0x8b   :  { %v433_v61 = vunpack.c.0.s8 %v432_v0  ;;  %v150_v0 = vld [vmem:[%s5984_s0] sm:$0xff] }
  0x8c   :  { %889 = vmatpush1.bf16.msra.mxu0 %v4469_v55  ;;  %930 = vmatpush1.bf16.msra.mxu1 %v4471_v62 }
  0x8d   :  { %961 = vmatprep.subr.bf16.mxu0 %v4092_v1  ;;  %1002 = vmatprep.subr.bf16.mxu1 %v4097_v2  ;;  %v4482_v59 = vsub.s32 %v433_v61, %v4479_v58 }
  0x8f   :  { %6344 = vst [vmem:[#allocation76_spill] sm:$0xff] %v4482_v59 }
 0x122   :  { %v377_v60 = vpop.f32.mrb[0].mxu0  ;;  %v418_v54 = vpop.f32.mrb[0].mxu1 }
 0x123   :  { %v379_v56 = vpop.f32.mrb[1].mxu0  ;;  %v420_v53 = vpop.f32.mrb[1].mxu1 }
 0x124   :  { %v429_v55 = vcombine.low %v377_v60, %v379_v56  ;;  %v430_v52 = vcombine.low %v418_v54, %v420_v53  ;;  %v381_v62 = vpop.f32.mrb[2].mxu0  ;;  %v422_v51 = vpop.f32.mrb[2].mxu1 }
 0x125   :  { %v382_v1 = vpop.f32.mrb[3].mxu0  ;;  %v423_v50 = vpop.f32.mrb[3].mxu1 }
 0x126   :  { %v437_v2 = vrot.slane %v429_v55, %v4482_v59  ;;  %v444_v57 = vrot.slane %v430_v52, %v4482_v59 }
 0x128   :  { %v445_v63 = vcombine.low %v437_v2, %v444_v57 }
 0x12a   :  { %v447_v49 = vadd.f32 %v445_v63, %v150_v0 }
 0x12c   :  { %v448_v61 = vmul.f32 0.5, %v447_v49  ;;  %v453_v58 = vrot.slane %v447_v49, 2  ;;  %v459_v53 = vrot.slane %v447_v49, 4  ;;  %v462_v54 = vrot.slane %v447_v49, 6 }
 0x12e   :  { %3508 = vtanh.f32 %v448_v61  ;;  %v455_v48 = vmul.f32 0.5, %v453_v58  ;;  %v464_v1 = vmul.f32 0.5, %v462_v54  ;;  %v6358_v54 = vld [vmem:[#allocation38_spill] sm:$0xff] }
 0x130   :  { %3510 = vtanh.f32 %v455_v48 }
 0x131   :  { %3512 = vtanh.f32 %v459_v53  ;;  %v6357_v53 = vld [vmem:[#allocation37_spill] sm:$0xff] }
 0x132   :  { %3514 = vtanh.f32 %v464_v1  ;;  %v6359_v1 = vld [vmem:[#allocation39_spill] sm:$0xff] }
 0x138   :  { %v3509_v50 = vpop.eup %3508 }
 0x139   :  { %v450_v51 = vmul.f32 0.5, %v3509_v50  ;;  %v6360_v50 = vld [vmem:[#allocation40_spill] sm:$0xff] }
 0x13a   :  { %v3511_v55 = vpop.eup %3510 }
 0x13b   :  { %v451_v56 = vadd.f32 0.5, %v450_v51  ;;  %v457_v52 = vmul.f32 0.5, %v3511_v55  ;;  %v3513_v62 = vpop.eup %3512  ;;  %v6361_v51 = vld [vmem:[#allocation41_spill] sm:$0xff]  ;;  %v6362_v55 = vld [vmem:[#allocation42_spill] sm:$0xff] }
 0x13c   :  { %v3515_v58 = vpop.eup %3514 }
 0x13d   :  { %v458_v60 = vadd.f32 0.5, %v457_v52  ;;  %v469_v2 = vmul.f32 %v3513_v62, %v451_v56  ;;  %v466_v48 = vmul.f32 0.5, %v3515_v58  ;;  %v6363_v56 = vld [vmem:[#allocation43_spill] sm:$0xff]  ;;  %v6364_v52 = vld [vmem:[#allocation44_spill] sm:$0xff]  ;;  %v6366_v62 = vld [vmem:[#allocation46_spill] sm:$0xff] }
 0x13e   :  { %v6368_v58 = vld [vmem:[#allocation48_spill] sm:$0xff] }
 0x13f   :  { %v468_v59 = vmul.f32 0.0, %v458_v60  ;;  %v467_v0 = vadd.f32 0.5, %v466_v48  ;;  %v6365_v60 = vld [vmem:[#allocation45_spill] sm:$0xff] }
 0x140   :  { %v6369_v48 = vld [vmem:[#allocation49_spill] sm:$0xff] }
 0x141   :  { %v4489_v57 = vadd.f32 %v469_v2, %v468_v59  ;;  %v6345_v59 = vmov 0   ;;  %v6367_v2 = vld [vmem:[#allocation47_spill] sm:$0xff] }
 0x143   :  { %3516 = vtanh.f32 %v4489_v57 }
 0x14d   :  { %v3517_v49 = vpop.eup %3516 }
 0x14e   :  { %v472_v63 = vmul.f32 %v3517_v49, %v467_v0  ;;  %v6370_v0 = vld [vmem:[#allocation50_spill] sm:$0xff]  ;;  %v6371_v49 = vld [vmem:[#allocation51_spill] sm:$0xff] }
 0x150   :  { %v473_v61 = vpack.c.bf16 %v472_v63, %v472_v63  ;;  %v6372_v63 = vld [vmem:[#allocation52_spill] sm:$0xff] }
 0x152   :  { %891 = vmatmul.mubr.bf16.vlgmr.msra.gmra.mrb[4].mxu0 %v473_v61  ;;  %932 = vmatmul.mubr.bf16.vlgmr.msra.gmra.mrb[4].mxu1 %v473_v61 }
 0x153   :  { %962 = vmatpush1.bf16.msra.mxu0 %v4103_v3  ;;  %1003 = vmatpush1.bf16.msra.mxu1 %v4108_v4  ;;  %v6346_v3 = vld [vmem:[#allocation26_spill] sm:$0xff]  ;;  %v6347_v4 = vld [vmem:[#allocation27_spill] sm:$0xff] }
 0x154   :  { %963 = vmatprep.subr.bf16.mxu0 %v4114_v5  ;;  %1004 = vmatprep.subr.bf16.mxu1 %v4121_v6  ;;  %v6348_v5 = vld [vmem:[#allocation28_spill] sm:$0xff]  ;;  %v6349_v6 = vld [vmem:[#allocation29_spill] sm:$0xff] }
 0x155   :  { %993 = vmatprep.mubr.bf16.mxu0 %v6345_v59  ;;  %1034 = vmatprep.mubr.bf16.mxu1 %v6345_v59 }
 0x157   :  { %964 = vmatpush1.bf16.msra.mxu0 %v4126_v7  ;;  %1005 = vmatpush1.bf16.msra.mxu1 %v4132_v8  ;;  %v6350_v7 = vld [vmem:[#allocation30_spill] sm:$0xff]  ;;  %v6351_v8 = vld [vmem:[#allocation31_spill] sm:$0xff] }
 0x158   :  { %965 = vmatprep.subr.bf16.mxu0 %v4138_v9  ;;  %1006 = vmatprep.subr.bf16.mxu1 %v4143_v10  ;;  %v6352_v9 = vld [vmem:[#allocation32_spill] sm:$0xff]  ;;  %v6353_v10 = vld [vmem:[#allocation33_spill] sm:$0xff] }
 0x15b   :  { %966 = vmatpush1.bf16.msra.mxu0 %v4148_v11  ;;  %1007 = vmatpush1.bf16.msra.mxu1 %v4153_v12  ;;  %v6354_v11 = vld [vmem:[#allocation34_spill] sm:$0xff]  ;;  %v6355_v12 = vld [vmem:[#allocation35_spill] sm:$0xff] }
 0x15c   :  { %967 = vmatprep.subr.bf16.mxu0 %v4160_v13  ;;  %1008 = vmatprep.subr.bf16.mxu1 %v4167_v14  ;;  %v6356_v13 = vld [vmem:[#allocation36_spill] sm:$0xff] }
 0x15f   :  { %968 = vmatpush1.bf16.msra.mxu0 %v4172_v15  ;;  %1009 = vmatpush1.bf16.msra.mxu1 %v4179_v16 }
 0x160   :  { %969 = vmatprep.subr.bf16.mxu0 %v4184_v17  ;;  %1010 = vmatprep.subr.bf16.mxu1 %v4191_v18 }
 0x163   :  { %970 = vmatpush1.bf16.msra.mxu0 %v4196_v19  ;;  %1011 = vmatpush1.bf16.msra.mxu1 %v4201_v20 }
 0x164   :  { %971 = vmatprep.subr.bf16.mxu0 %v4208_v21  ;;  %1012 = vmatprep.subr.bf16.mxu1 %v4215_v22 }
 0x167   :  { %972 = vmatpush1.bf16.msra.mxu0 %v4220_v23  ;;  %1013 = vmatpush1.bf16.msra.mxu1 %v4227_v24 }
 0x168   :  { %973 = vmatprep.subr.bf16.mxu0 %v4232_v25  ;;  %1014 = vmatprep.subr.bf16.mxu1 %v4239_v26 }
 0x16b   :  { %974 = vmatpush1.bf16.msra.mxu0 %v4244_v27  ;;  %1015 = vmatpush1.bf16.msra.mxu1 %v4249_v28 }
 0x16c   :  { %975 = vmatprep.subr.bf16.mxu0 %v4256_v29  ;;  %1016 = vmatprep.subr.bf16.mxu1 %v4263_v30 }
 0x16f   :  { %976 = vmatpush1.bf16.msra.mxu0 %v4268_v31  ;;  %1017 = vmatpush1.bf16.msra.mxu1 %v4275_v32 }
 0x170   :  { %1092 = vmatprep.subr.bf16.mxu0 %v4277_v33  ;;  %1133 = vmatprep.subr.bf16.mxu1 %v4281_v34 }
 0x172   :  { %994 = vmatmul.mubr.bf16.vlgmr.msra.gmra.mrb[8].mxu0 %v473_v61  ;;  %1035 = vmatmul.mubr.bf16.vlgmr.msra.gmra.mrb[8].mxu1 %v473_v61  ;;  %v6373_v61 = vld [vmem:[#allocation53_spill] sm:$0xff] }
 0x173   :  { %1093 = vmatpush1.bf16.msra.mxu0 %v4283_v35  ;;  %1134 = vmatpush1.bf16.msra.mxu1 %v4285_v36 }
 0x174   :  { %1094 = vmatprep.subr.bf16.mxu0 %v4289_v37  ;;  %1135 = vmatprep.subr.bf16.mxu1 %v4293_v38 }
 0x177   :  { %1095 = vmatpush1.bf16.msra.mxu0 %v4295_v39  ;;  %1136 = vmatpush1.bf16.msra.mxu1 %v4297_v40 }
 0x178   :  { %1096 = vmatprep.subr.bf16.mxu0 %v4301_v41  ;;  %1137 = vmatprep.subr.bf16.mxu1 %v4303_v42 }
 0x17b   :  { %1097 = vmatpush1.bf16.msra.mxu0 %v4309_v43  ;;  %1138 = vmatpush1.bf16.msra.mxu1 %v4311_v44 }
 0x17c   :  { %1098 = vmatprep.subr.bf16.mxu0 %v4315_v45  ;;  %1139 = vmatprep.subr.bf16.mxu1 %v4317_v46 }
 0x17f   :  { %1099 = vmatpush1.bf16.msra.mxu0 %v4323_v47  ;;  %1140 = vmatpush1.bf16.msra.mxu1 %v6346_v3 }
 0x180   :  { %1100 = vmatprep.subr.bf16.mxu0 %v6347_v4  ;;  %1141 = vmatprep.subr.bf16.mxu1 %v6348_v5 }
 0x183   :  { %1101 = vmatpush1.bf16.msra.mxu0 %v6349_v6  ;;  %1142 = vmatpush1.bf16.msra.mxu1 %v6350_v7 }
 0x184   :  { %1102 = vmatprep.subr.bf16.mxu0 %v6351_v8  ;;  %1143 = vmatprep.subr.bf16.mxu1 %v6352_v9 }
 0x187   :  { %1103 = vmatpush1.bf16.msra.mxu0 %v6353_v10  ;;  %1144 = vmatpush1.bf16.msra.mxu1 %v6354_v11 }
 0x188   :  { %1104 = vmatprep.subr.bf16.mxu0 %v6355_v12  ;;  %1145 = vmatprep.subr.bf16.mxu1 %v6356_v13 }
 0x18b   :  { %1105 = vmatpush1.bf16.msra.mxu0 %v6357_v53  ;;  %1146 = vmatpush1.bf16.msra.mxu1 %v6358_v54 }
 0x18c   :  { %1106 = vmatprep.subr.bf16.mxu0 %v6359_v1  ;;  %1147 = vmatprep.subr.bf16.mxu1 %v6360_v50 }
 0x18f   :  { %1107 = vmatpush1.bf16.msra.mxu0 %v6361_v51  ;;  %1148 = vmatpush1.bf16.msra.mxu1 %v6362_v55 }
 0x190   :  { %1108 = vmatprep.subr.bf16.mxu0 %v6363_v56  ;;  %1149 = vmatprep.subr.bf16.mxu1 %v6364_v52  ;;  %v6374_v56 = vld [vmem:[#allocation54_spill] sm:$0xff]  ;;  %v6375_v52 = vld [vmem:[#allocation55_spill] sm:$0xff] }
 0x193   :  { %1109 = vmatpush1.bf16.msra.mxu0 %v6365_v60  ;;  %1150 = vmatpush1.bf16.msra.mxu1 %v6366_v62  ;;  %v6376_v60 = vld [vmem:[#allocation56_spill] sm:$0xff]  ;;  %v6377_v62 = vld [vmem:[#allocation57_spill] sm:$0xff] }
 0x194   :  { %1110 = vmatprep.subr.bf16.mxu0 %v6367_v2  ;;  %1151 = vmatprep.subr.bf16.mxu1 %v6368_v58  ;;  %v6378_v2 = vld [vmem:[#allocation58_spill] sm:$0xff]  ;;  %v6379_v58 = vld [vmem:[#allocation59_spill] sm:$0xff] }
 0x197   :  { %1111 = vmatpush1.bf16.msra.mxu0 %v6369_v48  ;;  %1152 = vmatpush1.bf16.msra.mxu1 %v6370_v0  ;;  %v6380_v48 = vld [vmem:[#allocation60_spill] sm:$0xff]  ;;  %v6381_v0 = vld [vmem:[#allocation61_spill] sm:$0xff] }
 0x198   :  { %1112 = vmatprep.subr.bf16.mxu0 %v6371_v49  ;;  %1153 = vmatprep.subr.bf16.mxu1 %v6372_v63  ;;  %v6382_v49 = vld [vmem:[#allocation62_spill] sm:$0xff]  ;;  %v6383_v63 = vld [vmem:[#allocation63_spill] sm:$0xff] }
 0x19b   :  { %1113 = vmatpush1.bf16.msra.mxu0 %v6373_v61  ;;  %1154 = vmatpush1.bf16.msra.mxu1 %v6374_v56  ;;  %v6384_v61 = vld [vmem:[#allocation64_spill] sm:$0xff]  ;;  %v6385_v56 = vld [vmem:[#allocation65_spill] sm:$0xff] }
 0x19c   :  { %1114 = vmatprep.subr.bf16.mxu0 %v6375_v52  ;;  %1155 = vmatprep.subr.bf16.mxu1 %v6376_v60  ;;  %v6386_v52 = vld [vmem:[#allocation66_spill] sm:$0xff]  ;;  %v6387_v60 = vld [vmem:[#allocation67_spill] sm:$0xff] }
 0x19f   :  { %1115 = vmatpush1.bf16.msra.mxu0 %v6377_v62  ;;  %1156 = vmatpush1.bf16.msra.mxu1 %v6378_v2  ;;  %v6388_v62 = vld [vmem:[#allocation68_spill] sm:$0xff]  ;;  %v6389_v2 = vld [vmem:[#allocation69_spill] sm:$0xff] }
 0x1a0   :  { %1116 = vmatprep.subr.bf16.mxu0 %v6379_v58  ;;  %1157 = vmatprep.subr.bf16.mxu1 %v6380_v48  ;;  %v6390_v58 = vld [vmem:[#allocation70_spill] sm:$0xff]  ;;  %v6391_v48 = vld [vmem:[#allocation71_spill] sm:$0xff] }
 0x1a3   :  { %1117 = vmatpush1.bf16.msra.mxu0 %v6381_v0  ;;  %1158 = vmatpush1.bf16.msra.mxu1 %v6382_v49  ;;  %v6392_v0 = vld [vmem:[#allocation72_spill] sm:$0xff]  ;;  %v6393_v49 = vld [vmem:[#allocation73_spill] sm:$0xff] }
 0x1a4   :  { %1118 = vmatprep.subr.bf16.mxu0 %v6383_v63  ;;  %1159 = vmatprep.subr.bf16.mxu1 %v6384_v61  ;;  %v6394_v63 = vld [vmem:[#allocation74_spill] sm:$0xff]  ;;  %v6395_v61 = vld [vmem:[#allocation24_spill] sm:$0xff] }
 0x1a7   :  { %1119 = vmatpush1.bf16.msra.mxu0 %v6385_v56  ;;  %1160 = vmatpush1.bf16.msra.mxu1 %v6386_v52  ;;  %v6396_v56 = vld [vmem:[#allocation25_spill] sm:$0xff]  ;;  %v6397_v52 = vld [vmem:[#allocation75_spill] sm:$0xff] }
 0x1a8   :  { %1120 = vmatprep.subr.bf16.mxu0 %v6387_v60  ;;  %1161 = vmatprep.subr.bf16.mxu1 %v6388_v62  ;;  %v6106_v60 = vsub.s32 0, %v6397_v52  ;;  %v144_v51 = vsub.s32 3, %v6397_v52 }
 0x1ab   :  { %1121 = vmatpush1.bf16.msra.mxu0 %v6389_v2  ;;  %1162 = vmatpush1.bf16.msra.mxu1 %v6390_v58  ;;  %v128_v2 = vld [vmem:[%s5987_s3] sm:$0xf]  ;;  %v6107_v58 = vsub.s32 1, %v6397_v52 }
 0x1ac   :  { %1122 = vmatprep.subr.bf16.mxu0 %v6391_v48  ;;  %1163 = vmatprep.subr.bf16.mxu1 %v6392_v0  ;;  %v4597_v48 = vrot.slane %v128_v2, %v6106_v60 }
 0x1ae   :  { %6398 = vst [vmem:[#allocation26_spill] sm:$0xff] %v4597_v48 }
 0x1af   :  { %1123 = vmatpush1.bf16.msra.mxu0 %v6393_v49  ;;  %1164 = vmatpush1.bf16.msra.mxu1 %v6394_v63  ;;  %v6108_v49 = vsub.s32 2, %v6397_v52  ;;  %v4602_v63 = vrot.slane %v128_v2, %v6107_v58 }
 0x1b0   :  { %1195 = vmatprep.subr.bf16.mxu0 %v6395_v61  ;;  %1236 = vmatprep.subr.bf16.mxu1 %v6396_v56 }
 0x1b1   :  { %v4607_v62 = vrot.slane %v128_v2, %v6108_v49 }
 0x1b3   :  { %6399 = vst [vmem:[#allocation27_spill] sm:$0xff] %v4607_v62 }
 0x225   :  { %v892_v61 = vpop.f32.mrb[4].mxu0  ;;  %v933_v56 = vpop.f32.mrb[4].mxu1 }
 0x226   :  { %v893_v0 = vadd.f32 %v892_v61, %v4597_v48  ;;  %v894_v55 = vpop.f32.mrb[5].mxu0  ;;  %v935_v50 = vpop.f32.mrb[5].mxu1  ;;  %v934_v11 = vadd.f32 %v933_v56, %v4607_v62  ;;  %v4612_v61 = vrot.slane %v128_v2, %v144_v51 }
 0x227   :  { %v895_v60 = vadd.f32 %v894_v55, %v4602_v63  ;;  %v896_v1 = vpop.f32.mrb[6].mxu0  ;;  %v937_v54 = vpop.f32.mrb[6].mxu1 }
 0x228   :  { %v940_v53 = vmul.f32 0.5, %v893_v0  ;;  %v897_v13 = vpop.f32.mrb[7].mxu0  ;;  %v938_v58 = vpop.f32.mrb[7].mxu1  ;;  %6400 = vst [vmem:[#allocation28_spill] sm:$0xff] %v4612_v61  ;;  %v936_v49 = vadd.f32 %v935_v50, %v4612_v61 }
 0x229   :  { %v944_v12 = vmul.f32 0.5, %v895_v60 }
 0x22a   :  { %3518 = vtanh.f32 %v940_v53  ;;  %v949_v48 = vmul.f32 0.5, %v936_v49 }
 0x22b   :  { %3520 = vtanh.f32 %v944_v12 }
 0x22c   :  { %3522 = vtanh.f32 %v934_v11 }
 0x22d   :  { %3524 = vtanh.f32 %v949_v48 }
 0x234   :  { %v3519_v52 = vpop.eup %3518 }
 0x235   :  { %v3521_v10 = vpop.eup %3520  ;;  %v942_v9 = vmul.f32 0.5, %v3519_v52 }
 0x236   :  { %v946_v55 = vmul.f32 0.5, %v3521_v10  ;;  %v3523_v1 = vpop.eup %3522 }
 0x237   :  { %v943_v54 = vadd.f32 0.5, %v942_v9  ;;  %v3525_v51 = vpop.eup %3524 }
 0x238   :  { %v947_v13 = vadd.f32 0.5, %v946_v55  ;;  %v951_v12 = vmul.f32 0.5, %v3525_v51 }
 0x239   :  { %v954_v58 = vmul.f32 %v3523_v1, %v943_v54  ;;  %v6402_v54 = vld [vmem:[#allocation76_spill] sm:$0xff] }
 0x23a   :  { %v953_v60 = vmul.f32 0.0, %v947_v13  ;;  %v952_v49 = vadd.f32 0.5, %v951_v12 }
 0x23c   :  { %v4615_v53 = vadd.f32 %v954_v58, %v953_v60  ;;  %v3187_v60 = vld [vmem:[%s5984_s0 + $0x8] sm:$0xff] }
 0x23e   :  { %6401 = vst [vmem:[#allocation29_spill] sm:$0xff] %v4615_v53  ;;  %3526 = vtanh.f32 %v4615_v53 }
 0x245   :  { %v995_v11 = vpop.f32.mrb[8].mxu0  ;;  %v1036_v2 = vpop.f32.mrb[8].mxu1 }
 0x246   :  { %v997_v50 = vpop.f32.mrb[9].mxu0  ;;  %v1038_v0 = vpop.f32.mrb[9].mxu1 }
 0x247   :  { %v1047_v56 = vcombine.low %v995_v11, %v997_v50  ;;  %v1048_v52 = vcombine.low %v1036_v2, %v1038_v0  ;;  %v999_v10 = vpop.f32.mrb[10].mxu0  ;;  %v1040_v48 = vpop.f32.mrb[10].mxu1 }
 0x248   :  { %v3527_v9 = vpop.eup %3526  ;;  %v1000_v61 = vpop.f32.mrb[11].mxu0 }
 0x249   :  { %v1041_v55 = vpop.f32.mrb[11].mxu1  ;;  %v1055_v1 = vrot.slane %v1047_v56, %v6402_v54  ;;  %v1062_v13 = vrot.slane %v1048_v52, %v6402_v54  ;;  %v957_v58 = vmul.f32 %v3527_v9, %v952_v49 }
 0x24b   :  { %v1063_v51 = vcombine.low %v1055_v1, %v1062_v13  ;;  %v958_v53 = vpack.c.bf16 %v957_v58, %v957_v58 }
 0x24d   :  { %v1065_v62 = vadd.f32 %v3187_v60, %v1063_v51  ;;  %1124 = vmatprep.mubr.bf16.mxu0 %v958_v53  ;;  %1165 = vmatprep.mubr.bf16.mxu1 %v958_v53 }
 0x24f   :  { %v1066_v12 = vmul.f32 0.5, %v1065_v62  ;;  %v1071_v11 = vrot.slane %v1065_v62, 2  ;;  %v1077_v61 = vrot.slane %v1065_v62, 4  ;;  %v1080_v50 = vrot.slane %v1065_v62, 6 }
 0x251   :  { %3528 = vtanh.f32 %v1066_v12  ;;  %v1073_v2 = vmul.f32 0.5, %v1071_v11  ;;  %v1082_v0 = vmul.f32 0.5, %v1080_v50  ;;  %v4648_v50 = vld [vmem:[%s5985_s1 + $0x2c] ss:$16 sps:$4 sm:$0xff]  }
 0x253   :  { %3530 = vtanh.f32 %v1073_v2  ;;  %v4630_v2 = vld [vmem:[%s5985_s1] ss:$16 sps:$4 sm:$0xff]  }
 0x254   :  { %3532 = vtanh.f32 %v1077_v61  ;;  %v4642_v61 = vld [vmem:[%s5985_s1 + $0x24] ss:$16 sps:$4 sm:$0xff]  }
 0x255   :  { %3534 = vtanh.f32 %v1082_v0  ;;  %v4656_v0 = vld [vmem:[%s5985_s1 + $0x20] ss:$16 sps:$4 sm:$0xff]  }
 0x25b   :  { %v3529_v56 = vpop.eup %3528 }
 0x25c   :  { %v1068_v49 = vmul.f32 0.5, %v3529_v56  ;;  %v4662_v56 = vld [vmem:[%s5985_s1 + $0x28] ss:$16 sps:$4 sm:$0xff]  }
 0x25d   :  { %v3531_v52 = vpop.eup %3530 }
 0x25e   :  { %v1069_v10 = vadd.f32 0.5, %v1068_v49  ;;  %v1075_v48 = vmul.f32 0.5, %v3531_v52  ;;  %v3533_v55 = vpop.eup %3532  ;;  %v4668_v49 = vld [vmem:[%s5985_s1 + $0x44] ss:$16 sps:$4 sm:$0xff]   ;;  %v4674_v52 = vld [vmem:[%s5985_s1 + $0x4c] ss:$16 sps:$4 sm:$0xff]  }
 0x25f   :  { %v3535_v58 = vpop.eup %3534 }
 0x260   :  { %v1076_v9 = vadd.f32 0.5, %v1075_v48  ;;  %v1087_v53 = vmul.f32 %v3533_v55, %v1069_v10  ;;  %v1084_v60 = vmul.f32 0.5, %v3535_v58  ;;  %v4680_v10 = vld [vmem:[%s5985_s1 + $0x40] ss:$16 sps:$4 sm:$0xff]   ;;  %v4686_v48 = vld [vmem:[%s5985_s1 + $0x48] ss:$16 sps:$4 sm:$0xff]  }
 0x261   :  { %v6443_v55 = vld [vmem:[#allocation72_spill] sm:$0xff] }
 0x262   :  { %v1086_v1 = vmul.f32 %v1076_v9, %v4489_v57  ;;  %v1085_v62 = vadd.f32 0.5, %v1084_v60  ;;  %v4636_v57 = vld [vmem:[%s5985_s1 + $0x8] ss:$16 sps:$4 sm:$0xff]   ;;  %v4692_v9 = vld [vmem:[%s5985_s1 + $0x64] ss:$16 sps:$4 sm:$0xff]  }
 0x263   :  { %v4781_v58 = vld [vmem:[%s5985_s1 + $0x4] ss:$16 sps:$4 sm:$0xff]   ;;  %v4787_v60 = vld [vmem:[%s5985_s1 + $0xc] ss:$16 sps:$4 sm:$0xff]  }
 0x264   :  { %v4624_v13 = vadd.f32 %v1087_v53, %v1086_v1  ;;  %v6444_v1 = vld [vmem:[#allocation73_spill] sm:$0xff]  ;;  %v6445_v53 = vld [vmem:[#allocation74_spill] sm:$0xff]  ;;  %6446 = vst [vmem:[#allocation30_spill] sm:$0xff] %v4781_v58  ;;  %6447 = vst [vmem:[#allocation31_spill] sm:$0xff] %v4787_v60 }
 0x266   :  { %3536 = vtanh.f32 %v4624_v13 }
 0x270   :  { %v3537_v51 = vpop.eup %3536 }
 0x271   :  { %v1090_v12 = vmul.f32 %v3537_v51, %v1085_v62 }
 0x273   :  { %v1091_v11 = vpack.c.bf16 %v1090_v12, %v1090_v12  ;;  %v6448_v12 = vld [vmem:[#allocation26_spill] sm:$0xff] }
 0x275   :  { %1125 = vmatmul.mubr.bf16.vlgmr.msra.gmra.mrb[12].mxu0 %v1091_v11  ;;  %1166 = vmatmul.mubr.bf16.vlgmr.msra.gmra.mrb[12].mxu1 %v1091_v11 }
 0x276   :  { %1196 = vmatpush1.bf16.msra.mxu0 %v4630_v2  ;;  %1237 = vmatpush1.bf16.msra.mxu1 %v4636_v57 }
 0x277   :  { %1197 = vmatprep.subr.bf16.mxu0 %v4642_v61  ;;  %1238 = vmatprep.subr.bf16.mxu1 %v4648_v50 }
 0x278   :  { %1227 = vmatprep.mubr.bf16.mxu0 %v6345_v59  ;;  %1268 = vmatprep.mubr.bf16.mxu1 %v6345_v59 }
 0x27a   :  { %1198 = vmatpush1.bf16.msra.mxu0 %v4656_v0  ;;  %1239 = vmatpush1.bf16.msra.mxu1 %v4662_v56 }
 0x27b   :  { %1199 = vmatprep.subr.bf16.mxu0 %v4668_v49  ;;  %1240 = vmatprep.subr.bf16.mxu1 %v4674_v52 }
 0x27e   :  { %1200 = vmatpush1.bf16.msra.mxu0 %v4680_v10  ;;  %1241 = vmatpush1.bf16.msra.mxu1 %v4686_v48 }
 0x27f   :  { %1201 = vmatprep.subr.bf16.mxu0 %v4692_v9  ;;  %1242 = vmatprep.subr.bf16.mxu1 %v4167_v14  ;;  %v6403_v14 = vld [vmem:[#allocation32_spill] sm:$0xff] }
 0x282   :  { %1202 = vmatpush1.bf16.msra.mxu0 %v4172_v15  ;;  %1243 = vmatpush1.bf16.msra.mxu1 %v4179_v16  ;;  %v6404_v15 = vld [vmem:[#allocation33_spill] sm:$0xff]  ;;  %v6405_v16 = vld [vmem:[#allocation34_spill] sm:$0xff] }
 0x283   :  { %1203 = vmatprep.subr.bf16.mxu0 %v4184_v17  ;;  %1244 = vmatprep.subr.bf16.mxu1 %v4191_v18  ;;  %v6406_v17 = vld [vmem:[#allocation35_spill] sm:$0xff]  ;;  %v6407_v18 = vld [vmem:[#allocation36_spill] sm:$0xff] }
 0x286   :  { %1204 = vmatpush1.bf16.msra.mxu0 %v4196_v19  ;;  %1245 = vmatpush1.bf16.msra.mxu1 %v4201_v20  ;;  %v6408_v19 = vld [vmem:[#allocation37_spill] sm:$0xff]  ;;  %v6409_v20 = vld [vmem:[#allocation38_spill] sm:$0xff] }
 0x287   :  { %1205 = vmatprep.subr.bf16.mxu0 %v4208_v21  ;;  %1246 = vmatprep.subr.bf16.mxu1 %v4215_v22  ;;  %v6410_v21 = vld [vmem:[#allocation39_spill] sm:$0xff]  ;;  %v6411_v22 = vld [vmem:[#allocation40_spill] sm:$0xff] }
 0x28a   :  { %1206 = vmatpush1.bf16.msra.mxu0 %v4220_v23  ;;  %1247 = vmatpush1.bf16.msra.mxu1 %v4227_v24  ;;  %v6412_v23 = vld [vmem:[#allocation41_spill] sm:$0xff]  ;;  %v6413_v24 = vld [vmem:[#allocation42_spill] sm:$0xff] }
 0x28b   :  { %1207 = vmatprep.subr.bf16.mxu0 %v4232_v25  ;;  %1248 = vmatprep.subr.bf16.mxu1 %v4239_v26  ;;  %v6414_v25 = vld [vmem:[#allocation43_spill] sm:$0xff]  ;;  %v6415_v26 = vld [vmem:[#allocation44_spill] sm:$0xff] }
 0x28e   :  { %1208 = vmatpush1.bf16.msra.mxu0 %v4244_v27  ;;  %1249 = vmatpush1.bf16.msra.mxu1 %v4249_v28  ;;  %v6416_v27 = vld [vmem:[#allocation45_spill] sm:$0xff]  ;;  %v6417_v28 = vld [vmem:[#allocation46_spill] sm:$0xff] }
 0x28f   :  { %1209 = vmatprep.subr.bf16.mxu0 %v4256_v29  ;;  %1250 = vmatprep.subr.bf16.mxu1 %v4263_v30  ;;  %v6418_v29 = vld [vmem:[#allocation47_spill] sm:$0xff]  ;;  %v6419_v30 = vld [vmem:[#allocation48_spill] sm:$0xff] }
 0x292   :  { %1210 = vmatpush1.bf16.msra.mxu0 %v4268_v31  ;;  %1251 = vmatpush1.bf16.msra.mxu1 %v4275_v32  ;;  %v6420_v31 = vld [vmem:[#allocation49_spill] sm:$0xff]  ;;  %v6421_v32 = vld [vmem:[#allocation50_spill] sm:$0xff] }
 0x293   :  { %1326 = vmatprep.subr.bf16.mxu0 %v4277_v33  ;;  %1367 = vmatprep.subr.bf16.mxu1 %v4281_v34  ;;  %v6422_v33 = vld [vmem:[#allocation51_spill] sm:$0xff]  ;;  %v6423_v34 = vld [vmem:[#allocation52_spill] sm:$0xff] }
 0x295   :  { %1228 = vmatmul.mubr.bf16.vlgmr.msra.gmra.mrb[16].mxu0 %v1091_v11  ;;  %1269 = vmatmul.mubr.bf16.vlgmr.msra.gmra.mrb[16].mxu1 %v1091_v11 }
 0x296   :  { %1327 = vmatpush1.bf16.msra.mxu0 %v4283_v35  ;;  %1368 = vmatpush1.bf16.msra.mxu1 %v4285_v36  ;;  %v6424_v35 = vld [vmem:[#allocation53_spill] sm:$0xff]  ;;  %v6425_v36 = vld [vmem:[#allocation54_spill] sm:$0xff] }
 0x297   :  { %1328 = vmatprep.subr.bf16.mxu0 %v4289_v37  ;;  %1369 = vmatprep.subr.bf16.mxu1 %v4293_v38  ;;  %v6426_v37 = vld [vmem:[#allocation55_spill] sm:$0xff]  ;;  %v6427_v38 = vld [vmem:[#allocation56_spill] sm:$0xff] }
 0x29a   :  { %1329 = vmatpush1.bf16.msra.mxu0 %v4295_v39  ;;  %1370 = vmatpush1.bf16.msra.mxu1 %v4297_v40  ;;  %v6428_v39 = vld [vmem:[#allocation57_spill] sm:$0xff]  ;;  %v6429_v40 = vld [vmem:[#allocation58_spill] sm:$0xff] }
 0x29b   :  { %1330 = vmatprep.subr.bf16.mxu0 %v4301_v41  ;;  %1371 = vmatprep.subr.bf16.mxu1 %v4303_v42  ;;  %v6430_v41 = vld [vmem:[#allocation59_spill] sm:$0xff]  ;;  %v6431_v42 = vld [vmem:[#allocation60_spill] sm:$0xff] }
 0x29e   :  { %1331 = vmatpush1.bf16.msra.mxu0 %v4309_v43  ;;  %1372 = vmatpush1.bf16.msra.mxu1 %v4311_v44  ;;  %v6432_v43 = vld [vmem:[#allocation61_spill] sm:$0xff]  ;;  %v6433_v44 = vld [vmem:[#allocation62_spill] sm:$0xff] }
 0x29f   :  { %1332 = vmatprep.subr.bf16.mxu0 %v4315_v45  ;;  %1373 = vmatprep.subr.bf16.mxu1 %v4317_v46  ;;  %v6434_v45 = vld [vmem:[#allocation63_spill] sm:$0xff]  ;;  %v6435_v46 = vld [vmem:[#allocation64_spill] sm:$0xff] }
 0x2a2   :  { %1333 = vmatpush1.bf16.msra.mxu0 %v4323_v47  ;;  %1374 = vmatpush1.bf16.msra.mxu1 %v6346_v3  ;;  %v6436_v47 = vld [vmem:[#allocation65_spill] sm:$0xff]  ;;  %v6437_v3 = vld [vmem:[#allocation66_spill] sm:$0xff] }
 0x2a3   :  { %1334 = vmatprep.subr.bf16.mxu0 %v6347_v4  ;;  %1375 = vmatprep.subr.bf16.mxu1 %v6348_v5  ;;  %v6438_v4 = vld [vmem:[#allocation67_spill] sm:$0xff]  ;;  %v6439_v5 = vld [vmem:[#allocation68_spill] sm:$0xff] }
 0x2a6   :  { %1335 = vmatpush1.bf16.msra.mxu0 %v6349_v6  ;;  %1376 = vmatpush1.bf16.msra.mxu1 %v6350_v7  ;;  %v6440_v6 = vld [vmem:[#allocation69_spill] sm:$0xff]  ;;  %v6441_v7 = vld [vmem:[#allocation70_spill] sm:$0xff] }
 0x2a7   :  { %1336 = vmatprep.subr.bf16.mxu0 %v6351_v8  ;;  %1377 = vmatprep.subr.bf16.mxu1 %v6403_v14  ;;  %v6442_v8 = vld [vmem:[#allocation71_spill] sm:$0xff] }
 0x2aa   :  { %1337 = vmatpush1.bf16.msra.mxu0 %v6404_v15  ;;  %1378 = vmatpush1.bf16.msra.mxu1 %v6405_v16 }
 0x2ab   :  { %1338 = vmatprep.subr.bf16.mxu0 %v6406_v17  ;;  %1379 = vmatprep.subr.bf16.mxu1 %v6407_v18 }
 0x2ae   :  { %1339 = vmatpush1.bf16.msra.mxu0 %v6408_v19  ;;  %1380 = vmatpush1.bf16.msra.mxu1 %v6409_v20 }
 0x2af   :  { %1340 = vmatprep.subr.bf16.mxu0 %v6410_v21  ;;  %1381 = vmatprep.subr.bf16.mxu1 %v6411_v22 }
 0x2b2   :  { %1341 = vmatpush1.bf16.msra.mxu0 %v6412_v23  ;;  %1382 = vmatpush1.bf16.msra.mxu1 %v6413_v24  ;;  %v6449_v23 = vld [vmem:[#allocation27_spill] sm:$0xff] }
 0x2b3   :  { %1342 = vmatprep.subr.bf16.mxu0 %v6414_v25  ;;  %1383 = vmatprep.subr.bf16.mxu1 %v6415_v26  ;;  %v6450_v25 = vld [vmem:[#allocation28_spill] sm:$0xff] }
 0x2b6   :  { %1343 = vmatpush1.bf16.msra.mxu0 %v6416_v27  ;;  %1384 = vmatpush1.bf16.msra.mxu1 %v6417_v28 }
 0x2b7   :  { %1344 = vmatprep.subr.bf16.mxu0 %v6418_v29  ;;  %1385 = vmatprep.subr.bf16.mxu1 %v6419_v30 }
 0x2ba   :  { %1345 = vmatpush1.bf16.msra.mxu0 %v6420_v31  ;;  %1386 = vmatpush1.bf16.msra.mxu1 %v6421_v32 }
 0x2bb   :  { %1346 = vmatprep.subr.bf16.mxu0 %v6422_v33  ;;  %1387 = vmatprep.subr.bf16.mxu1 %v6423_v34 }
 0x2be   :  { %1347 = vmatpush1.bf16.msra.mxu0 %v6424_v35  ;;  %1388 = vmatpush1.bf16.msra.mxu1 %v6425_v36  ;;  %v6451_v36 = vld [vmem:[#allocation29_spill] sm:$0xff] }
 0x2bf   :  { %1348 = vmatprep.subr.bf16.mxu0 %v6426_v37  ;;  %1389 = vmatprep.subr.bf16.mxu1 %v6427_v38 }
 0x2c2   :  { %1349 = vmatpush1.bf16.msra.mxu0 %v6428_v39  ;;  %1390 = vmatpush1.bf16.msra.mxu1 %v6429_v40 }
 0x2c3   :  { %1350 = vmatprep.subr.bf16.mxu0 %v6430_v41  ;;  %1391 = vmatprep.subr.bf16.mxu1 %v6431_v42 }
 0x2c6   :  { %1351 = vmatpush1.bf16.msra.mxu0 %v6432_v43  ;;  %1392 = vmatpush1.bf16.msra.mxu1 %v6433_v44 }
 0x2c7   :  { %1352 = vmatprep.subr.bf16.mxu0 %v6434_v45  ;;  %1393 = vmatprep.subr.bf16.mxu1 %v6435_v46 }
 0x2ca   :  { %1353 = vmatpush1.bf16.msra.mxu0 %v6436_v47  ;;  %1394 = vmatpush1.bf16.msra.mxu1 %v6437_v3 }
 0x2cb   :  { %1354 = vmatprep.subr.bf16.mxu0 %v6438_v4  ;;  %1395 = vmatprep.subr.bf16.mxu1 %v6439_v5 }
 0x2ce   :  { %1355 = vmatpush1.bf16.msra.mxu0 %v6440_v6  ;;  %1396 = vmatpush1.bf16.msra.mxu1 %v6441_v7 }
 0x2cf   :  { %1356 = vmatprep.subr.bf16.mxu0 %v6442_v8  ;;  %1397 = vmatprep.subr.bf16.mxu1 %v6443_v55 }
 0x2d2   :  { %1357 = vmatpush1.bf16.msra.mxu0 %v6444_v1  ;;  %1398 = vmatpush1.bf16.msra.mxu1 %v6445_v53  ;;  %v3188_v53 = vld [vmem:[%s5984_s0 + $0x10] sm:$0xff] }
 0x2d3   :  { %1429 = vmatprep.subr.bf16.mxu0 %v4781_v58  ;;  %1470 = vmatprep.subr.bf16.mxu1 %v4787_v60 }
 0x348   :  { %v1126_v62 = vpop.f32.mrb[12].mxu0  ;;  %v1167_v51 = vpop.f32.mrb[12].mxu1 }
 0x349   :  { %v1127_v11 = vadd.f32 %v1126_v62, %v6448_v12  ;;  %v1128_v14 = vpop.f32.mrb[13].mxu0  ;;  %v1169_v15 = vpop.f32.mrb[13].mxu1  ;;  %v1168_v24 = vadd.f32 %v1167_v51, %v6449_v23 }
 0x34a   :  { %v1129_v16 = vadd.f32 %v1128_v14, %v4602_v63  ;;  %v1130_v17 = vpop.f32.mrb[14].mxu0  ;;  %v1171_v18 = vpop.f32.mrb[14].mxu1  ;;  %v1170_v26 = vadd.f32 %v1169_v15, %v6450_v25 }
 0x34b   :  { %v1174_v19 = vmul.f32 0.5, %v1127_v11  ;;  %v1131_v20 = vpop.f32.mrb[15].mxu0  ;;  %v1172_v21 = vpop.f32.mrb[15].mxu1 }
 0x34c   :  { %v1178_v22 = vmul.f32 0.5, %v1129_v16  ;;  %v1183_v27 = vmul.f32 0.5, %v1170_v26 }
 0x34d   :  { %3538 = vtanh.f32 %v1174_v19 }
 0x34e   :  { %3540 = vtanh.f32 %v1178_v22 }
 0x34f   :  { %3542 = vtanh.f32 %v1168_v24 }
 0x350   :  { %3544 = vtanh.f32 %v1183_v27 }
 0x357   :  { %v3539_v28 = vpop.eup %3538 }
 0x358   :  { %v3541_v29 = vpop.eup %3540  ;;  %v1176_v30 = vmul.f32 0.5, %v3539_v28 }
 0x359   :  { %v1180_v31 = vmul.f32 0.5, %v3541_v29  ;;  %v3543_v33 = vpop.eup %3542 }
 0x35a   :  { %v1177_v32 = vadd.f32 0.5, %v1176_v30  ;;  %v3545_v39 = vpop.eup %3544 }
 0x35b   :  { %v1181_v34 = vadd.f32 0.5, %v1180_v31  ;;  %v1185_v40 = vmul.f32 0.5, %v3545_v39  ;;  %v4829_v39 = vld [vmem:[%s5985_s1 + $0x60] ss:$16 sps:$4 sm:$0xff]  }
 0x35c   :  { %v1188_v35 = vmul.f32 %v3543_v33, %v1177_v32 }
 0x35d   :  { %v1187_v37 = vmul.f32 %v1181_v34, %v6451_v36  ;;  %v1186_v45 = vadd.f32 0.5, %v1185_v40  ;;  %v4835_v40 = vld [vmem:[%s5985_s1 + $0x68] ss:$16 sps:$4 sm:$0xff]  }
 0x35f   :  { %v4795_v38 = vadd.f32 %v1188_v35, %v1187_v37 }
 0x361   :  { %3546 = vtanh.f32 %v4795_v38 }
 0x368   :  { %v1229_v41 = vpop.f32.mrb[16].mxu0  ;;  %v1270_v42 = vpop.f32.mrb[16].mxu1 }
 0x369   :  { %v1231_v43 = vpop.f32.mrb[17].mxu0  ;;  %v1272_v44 = vpop.f32.mrb[17].mxu1 }
 0x36a   :  { %v1281_v46 = vcombine.low %v1229_v41, %v1231_v43  ;;  %v1282_v47 = vcombine.low %v1270_v42, %v1272_v44  ;;  %v1233_v3 = vpop.f32.mrb[18].mxu0  ;;  %v1274_v4 = vpop.f32.mrb[18].mxu1  ;;  %v4841_v41 = vld [vmem:[%s5985_s1 + $0x84] ss:$16 sps:$4 sm:$0xff]   ;;  %v4847_v42 = vld [vmem:[%s5985_s1 + $0x8c] ss:$16 sps:$4 sm:$0xff]  }
 0x36b   :  { %v3547_v5 = vpop.eup %3546  ;;  %v1234_v6 = vpop.f32.mrb[19].mxu0  ;;  %v4853_v43 = vld [vmem:[%s5985_s1 + $0x80] ss:$16 sps:$4 sm:$0xff]   ;;  %v4859_v44 = vld [vmem:[%s5985_s1 + $0x88] ss:$16 sps:$4 sm:$0xff]  }
 0x36c   :  { %v1275_v7 = vpop.f32.mrb[19].mxu1  ;;  %v1289_v8 = vrot.slane %v1281_v46, %v6402_v54  ;;  %v1296_v55 = vrot.slane %v1282_v47, %v6402_v54  ;;  %v1191_v1 = vmul.f32 %v3547_v5, %v1186_v45  ;;  %v4865_v45 = vld [vmem:[%s5985_s1 + $0xa4] ss:$16 sps:$4 sm:$0xff]   ;;  %v4871_v46 = vld [vmem:[%s5985_s1 + $0xac] ss:$16 sps:$4 sm:$0xff]  }
 0x36d   :  { %v4877_v47 = vld [vmem:[%s5985_s1 + $0xa0] ss:$16 sps:$4 sm:$0xff]   ;;  %v4883_v3 = vld [vmem:[%s5985_s1 + $0xa8] ss:$16 sps:$4 sm:$0xff]   ;;  %v4889_v4 = vld [vmem:[%s5985_s1 + $0xc4] ss:$16 sps:$4 sm:$0xff]  }
 0x36e   :  { %v1297_v62 = vcombine.low %v1289_v8, %v1296_v55  ;;  %v1192_v51 = vpack.c.bf16 %v1191_v1, %v1191_v1  ;;  %v4895_v5 = vld [vmem:[%s5985_s1 + $0xcc] ss:$16 sps:$4 sm:$0xff]   ;;  %v4901_v6 = vld [vmem:[%s5985_s1 + $0xc0] ss:$16 sps:$4 sm:$0xff]   ;;  %v4907_v7 = vld [vmem:[%s5985_s1 + $0xc8] ss:$16 sps:$4 sm:$0xff]  }
 0x36f   :  { %v4913_v8 = vld [vmem:[%s5985_s1 + $0xe4] ss:$16 sps:$4 sm:$0xff]   ;;  %v4919_v55 = vld [vmem:[%s5985_s1 + $0xec] ss:$16 sps:$4 sm:$0xff]   ;;  %v4925_v1 = vld [vmem:[%s5985_s1 + $0xe0] ss:$16 sps:$4 sm:$0xff]  }
 0x370   :  { %v1299_v11 = vadd.f32 %v3188_v53, %v1297_v62  ;;  %1358 = vmatprep.mubr.bf16.mxu0 %v1192_v51  ;;  %1399 = vmatprep.mubr.bf16.mxu1 %v1192_v51  ;;  %v4931_v53 = vld [vmem:[%s5985_s1 + $0xe8] ss:$16 sps:$4 sm:$0xff]   ;;  %v4934_v62 = vld [vmem:[#allocation7 + $0x4] ss:$16 sps:$4 sm:$0xff]   ;;  %v4937_v51 = vld [vmem:[#allocation7 + $0xc] ss:$16 sps:$4 sm:$0xff]  }
 0x372   :  { %v1300_v14 = vmul.f32 0.5, %v1299_v11  ;;  %v1305_v15 = vrot.slane %v1299_v11, 2  ;;  %v1311_v17 = vrot.slane %v1299_v11, 4  ;;  %v1314_v18 = vrot.slane %v1299_v11, 6  ;;  %v4940_v11 = vld [vmem:[#allocation7] ss:$16 sps:$4 sm:$0xff]  }
 0x374   :  { %3548 = vtanh.f32 %v1300_v14  ;;  %v1307_v16 = vmul.f32 0.5, %v1305_v15  ;;  %v1316_v19 = vmul.f32 0.5, %v1314_v18  ;;  %v4943_v14 = vld [vmem:[#allocation7 + $0x8] ss:$16 sps:$4 sm:$0xff]   ;;  %v4946_v15 = vld [vmem:[#allocation7 + $0x24] ss:$16 sps:$4 sm:$0xff]  }
 0x375   :  { %v4955_v18 = vld [vmem:[#allocation7 + $0x28] ss:$16 sps:$4 sm:$0xff]  }
 0x376   :  { %3550 = vtanh.f32 %v1307_v16  ;;  %v4949_v16 = vld [vmem:[#allocation7 + $0x2c] ss:$16 sps:$4 sm:$0xff]  }
 0x377   :  { %3552 = vtanh.f32 %v1311_v17  ;;  %v4952_v17 = vld [vmem:[#allocation7 + $0x20] ss:$16 sps:$4 sm:$0xff]  }
 0x378   :  { %3554 = vtanh.f32 %v1316_v19  ;;  %v4958_v19 = vld [vmem:[#allocation7 + $0x44] ss:$16 sps:$4 sm:$0xff]  }
 0x37e   :  { %v3549_v20 = vpop.eup %3548 }
 0x37f   :  { %v1302_v21 = vmul.f32 0.5, %v3549_v20  ;;  %v4961_v20 = vld [vmem:[#allocation7 + $0x4c] ss:$16 sps:$4 sm:$0xff]  }
 0x380   :  { %v3551_v22 = vpop.eup %3550  ;;  %6452 = vst [vmem:[#allocation24_spill] sm:$0xff] %v4961_v20 }
 0x381   :  { %v1303_v24 = vadd.f32 0.5, %v1302_v21  ;;  %v1309_v26 = vmul.f32 0.5, %v3551_v22  ;;  %v3553_v28 = vpop.eup %3552  ;;  %v4964_v21 = vld [vmem:[#allocation7 + $0x40] ss:$16 sps:$4 sm:$0xff]   ;;  %v4967_v22 = vld [vmem:[#allocation7 + $0x48] ss:$16 sps:$4 sm:$0xff]  }
 0x382   :  { %v3555_v32 = vpop.eup %3554  ;;  %6453 = vst [vmem:[#allocation25_spill] sm:$0xff] %v4964_v21  ;;  %6454 = vst [vmem:[#allocation76_spill] sm:$0xff] %v4967_v22 }
 0x383   :  { %v1310_v27 = vadd.f32 0.5, %v1309_v26  ;;  %v1321_v30 = vmul.f32 %v3553_v28, %v1303_v24  ;;  %v1318_v33 = vmul.f32 0.5, %v3555_v32  ;;  %v4970_v24 = vld [vmem:[#allocation7 + $0x64] ss:$16 sps:$4 sm:$0xff]   ;;  %v4973_v26 = vld [vmem:[#allocation7 + $0x6c] ss:$16 sps:$4 sm:$0xff]  }
 0x384   :  { %6455 = vst [vmem:[#allocation32_spill] sm:$0xff] %v4970_v24  ;;  %6456 = vst [vmem:[#allocation33_spill] sm:$0xff] %v4973_v26  ;;  %v4979_v28 = vld [vmem:[#allocation7 + $0x68] ss:$16 sps:$4 sm:$0xff]   ;;  %v4988_v32 = vld [vmem:[#allocation7 + $0x80] ss:$16 sps:$4 sm:$0xff]  }
 0x385   :  { %v1320_v29 = vmul.f32 %v1310_v27, %v4624_v13  ;;  %v1319_v34 = vadd.f32 0.5, %v1318_v33  ;;  %v4823_v13 = vld [vmem:[%s5985_s1 + $0x6c] ss:$16 sps:$4 sm:$0xff]   ;;  %v4976_v27 = vld [vmem:[#allocation7 + $0x60] ss:$16 sps:$4 sm:$0xff]   ;;  %6458 = vst [vmem:[#allocation35_spill] sm:$0xff] %v4979_v28 }
 0x386   :  { %6457 = vst [vmem:[#allocation34_spill] sm:$0xff] %v4976_v27  ;;  %6461 = vst [vmem:[#allocation38_spill] sm:$0xff] %v4988_v32  ;;  %v4991_v33 = vld [vmem:[#allocation7 + $0x88] ss:$16 sps:$4 sm:$0xff]  }
 0x387   :  { %v4804_v31 = vadd.f32 %v1321_v30, %v1320_v29  ;;  %v4982_v29 = vld [vmem:[#allocation7 + $0x84] ss:$16 sps:$4 sm:$0xff]   ;;  %v4985_v30 = vld [vmem:[#allocation7 + $0x8c] ss:$16 sps:$4 sm:$0xff]   ;;  %6462 = vst [vmem:[#allocation39_spill] sm:$0xff] %v4991_v33 }
 0x388   :  { %6459 = vst [vmem:[#allocation36_spill] sm:$0xff] %v4982_v29  ;;  %6460 = vst [vmem:[#allocation37_spill] sm:$0xff] %v4985_v30 }
 0x389   :  { %3556 = vtanh.f32 %v4804_v31 }
 0x393   :  { %v3557_v35 = vpop.eup %3556 }
 0x394   :  { %v1324_v36 = vmul.f32 %v3557_v35, %v1319_v34  ;;  %v4994_v34 = vld [vmem:[#allocation7 + $0xa4] ss:$16 sps:$4 sm:$0xff]   ;;  %v4997_v35 = vld [vmem:[#allocation7 + $0xac] ss:$16 sps:$4 sm:$0xff]  }
 0x395   :  { %6463 = vst [vmem:[#allocation40_spill] sm:$0xff] %v4994_v34  ;;  %6464 = vst [vmem:[#allocation41_spill] sm:$0xff] %v4997_v35 }
 0x396   :  { %v1325_v37 = vpack.c.bf16 %v1324_v36, %v1324_v36  ;;  %v5000_v36 = vld [vmem:[#allocation7 + $0xa0] ss:$16 sps:$4 sm:$0xff]  }
 0x397   :  { %6465 = vst [vmem:[#allocation42_spill] sm:$0xff] %v5000_v36 }
 0x398   :  { %1359 = vmatmul.mubr.bf16.vlgmr.msra.gmra.mrb[20].mxu0 %v1325_v37  ;;  %1400 = vmatmul.mubr.bf16.vlgmr.msra.gmra.mrb[20].mxu1 %v1325_v37 }
 0x399   :  { %1430 = vmatpush1.bf16.msra.mxu0 %v4630_v2  ;;  %1471 = vmatpush1.bf16.msra.mxu1 %v4636_v57 }
 0x39a   :  { %1431 = vmatprep.subr.bf16.mxu0 %v4642_v61  ;;  %1472 = vmatprep.subr.bf16.mxu1 %v4648_v50 }
 0x39b   :  { %1461 = vmatprep.mubr.bf16.mxu0 %v6345_v59  ;;  %1502 = vmatprep.mubr.bf16.mxu1 %v6345_v59 }
 0x39d   :  { %1432 = vmatpush1.bf16.msra.mxu0 %v4656_v0  ;;  %1473 = vmatpush1.bf16.msra.mxu1 %v4662_v56 }
 0x39e   :  { %1433 = vmatprep.subr.bf16.mxu0 %v4668_v49  ;;  %1474 = vmatprep.subr.bf16.mxu1 %v4674_v52 }
 0x3a1   :  { %1434 = vmatpush1.bf16.msra.mxu0 %v4680_v10  ;;  %1475 = vmatpush1.bf16.msra.mxu1 %v4686_v48 }
 0x3a2   :  { %1435 = vmatprep.subr.bf16.mxu0 %v4692_v9  ;;  %1476 = vmatprep.subr.bf16.mxu1 %v4823_v13 }
 0x3a5   :  { %1436 = vmatpush1.bf16.msra.mxu0 %v4829_v39  ;;  %1477 = vmatpush1.bf16.msra.mxu1 %v4835_v40 }
 0x3a6   :  { %1437 = vmatprep.subr.bf16.mxu0 %v4841_v41  ;;  %1478 = vmatprep.subr.bf16.mxu1 %v4847_v42 }
 0x3a9   :  { %1438 = vmatpush1.bf16.msra.mxu0 %v4853_v43  ;;  %1479 = vmatpush1.bf16.msra.mxu1 %v4859_v44 }
 0x3aa   :  { %1439 = vmatprep.subr.bf16.mxu0 %v4865_v45  ;;  %1480 = vmatprep.subr.bf16.mxu1 %v4871_v46 }
 0x3ad   :  { %1440 = vmatpush1.bf16.msra.mxu0 %v4877_v47  ;;  %1481 = vmatpush1.bf16.msra.mxu1 %v4883_v3 }
 0x3ae   :  { %1441 = vmatprep.subr.bf16.mxu0 %v4889_v4  ;;  %1482 = vmatprep.subr.bf16.mxu1 %v4895_v5 }
 0x3b1   :  { %1442 = vmatpush1.bf16.msra.mxu0 %v4901_v6  ;;  %1483 = vmatpush1.bf16.msra.mxu1 %v4907_v7 }
 0x3b2   :  { %1443 = vmatprep.subr.bf16.mxu0 %v4913_v8  ;;  %1484 = vmatprep.subr.bf16.mxu1 %v4919_v55 }
 0x3b5   :  { %1444 = vmatpush1.bf16.msra.mxu0 %v4925_v1  ;;  %1485 = vmatpush1.bf16.msra.mxu1 %v4931_v53 }
 0x3b6   :  { %1560 = vmatprep.subr.bf16.mxu0 %v4934_v62  ;;  %1601 = vmatprep.subr.bf16.mxu1 %v4937_v51 }
 0x3b8   :  { %1462 = vmatmul.mubr.bf16.vlgmr.msra.gmra.mrb[24].mxu0 %v1325_v37  ;;  %1503 = vmatmul.mubr.bf16.vlgmr.msra.gmra.mrb[24].mxu1 %v1325_v37  ;;  %v5003_v37 = vld [vmem:[#allocation7 + $0xa8] ss:$16 sps:$4 sm:$0xff]  }
 0x3b9   :  { %1561 = vmatpush1.bf16.msra.mxu0 %v4940_v11  ;;  %1602 = vmatpush1.bf16.msra.mxu1 %v4943_v14  ;;  %6466 = vst [vmem:[#allocation43_spill] sm:$0xff] %v5003_v37 }
 0x3ba   :  { %1562 = vmatprep.subr.bf16.mxu0 %v4946_v15  ;;  %1603 = vmatprep.subr.bf16.mxu1 %v4949_v16 }
 0x3bd   :  { %1563 = vmatpush1.bf16.msra.mxu0 %v4952_v17  ;;  %1604 = vmatpush1.bf16.msra.mxu1 %v4955_v18 }
 0x3be   :  { %1564 = vmatprep.subr.bf16.mxu0 %v4958_v19  ;;  %1605 = vmatprep.subr.bf16.mxu1 %v4961_v20 }
 0x3c1   :  { %1565 = vmatpush1.bf16.msra.mxu0 %v4964_v21  ;;  %1606 = vmatpush1.bf16.msra.mxu1 %v4967_v22 }
 0x3c2   :  { %1566 = vmatprep.subr.bf16.mxu0 %v4970_v24  ;;  %1607 = vmatprep.subr.bf16.mxu1 %v4973_v26 }
 0x3c5   :  { %1567 = vmatpush1.bf16.msra.mxu0 %v4976_v27  ;;  %1608 = vmatpush1.bf16.msra.mxu1 %v4979_v28 }
 0x3c6   :  { %1568 = vmatprep.subr.bf16.mxu0 %v4982_v29  ;;  %1609 = vmatprep.subr.bf16.mxu1 %v4985_v30 }
 0x3c9   :  { %1569 = vmatpush1.bf16.msra.mxu0 %v4988_v32  ;;  %1610 = vmatpush1.bf16.msra.mxu1 %v4991_v33  ;;  %v5006_v32 = vld [vmem:[#allocation7 + $0xc4] ss:$16 sps:$4 sm:$0xff]   ;;  %v5009_v33 = vld [vmem:[#allocation7 + $0xcc] ss:$16 sps:$4 sm:$0xff]  }
 0x3ca   :  { %1570 = vmatprep.subr.bf16.mxu0 %v4994_v34  ;;  %1611 = vmatprep.subr.bf16.mxu1 %v4997_v35  ;;  %6467 = vst [vmem:[#allocation44_spill] sm:$0xff] %v5006_v32  ;;  %6468 = vst [vmem:[#allocation45_spill] sm:$0xff] %v5009_v33  ;;  %v5012_v34 = vld [vmem:[#allocation7 + $0xc0] ss:$16 sps:$4 sm:$0xff]   ;;  %v5015_v35 = vld [vmem:[#allocation7 + $0xc8] ss:$16 sps:$4 sm:$0xff]  }
 0x3cb   :  { %6469 = vst [vmem:[#allocation46_spill] sm:$0xff] %v5012_v34  ;;  %6470 = vst [vmem:[#allocation47_spill] sm:$0xff] %v5015_v35 }
 0x3cd   :  { %1571 = vmatpush1.bf16.msra.mxu0 %v5000_v36  ;;  %1612 = vmatpush1.bf16.msra.mxu1 %v5003_v37  ;;  %v5018_v36 = vld [vmem:[#allocation7 + $0xe4] ss:$16 sps:$4 sm:$0xff]   ;;  %v5021_v37 = vld [vmem:[#allocation7 + $0xec] ss:$16 sps:$4 sm:$0xff]  }
 0x3ce   :  { %1572 = vmatprep.subr.bf16.mxu0 %v5006_v32  ;;  %1613 = vmatprep.subr.bf16.mxu1 %v5009_v33  ;;  %6471 = vst [vmem:[#allocation48_spill] sm:$0xff] %v5018_v36  ;;  %6472 = vst [vmem:[#allocation49_spill] sm:$0xff] %v5021_v37  ;;  %v5024_v32 = vld [vmem:[#allocation7 + $0xe0] ss:$16 sps:$4 sm:$0xff]   ;;  %v5027_v33 = vld [vmem:[#allocation7 + $0xe8] ss:$16 sps:$4 sm:$0xff]  }
 0x3cf   :  { %6473 = vst [vmem:[#allocation50_spill] sm:$0xff] %v5024_v32  ;;  %6474 = vst [vmem:[#allocation51_spill] sm:$0xff] %v5027_v33 }
 0x3d1   :  { %1573 = vmatpush1.bf16.msra.mxu0 %v5012_v34  ;;  %1614 = vmatpush1.bf16.msra.mxu1 %v5015_v35  ;;  %v5030_v34 = vld [vmem:[#allocation7 + $0x104] ss:$16 sps:$4 sm:$0xff]   ;;  %v5033_v35 = vld [vmem:[#allocation7 + $0x10c] ss:$16 sps:$4 sm:$0xff]  }
 0x3d2   :  { %1574 = vmatprep.subr.bf16.mxu0 %v5018_v36  ;;  %1615 = vmatprep.subr.bf16.mxu1 %v5021_v37  ;;  %6475 = vst [vmem:[#allocation52_spill] sm:$0xff] %v5030_v34  ;;  %6476 = vst [vmem:[#allocation53_spill] sm:$0xff] %v5033_v35  ;;  %v5036_v36 = vld [vmem:[#allocation7 + $0x100] ss:$16 sps:$4 sm:$0xff]   ;;  %v5039_v37 = vld [vmem:[#allocation7 + $0x108] ss:$16 sps:$4 sm:$0xff]  }
 0x3d3   :  { %6477 = vst [vmem:[#allocation54_spill] sm:$0xff] %v5036_v36  ;;  %6478 = vst [vmem:[#allocation55_spill] sm:$0xff] %v5039_v37 }
 0x3d5   :  { %1575 = vmatpush1.bf16.msra.mxu0 %v5024_v32  ;;  %1616 = vmatpush1.bf16.msra.mxu1 %v5027_v33  ;;  %v5042_v32 = vld [vmem:[#allocation7 + $0x124] ss:$16 sps:$4 sm:$0xff]   ;;  %v5045_v33 = vld [vmem:[#allocation7 + $0x12c] ss:$16 sps:$4 sm:$0xff]  }
 0x3d6   :  { %1576 = vmatprep.subr.bf16.mxu0 %v5030_v34  ;;  %1617 = vmatprep.subr.bf16.mxu1 %v5033_v35  ;;  %6479 = vst [vmem:[#allocation56_spill] sm:$0xff] %v5042_v32  ;;  %6480 = vst [vmem:[#allocation57_spill] sm:$0xff] %v5045_v33  ;;  %v5048_v34 = vld [vmem:[#allocation7 + $0x120] ss:$16 sps:$4 sm:$0xff]   ;;  %v5051_v35 = vld [vmem:[#allocation7 + $0x128] ss:$16 sps:$4 sm:$0xff]  }
 0x3d7   :  { %6481 = vst [vmem:[#allocation58_spill] sm:$0xff] %v5048_v34  ;;  %6482 = vst [vmem:[#allocation59_spill] sm:$0xff] %v5051_v35 }
 0x3d9   :  { %1577 = vmatpush1.bf16.msra.mxu0 %v5036_v36  ;;  %1618 = vmatpush1.bf16.msra.mxu1 %v5039_v37  ;;  %v5054_v36 = vld [vmem:[#allocation7 + $0x144] ss:$16 sps:$4 sm:$0xff]   ;;  %v5057_v37 = vld [vmem:[#allocation7 + $0x14c] ss:$16 sps:$4 sm:$0xff]  }
 0x3da   :  { %1578 = vmatprep.subr.bf16.mxu0 %v5042_v32  ;;  %1619 = vmatprep.subr.bf16.mxu1 %v5045_v33  ;;  %6483 = vst [vmem:[#allocation60_spill] sm:$0xff] %v5054_v36  ;;  %6484 = vst [vmem:[#allocation61_spill] sm:$0xff] %v5057_v37  ;;  %v5060_v32 = vld [vmem:[#allocation7 + $0x140] ss:$16 sps:$4 sm:$0xff]   ;;  %v5063_v33 = vld [vmem:[#allocation7 + $0x148] ss:$16 sps:$4 sm:$0xff]  }
 0x3db   :  { %6485 = vst [vmem:[#allocation62_spill] sm:$0xff] %v5060_v32  ;;  %6486 = vst [vmem:[#allocation63_spill] sm:$0xff] %v5063_v33 }
 0x3dd   :  { %1579 = vmatpush1.bf16.msra.mxu0 %v5048_v34  ;;  %1620 = vmatpush1.bf16.msra.mxu1 %v5051_v35  ;;  %v5066_v34 = vld [vmem:[#allocation7 + $0x164] ss:$16 sps:$4 sm:$0xff]   ;;  %v5069_v35 = vld [vmem:[#allocation7 + $0x16c] ss:$16 sps:$4 sm:$0xff]  }
 0x3de   :  { %1580 = vmatprep.subr.bf16.mxu0 %v5054_v36  ;;  %1621 = vmatprep.subr.bf16.mxu1 %v5057_v37  ;;  %6487 = vst [vmem:[#allocation64_spill] sm:$0xff] %v5066_v34  ;;  %6488 = vst [vmem:[#allocation65_spill] sm:$0xff] %v5069_v35  ;;  %v5072_v36 = vld [vmem:[#allocation7 + $0x160] ss:$16 sps:$4 sm:$0xff]   ;;  %v5075_v37 = vld [vmem:[#allocation7 + $0x168] ss:$16 sps:$4 sm:$0xff]  }
 0x3df   :  { %6489 = vst [vmem:[#allocation66_spill] sm:$0xff] %v5072_v36  ;;  %6490 = vst [vmem:[#allocation67_spill] sm:$0xff] %v5075_v37 }
 0x3e1   :  { %1581 = vmatpush1.bf16.msra.mxu0 %v5060_v32  ;;  %1622 = vmatpush1.bf16.msra.mxu1 %v5063_v33  ;;  %v5078_v32 = vld [vmem:[#allocation7 + $0x184] ss:$16 sps:$4 sm:$0xff]   ;;  %v5081_v33 = vld [vmem:[#allocation7 + $0x18c] ss:$16 sps:$4 sm:$0xff]  }
 0x3e2   :  { %1582 = vmatprep.subr.bf16.mxu0 %v5066_v34  ;;  %1623 = vmatprep.subr.bf16.mxu1 %v5069_v35  ;;  %6491 = vst [vmem:[#allocation68_spill] sm:$0xff] %v5078_v32  ;;  %6492 = vst [vmem:[#allocation69_spill] sm:$0xff] %v5081_v33  ;;  %v5084_v34 = vld [vmem:[#allocation7 + $0x180] ss:$16 sps:$4 sm:$0xff]   ;;  %v5087_v35 = vld [vmem:[#allocation7 + $0x188] ss:$16 sps:$4 sm:$0xff]  }
 0x3e3   :  { %6493 = vst [vmem:[#allocation70_spill] sm:$0xff] %v5084_v34  ;;  %6494 = vst [vmem:[#allocation71_spill] sm:$0xff] %v5087_v35 }
 0x3e5   :  { %1583 = vmatpush1.bf16.msra.mxu0 %v5072_v36  ;;  %1624 = vmatpush1.bf16.msra.mxu1 %v5075_v37  ;;  %v5090_v36 = vld [vmem:[#allocation7 + $0x1a4] ss:$16 sps:$4 sm:$0xff]   ;;  %v5093_v37 = vld [vmem:[#allocation7 + $0x1ac] ss:$16 sps:$4 sm:$0xff]  }
 0x3e6   :  { %1584 = vmatprep.subr.bf16.mxu0 %v5078_v32  ;;  %1625 = vmatprep.subr.bf16.mxu1 %v5081_v33  ;;  %6495 = vst [vmem:[#allocation72_spill] sm:$0xff] %v5090_v36  ;;  %6496 = vst [vmem:[#allocation73_spill] sm:$0xff] %v5093_v37  ;;  %v5096_v32 = vld [vmem:[#allocation7 + $0x1a0] ss:$16 sps:$4 sm:$0xff]   ;;  %v5099_v33 = vld [vmem:[#allocation7 + $0x1a8] ss:$16 sps:$4 sm:$0xff]  }
 0x3e7   :  { %6497 = vst [vmem:[#allocation74_spill] sm:$0xff] %v5096_v32  ;;  %6498 = vst [vmem:[#allocation29_spill] sm:$0xff] %v5099_v33 }
 0x3e9   :  { %1585 = vmatpush1.bf16.msra.mxu0 %v5084_v34  ;;  %1626 = vmatpush1.bf16.msra.mxu1 %v5087_v35  ;;  %v5102_v34 = vld [vmem:[#allocation7 + $0x1c4] ss:$16 sps:$4 sm:$0xff]   ;;  %v5105_v35 = vld [vmem:[#allocation7 + $0x1cc] ss:$16 sps:$4 sm:$0xff]  }
 0x3ea   :  { %1586 = vmatprep.subr.bf16.mxu0 %v5090_v36  ;;  %1627 = vmatprep.subr.bf16.mxu1 %v5093_v37  ;;  %6499 = vst [vmem:[#allocation77_spill] sm:$0xff] %v5102_v34  ;;  %6500 = vst [vmem:[#allocation78_spill] sm:$0xff] %v5105_v35  ;;  %v5108_v36 = vld [vmem:[#allocation7 + $0x1c0] ss:$16 sps:$4 sm:$0xff]   ;;  %v5111_v37 = vld [vmem:[#allocation7 + $0x1c8] ss:$16 sps:$4 sm:$0xff]  }
 0x3eb   :  { %6501 = vst [vmem:[#allocation79_spill] sm:$0xff] %v5108_v36  ;;  %6502 = vst [vmem:[#allocation80_spill] sm:$0xff] %v5111_v37 }
 0x3ed   :  { %1587 = vmatpush1.bf16.msra.mxu0 %v5096_v32  ;;  %1628 = vmatpush1.bf16.msra.mxu1 %v5099_v33  ;;  %v5114_v32 = vld [vmem:[#allocation7 + $0x1e4] ss:$16 sps:$4 sm:$0xff]   ;;  %v5117_v33 = vld [vmem:[#allocation7 + $0x1ec] ss:$16 sps:$4 sm:$0xff]  }
 0x3ee   :  { %1588 = vmatprep.subr.bf16.mxu0 %v5102_v34  ;;  %1629 = vmatprep.subr.bf16.mxu1 %v5105_v35  ;;  %6503 = vst [vmem:[#allocation81_spill] sm:$0xff] %v5114_v32  ;;  %6504 = vst [vmem:[#allocation82_spill] sm:$0xff] %v5117_v33  ;;  %v5120_v34 = vld [vmem:[#allocation7 + $0x1e0] ss:$16 sps:$4 sm:$0xff]   ;;  %v5123_v35 = vld [vmem:[#allocation7 + $0x1e8] ss:$16 sps:$4 sm:$0xff]  }
 0x3ef   :  { %6505 = vst [vmem:[#allocation83_spill] sm:$0xff] %v5120_v34  ;;  %6506 = vst [vmem:[#allocation84_spill] sm:$0xff] %v5123_v35 }
 0x3f1   :  { %1589 = vmatpush1.bf16.msra.mxu0 %v5108_v36  ;;  %1630 = vmatpush1.bf16.msra.mxu1 %v5111_v37 }
 0x3f2   :  { %1590 = vmatprep.subr.bf16.mxu0 %v5114_v32  ;;  %1631 = vmatprep.subr.bf16.mxu1 %v5117_v33 }
 0x3f5   :  { %1591 = vmatpush1.bf16.msra.mxu0 %v5120_v34  ;;  %1632 = vmatpush1.bf16.msra.mxu1 %v5123_v35 }
 0x3f6   :  { %1663 = vmatprep.subr.bf16.mxu0 %v4781_v58  ;;  %1704 = vmatprep.subr.bf16.mxu1 %v4787_v60 }
 0x46b   :  { %v1360_v37 = vpop.f32.mrb[20].mxu0  ;;  %v1401_v36 = vpop.f32.mrb[20].mxu1 }
 0x46c   :  { %v1361_v32 = vadd.f32 %v1360_v37, %v6448_v12  ;;  %v1362_v30 = vpop.f32.mrb[21].mxu0  ;;  %v1403_v29 = vpop.f32.mrb[21].mxu1  ;;  %v1402_v35 = vadd.f32 %v1401_v36, %v6449_v23 }
 0x46d   :  { %v1363_v33 = vadd.f32 %v1362_v30, %v4602_v63  ;;  %v1364_v28 = vpop.f32.mrb[22].mxu0  ;;  %v1405_v27 = vpop.f32.mrb[22].mxu1  ;;  %v1404_v60 = vadd.f32 %v1403_v29, %v6450_v25 }
 0x46e   :  { %v1408_v26 = vmul.f32 0.5, %v1361_v32  ;;  %v1365_v34 = vpop.f32.mrb[23].mxu0  ;;  %v1406_v24 = vpop.f32.mrb[23].mxu1 }
 0x46f   :  { %v1412_v22 = vmul.f32 0.5, %v1363_v33  ;;  %v1417_v58 = vmul.f32 0.5, %v1404_v60 }
 0x470   :  { %3558 = vtanh.f32 %v1408_v26 }
 0x471   :  { %3560 = vtanh.f32 %v1412_v22 }
 0x472   :  { %3562 = vtanh.f32 %v1402_v35 }
 0x473   :  { %3564 = vtanh.f32 %v1417_v58 }
 0x47a   :  { %v3559_v21 = vpop.eup %3558 }
 0x47b   :  { %v3561_v37 = vpop.eup %3560  ;;  %v1410_v12 = vmul.f32 0.5, %v3559_v21 }
 0x47c   :  { %v1414_v20 = vmul.f32 0.5, %v3561_v37  ;;  %v3563_v28 = vpop.eup %3562 }
 0x47d   :  { %v1411_v30 = vadd.f32 0.5, %v1410_v12  ;;  %v3565_v22 = vpop.eup %3564 }
 0x47e   :  { %v1415_v27 = vadd.f32 0.5, %v1414_v20  ;;  %v1419_v26 = vmul.f32 0.5, %v3565_v22 }
 0x47f   :  { %v1422_v32 = vmul.f32 %v3563_v28, %v1411_v30 }
 0x480   :  { %v1421_v24 = vmul.f32 %v1415_v27, %v4795_v38  ;;  %v1420_v36 = vadd.f32 0.5, %v1419_v26 }
 0x482   :  { %v5133_v33 = vadd.f32 %v1422_v32, %v1421_v24  ;;  %v3189_v32 = vld [vmem:[%s5984_s0 + $0x18] sm:$0xff] }
 0x484   :  { %6507 = vst [vmem:[#allocation85_spill] sm:$0xff] %v5133_v33  ;;  %3566 = vtanh.f32 %v5133_v33 }
 0x48b   :  { %v1463_v34 = vpop.f32.mrb[24].mxu0  ;;  %v1504_v29 = vpop.f32.mrb[24].mxu1 }
 0x48c   :  { %v1465_v60 = vpop.f32.mrb[25].mxu0  ;;  %v1506_v35 = vpop.f32.mrb[25].mxu1 }
 0x48d   :  { %v1515_v21 = vcombine.low %v1463_v34, %v1465_v60  ;;  %v1516_v37 = vcombine.low %v1504_v29, %v1506_v35  ;;  %v1467_v58 = vpop.f32.mrb[26].mxu0  ;;  %v1508_v12 = vpop.f32.mrb[26].mxu1 }
 0x48e   :  { %v3567_v25 = vpop.eup %3566  ;;  %v1468_v20 = vpop.f32.mrb[27].mxu0 }
 0x48f   :  { %v1509_v30 = vpop.f32.mrb[27].mxu1  ;;  %v1523_v38 = vrot.slane %v1515_v21, %v6402_v54  ;;  %v1530_v28 = vrot.slane %v1516_v37, %v6402_v54  ;;  %v1425_v27 = vmul.f32 %v3567_v25, %v1420_v36 }
 0x491   :  { %v1531_v24 = vcombine.low %v1523_v38, %v1530_v28  ;;  %v1426_v22 = vpack.c.bf16 %v1425_v27, %v1425_v27 }
 0x493   :  { %v1533_v33 = vadd.f32 %v3189_v32, %v1531_v24  ;;  %1592 = vmatprep.mubr.bf16.mxu0 %v1426_v22  ;;  %1633 = vmatprep.mubr.bf16.mxu1 %v1426_v22 }
 0x495   :  { %v1534_v26 = vmul.f32 0.5, %v1533_v33  ;;  %v1539_v34 = vrot.slane %v1533_v33, 2  ;;  %v1545_v60 = vrot.slane %v1533_v33, 4  ;;  %v1548_v35 = vrot.slane %v1533_v33, 6 }
 0x497   :  { %3568 = vtanh.f32 %v1534_v26  ;;  %v1541_v29 = vmul.f32 0.5, %v1539_v34  ;;  %v1550_v21 = vmul.f32 0.5, %v1548_v35  ;;  %v6522_v35 = vld [vmem:[#allocation43_spill] sm:$0xff] }
 0x499   :  { %3570 = vtanh.f32 %v1541_v29  ;;  %v6520_v29 = vld [vmem:[#allocation41_spill] sm:$0xff] }
 0x49a   :  { %3572 = vtanh.f32 %v1545_v60  ;;  %v6521_v60 = vld [vmem:[#allocation42_spill] sm:$0xff] }
 0x49b   :  { %3574 = vtanh.f32 %v1550_v21  ;;  %v6523_v21 = vld [vmem:[#allocation44_spill] sm:$0xff] }
 0x4a1   :  { %v3569_v37 = vpop.eup %3568 }
 0x4a2   :  { %v1536_v25 = vmul.f32 0.5, %v3569_v37  ;;  %v6524_v37 = vld [vmem:[#allocation45_spill] sm:$0xff] }
 0x4a3   :  { %v3571_v36 = vpop.eup %3570 }
 0x4a4   :  { %v1537_v58 = vadd.f32 0.5, %v1536_v25  ;;  %v1543_v12 = vmul.f32 0.5, %v3571_v36  ;;  %v3573_v30 = vpop.eup %3572  ;;  %v6525_v25 = vld [vmem:[#allocation46_spill] sm:$0xff]  ;;  %v6526_v36 = vld [vmem:[#allocation47_spill] sm:$0xff] }
 0x4a5   :  { %v3575_v32 = vpop.eup %3574 }
 0x4a6   :  { %v1544_v20 = vadd.f32 0.5, %v1543_v12  ;;  %v1555_v28 = vmul.f32 %v3573_v30, %v1537_v58  ;;  %v1552_v24 = vmul.f32 0.5, %v3575_v32  ;;  %v6527_v58 = vld [vmem:[#allocation48_spill] sm:$0xff]  ;;  %v6528_v12 = vld [vmem:[#allocation49_spill] sm:$0xff]  ;;  %v6530_v30 = vld [vmem:[#allocation51_spill] sm:$0xff] }
 0x4a7   :  { %v6533_v32 = vld [vmem:[#allocation54_spill] sm:$0xff] }
 0x4a8   :  { %v1554_v38 = vmul.f32 %v1544_v20, %v4804_v31  ;;  %v1553_v33 = vadd.f32 0.5, %v1552_v24  ;;  %v6519_v31 = vld [vmem:[#allocation40_spill] sm:$0xff]  ;;  %v6529_v20 = vld [vmem:[#allocation50_spill] sm:$0xff]  ;;  %v6534_v24 = vld [vmem:[#allocation55_spill] sm:$0xff] }
 0x4aa   :  { %v5142_v27 = vadd.f32 %v1555_v28, %v1554_v38  ;;  %v6531_v38 = vld [vmem:[#allocation52_spill] sm:$0xff]  ;;  %v6532_v28 = vld [vmem:[#allocation53_spill] sm:$0xff] }
 0x4ac   :  { %3576 = vtanh.f32 %v5142_v27 }
 0x4b6   :  { %v3577_v22 = vpop.eup %3576 }
 0x4b7   :  { %v1558_v26 = vmul.f32 %v3577_v22, %v1553_v33  ;;  %v6535_v33 = vld [vmem:[#allocation56_spill] sm:$0xff]  ;;  %v6536_v22 = vld [vmem:[#allocation57_spill] sm:$0xff] }
 0x4b9   :  { %v1559_v34 = vpack.c.bf16 %v1558_v26, %v1558_v26  ;;  %v6537_v26 = vld [vmem:[#allocation58_spill] sm:$0xff] }
 0x4bb   :  { %1593 = vmatmul.mubr.bf16.vlgmr.msra.gmra.mrb[28].mxu0 %v1559_v34  ;;  %1634 = vmatmul.mubr.bf16.vlgmr.msra.gmra.mrb[28].mxu1 %v1559_v34 }
 0x4bc   :  { %1664 = vmatpush1.bf16.msra.mxu0 %v4630_v2  ;;  %1705 = vmatpush1.bf16.msra.mxu1 %v4636_v57  ;;  %v6508_v2 = vld [vmem:[#allocation24_spill] sm:$0xff]  ;;  %v6509_v57 = vld [vmem:[#allocation25_spill] sm:$0xff] }
 0x4bd   :  { %1665 = vmatprep.subr.bf16.mxu0 %v4642_v61  ;;  %1706 = vmatprep.subr.bf16.mxu1 %v4648_v50  ;;  %v6510_v61 = vld [vmem:[#allocation76_spill] sm:$0xff] }
 0x4be   :  { %1695 = vmatprep.mubr.bf16.mxu0 %v6345_v59  ;;  %1736 = vmatprep.mubr.bf16.mxu1 %v6345_v59  ;;  %v6511_v50 = vld [vmem:[#allocation32_spill] sm:$0xff] }
 0x4c0   :  { %1666 = vmatpush1.bf16.msra.mxu0 %v4656_v0  ;;  %1707 = vmatpush1.bf16.msra.mxu1 %v4662_v56  ;;  %v6512_v0 = vld [vmem:[#allocation33_spill] sm:$0xff]  ;;  %v6513_v56 = vld [vmem:[#allocation34_spill] sm:$0xff] }
 0x4c1   :  { %1667 = vmatprep.subr.bf16.mxu0 %v4668_v49  ;;  %1708 = vmatprep.subr.bf16.mxu1 %v4674_v52  ;;  %v6514_v49 = vld [vmem:[#allocation35_spill] sm:$0xff]  ;;  %v6515_v52 = vld [vmem:[#allocation36_spill] sm:$0xff] }
 0x4c4   :  { %1668 = vmatpush1.bf16.msra.mxu0 %v4680_v10  ;;  %1709 = vmatpush1.bf16.msra.mxu1 %v4686_v48  ;;  %v6516_v10 = vld [vmem:[#allocation37_spill] sm:$0xff]  ;;  %v6517_v48 = vld [vmem:[#allocation38_spill] sm:$0xff] }
 0x4c5   :  { %1669 = vmatprep.subr.bf16.mxu0 %v4692_v9  ;;  %1710 = vmatprep.subr.bf16.mxu1 %v4823_v13  ;;  %v6518_v9 = vld [vmem:[#allocation39_spill] sm:$0xff] }
 0x4c8   :  { %1670 = vmatpush1.bf16.msra.mxu0 %v4829_v39  ;;  %1711 = vmatpush1.bf16.msra.mxu1 %v4835_v40 }
 0x4c9   :  { %1671 = vmatprep.subr.bf16.mxu0 %v4841_v41  ;;  %1712 = vmatprep.subr.bf16.mxu1 %v4847_v42 }
 0x4cc   :  { %1672 = vmatpush1.bf16.msra.mxu0 %v4853_v43  ;;  %1713 = vmatpush1.bf16.msra.mxu1 %v4859_v44 }
 0x4cd   :  { %1673 = vmatprep.subr.bf16.mxu0 %v4865_v45  ;;  %1714 = vmatprep.subr.bf16.mxu1 %v4871_v46 }
 0x4d0   :  { %1674 = vmatpush1.bf16.msra.mxu0 %v4877_v47  ;;  %1715 = vmatpush1.bf16.msra.mxu1 %v4883_v3 }
 0x4d1   :  { %1675 = vmatprep.subr.bf16.mxu0 %v4889_v4  ;;  %1716 = vmatprep.subr.bf16.mxu1 %v4895_v5 }
 0x4d4   :  { %1676 = vmatpush1.bf16.msra.mxu0 %v4901_v6  ;;  %1717 = vmatpush1.bf16.msra.mxu1 %v4907_v7 }
 0x4d5   :  { %1677 = vmatprep.subr.bf16.mxu0 %v4913_v8  ;;  %1718 = vmatprep.subr.bf16.mxu1 %v4919_v55 }
 0x4d8   :  { %1678 = vmatpush1.bf16.msra.mxu0 %v4925_v1  ;;  %1719 = vmatpush1.bf16.msra.mxu1 %v4931_v53 }
 0x4d9   :  { %1794 = vmatprep.subr.bf16.mxu0 %v4934_v62  ;;  %1835 = vmatprep.subr.bf16.mxu1 %v4937_v51 }
 0x4db   :  { %1696 = vmatmul.mubr.bf16.vlgmr.msra.gmra.mrb[32].mxu0 %v1559_v34  ;;  %1737 = vmatmul.mubr.bf16.vlgmr.msra.gmra.mrb[32].mxu1 %v1559_v34  ;;  %v6538_v34 = vld [vmem:[#allocation59_spill] sm:$0xff] }
 0x4dc   :  { %1795 = vmatpush1.bf16.msra.mxu0 %v4940_v11  ;;  %1836 = vmatpush1.bf16.msra.mxu1 %v4943_v14 }
 0x4dd   :  { %1796 = vmatprep.subr.bf16.mxu0 %v4946_v15  ;;  %1837 = vmatprep.subr.bf16.mxu1 %v4949_v16 }
 0x4e0   :  { %1797 = vmatpush1.bf16.msra.mxu0 %v4952_v17  ;;  %1838 = vmatpush1.bf16.msra.mxu1 %v4955_v18 }
 0x4e1   :  { %1798 = vmatprep.subr.bf16.mxu0 %v4958_v19  ;;  %1839 = vmatprep.subr.bf16.mxu1 %v6508_v2 }
 0x4e4   :  { %1799 = vmatpush1.bf16.msra.mxu0 %v6509_v57  ;;  %1840 = vmatpush1.bf16.msra.mxu1 %v6510_v61 }
 0x4e5   :  { %1800 = vmatprep.subr.bf16.mxu0 %v6511_v50  ;;  %1841 = vmatprep.subr.bf16.mxu1 %v6512_v0 }
 0x4e8   :  { %1801 = vmatpush1.bf16.msra.mxu0 %v6513_v56  ;;  %1842 = vmatpush1.bf16.msra.mxu1 %v6514_v49 }
 0x4e9   :  { %1802 = vmatprep.subr.bf16.mxu0 %v6515_v52  ;;  %1843 = vmatprep.subr.bf16.mxu1 %v6516_v10 }
 0x4ec   :  { %1803 = vmatpush1.bf16.msra.mxu0 %v6517_v48  ;;  %1844 = vmatpush1.bf16.msra.mxu1 %v6518_v9 }
 0x4ed   :  { %1804 = vmatprep.subr.bf16.mxu0 %v6519_v31  ;;  %1845 = vmatprep.subr.bf16.mxu1 %v6520_v29 }
 0x4f0   :  { %1805 = vmatpush1.bf16.msra.mxu0 %v6521_v60  ;;  %1846 = vmatpush1.bf16.msra.mxu1 %v6522_v35 }
 0x4f1   :  { %1806 = vmatprep.subr.bf16.mxu0 %v6523_v21  ;;  %1847 = vmatprep.subr.bf16.mxu1 %v6524_v37 }
 0x4f4   :  { %1807 = vmatpush1.bf16.msra.mxu0 %v6525_v25  ;;  %1848 = vmatpush1.bf16.msra.mxu1 %v6526_v36 }
 0x4f5   :  { %1808 = vmatprep.subr.bf16.mxu0 %v6527_v58  ;;  %1849 = vmatprep.subr.bf16.mxu1 %v6528_v12  ;;  %v6539_v12 = vld [vmem:[#allocation60_spill] sm:$0xff]  ;;  %v6565_v58 = vld [vmem:[#allocation26_spill] sm:$0xff] }
 0x4f8   :  { %1809 = vmatpush1.bf16.msra.mxu0 %v6529_v20  ;;  %1850 = vmatpush1.bf16.msra.mxu1 %v6530_v30  ;;  %v6540_v20 = vld [vmem:[#allocation61_spill] sm:$0xff]  ;;  %v6541_v30 = vld [vmem:[#allocation62_spill] sm:$0xff] }
 0x4f9   :  { %1810 = vmatprep.subr.bf16.mxu0 %v6531_v38  ;;  %1851 = vmatprep.subr.bf16.mxu1 %v6532_v28  ;;  %v6542_v38 = vld [vmem:[#allocation63_spill] sm:$0xff]  ;;  %v6543_v28 = vld [vmem:[#allocation64_spill] sm:$0xff] }
 0x4fc   :  { %1811 = vmatpush1.bf16.msra.mxu0 %v6533_v32  ;;  %1852 = vmatpush1.bf16.msra.mxu1 %v6534_v24  ;;  %v6544_v32 = vld [vmem:[#allocation65_spill] sm:$0xff]  ;;  %v6545_v24 = vld [vmem:[#allocation66_spill] sm:$0xff] }
 0x4fd   :  { %1812 = vmatprep.subr.bf16.mxu0 %v6535_v33  ;;  %1853 = vmatprep.subr.bf16.mxu1 %v6536_v22  ;;  %v6546_v33 = vld [vmem:[#allocation67_spill] sm:$0xff]  ;;  %v6547_v22 = vld [vmem:[#allocation68_spill] sm:$0xff] }
 0x500   :  { %1813 = vmatpush1.bf16.msra.mxu0 %v6537_v26  ;;  %1854 = vmatpush1.bf16.msra.mxu1 %v6538_v34  ;;  %v6548_v26 = vld [vmem:[#allocation69_spill] sm:$0xff]  ;;  %v6549_v34 = vld [vmem:[#allocation70_spill] sm:$0xff] }
 0x501   :  { %1814 = vmatprep.subr.bf16.mxu0 %v6539_v12  ;;  %1855 = vmatprep.subr.bf16.mxu1 %v6540_v20  ;;  %v6550_v12 = vld [vmem:[#allocation71_spill] sm:$0xff]  ;;  %v6551_v20 = vld [vmem:[#allocation72_spill] sm:$0xff] }
 0x504   :  { %1815 = vmatpush1.bf16.msra.mxu0 %v6541_v30  ;;  %1856 = vmatpush1.bf16.msra.mxu1 %v6542_v38  ;;  %v6552_v30 = vld [vmem:[#allocation73_spill] sm:$0xff]  ;;  %v6553_v38 = vld [vmem:[#allocation74_spill] sm:$0xff] }
 0x505   :  { %1816 = vmatprep.subr.bf16.mxu0 %v6543_v28  ;;  %1857 = vmatprep.subr.bf16.mxu1 %v6544_v32  ;;  %v6554_v28 = vld [vmem:[#allocation29_spill] sm:$0xff] }
 0x506   :  { %v6555_v32 = vld [vmem:[#allocation77_spill] sm:$0xff] }
 0x508   :  { %1817 = vmatpush1.bf16.msra.mxu0 %v6545_v24  ;;  %1858 = vmatpush1.bf16.msra.mxu1 %v6546_v33  ;;  %v6556_v24 = vld [vmem:[#allocation78_spill] sm:$0xff]  ;;  %v6557_v33 = vld [vmem:[#allocation79_spill] sm:$0xff] }
 0x509   :  { %1818 = vmatprep.subr.bf16.mxu0 %v6547_v22  ;;  %1859 = vmatprep.subr.bf16.mxu1 %v6548_v26  ;;  %v6558_v22 = vld [vmem:[#allocation80_spill] sm:$0xff]  ;;  %v6559_v26 = vld [vmem:[#allocation81_spill] sm:$0xff] }
 0x50c   :  { %1819 = vmatpush1.bf16.msra.mxu0 %v6549_v34  ;;  %1860 = vmatpush1.bf16.msra.mxu1 %v6550_v12  ;;  %v6560_v34 = vld [vmem:[#allocation82_spill] sm:$0xff]  ;;  %v6561_v12 = vld [vmem:[#allocation83_spill] sm:$0xff] }
 0x50d   :  { %1820 = vmatprep.subr.bf16.mxu0 %v6551_v20  ;;  %1861 = vmatprep.subr.bf16.mxu1 %v6552_v30  ;;  %v6562_v20 = vld [vmem:[#allocation84_spill] sm:$0xff]  ;;  %v6563_v30 = vld [vmem:[#allocation30_spill] sm:$0xff] }
 0x510   :  { %1821 = vmatpush1.bf16.msra.mxu0 %v6553_v38  ;;  %1862 = vmatpush1.bf16.msra.mxu1 %v6554_v28  ;;  %v6564_v38 = vld [vmem:[#allocation31_spill] sm:$0xff] }
 0x511   :  { %1822 = vmatprep.subr.bf16.mxu0 %v6555_v32  ;;  %1863 = vmatprep.subr.bf16.mxu1 %v6556_v24 }
 0x514   :  { %1823 = vmatpush1.bf16.msra.mxu0 %v6557_v33  ;;  %1864 = vmatpush1.bf16.msra.mxu1 %v6558_v22 }
 0x515   :  { %1824 = vmatprep.subr.bf16.mxu0 %v6559_v26  ;;  %1865 = vmatprep.subr.bf16.mxu1 %v6560_v34 }
 0x518   :  { %1825 = vmatpush1.bf16.msra.mxu0 %v6561_v12  ;;  %1866 = vmatpush1.bf16.msra.mxu1 %v6562_v20 }
 0x519   :  { %1897 = vmatprep.subr.bf16.mxu0 %v6563_v30  ;;  %1938 = vmatprep.subr.bf16.mxu1 %v6564_v38  ;;  %v6566_v30 = vld [vmem:[#allocation28_spill] sm:$0xff] }
 0x58e   :  { %v1594_v28 = vpop.f32.mrb[28].mxu0  ;;  %v1635_v32 = vpop.f32.mrb[28].mxu1 }
 0x58f   :  { %v1595_v24 = vadd.f32 %v1594_v28, %v6565_v58  ;;  %v1596_v36 = vpop.f32.mrb[29].mxu0  ;;  %v1637_v33 = vpop.f32.mrb[29].mxu1  ;;  %v1636_v20 = vadd.f32 %v1635_v32, %v6449_v23 }
 0x590   :  { %v1597_v22 = vadd.f32 %v1596_v36, %v4602_v63  ;;  %v1598_v25 = vpop.f32.mrb[30].mxu0  ;;  %v1639_v26 = vpop.f32.mrb[30].mxu1  ;;  %v1638_v38 = vadd.f32 %v1637_v33, %v6566_v30 }
 0x591   :  { %v1642_v37 = vmul.f32 0.5, %v1595_v24  ;;  %v1599_v34 = vpop.f32.mrb[31].mxu0  ;;  %v1640_v21 = vpop.f32.mrb[31].mxu1 }
 0x592   :  { %v1646_v12 = vmul.f32 0.5, %v1597_v22  ;;  %v1651_v35 = vmul.f32 0.5, %v1638_v38  ;;  %v6567_v34 = vld [vmem:[#allocation85_spill] sm:$0xff] }
 0x593   :  { %3578 = vtanh.f32 %v1642_v37 }
 0x594   :  { %3580 = vtanh.f32 %v1646_v12 }
 0x595   :  { %3582 = vtanh.f32 %v1636_v20 }
 0x596   :  { %3584 = vtanh.f32 %v1651_v35 }
 0x59d   :  { %v3579_v60 = vpop.eup %3578 }
 0x59e   :  { %v3581_v28 = vpop.eup %3580  ;;  %v1644_v58 = vmul.f32 0.5, %v3579_v60 }
 0x59f   :  { %v1648_v29 = vmul.f32 0.5, %v3581_v28  ;;  %v3583_v25 = vpop.eup %3582 }
 0x5a0   :  { %v1645_v36 = vadd.f32 0.5, %v1644_v58  ;;  %v3585_v37 = vpop.eup %3584 }
 0x5a1   :  { %v1649_v26 = vadd.f32 0.5, %v1648_v29  ;;  %v1653_v12 = vmul.f32 0.5, %v3585_v37 }
 0x5a2   :  { %v1656_v24 = vmul.f32 %v3583_v25, %v1645_v36 }
 0x5a3   :  { %v1655_v21 = vmul.f32 %v1649_v26, %v6567_v34  ;;  %v1654_v30 = vadd.f32 0.5, %v1653_v12  ;;  %v3190_v34 = vld [vmem:[%s5984_s0 + $0x20] sm:$0xff] }
 0x5a5   :  { %v5248_v22 = vadd.f32 %v1656_v24, %v1655_v21 }
 0x5a7   :  { %6568 = vst [vmem:[#allocation24_spill] sm:$0xff] %v5248_v22  ;;  %3586 = vtanh.f32 %v5248_v22 }
 0x5ae   :  { %v1697_v20 = vpop.f32.mrb[32].mxu0  ;;  %v1738_v32 = vpop.f32.mrb[32].mxu1 }
 0x5af   :  { %v1699_v33 = vpop.f32.mrb[33].mxu0  ;;  %v1740_v38 = vpop.f32.mrb[33].mxu1 }
 0x5b0   :  { %v1749_v60 = vcombine.low %v1697_v20, %v1699_v33  ;;  %v1750_v28 = vcombine.low %v1738_v32, %v1740_v38  ;;  %v1701_v35 = vpop.f32.mrb[34].mxu0  ;;  %v1742_v58 = vpop.f32.mrb[34].mxu1 }
 0x5b1   :  { %v3587_v23 = vpop.eup %3586  ;;  %v1702_v29 = vpop.f32.mrb[35].mxu0 }
 0x5b2   :  { %v1743_v36 = vpop.f32.mrb[35].mxu1  ;;  %v1757_v25 = vrot.slane %v1749_v60, %v6402_v54  ;;  %v1764_v26 = vrot.slane %v1750_v28, %v6402_v54  ;;  %v1659_v24 = vmul.f32 %v3587_v23, %v1654_v30 }
 0x5b4   :  { %v1765_v21 = vcombine.low %v1757_v25, %v1764_v26  ;;  %v1660_v37 = vpack.c.bf16 %v1659_v24, %v1659_v24 }
 0x5b6   :  { %v1767_v22 = vadd.f32 %v3190_v34, %v1765_v21  ;;  %1826 = vmatprep.mubr.bf16.mxu0 %v1660_v37  ;;  %1867 = vmatprep.mubr.bf16.mxu1 %v1660_v37 }
 0x5b8   :  { %v1768_v12 = vmul.f32 0.5, %v1767_v22  ;;  %v1773_v20 = vrot.slane %v1767_v22, 2  ;;  %v1779_v33 = vrot.slane %v1767_v22, 4  ;;  %v1782_v38 = vrot.slane %v1767_v22, 6 }
 0x5ba   :  { %3588 = vtanh.f32 %v1768_v12  ;;  %v1775_v32 = vmul.f32 0.5, %v1773_v20  ;;  %v1784_v60 = vmul.f32 0.5, %v1782_v38  ;;  %v5281_v38 = vld [vmem:[%s5985_s1 + $0x2c] ss:$16 sps:$4 sm:$0xff]  }
 0x5bc   :  { %3590 = vtanh.f32 %v1775_v32  ;;  %v5263_v32 = vld [vmem:[%s5985_s1] ss:$16 sps:$4 sm:$0xff]  }
 0x5bd   :  { %3592 = vtanh.f32 %v1779_v33  ;;  %v5275_v33 = vld [vmem:[%s5985_s1 + $0x24] ss:$16 sps:$4 sm:$0xff]  }
 0x5be   :  { %3594 = vtanh.f32 %v1784_v60  ;;  %v5289_v60 = vld [vmem:[%s5985_s1 + $0x20] ss:$16 sps:$4 sm:$0xff]  }
 0x5c4   :  { %v3589_v28 = vpop.eup %3588 }
 0x5c5   :  { %v1770_v23 = vmul.f32 0.5, %v3589_v28  ;;  %v5295_v28 = vld [vmem:[%s5985_s1 + $0x28] ss:$16 sps:$4 sm:$0xff]  }
 0x5c6   :  { %v3591_v30 = vpop.eup %3590 }
 0x5c7   :  { %v1771_v35 = vadd.f32 0.5, %v1770_v23  ;;  %v1777_v58 = vmul.f32 0.5, %v3591_v30  ;;  %v3593_v36 = vpop.eup %3592  ;;  %v5301_v23 = vld [vmem:[%s5985_s1 + $0x44] ss:$16 sps:$4 sm:$0xff]   ;;  %v5307_v30 = vld [vmem:[%s5985_s1 + $0x4c] ss:$16 sps:$4 sm:$0xff]  }
 0x5c8   :  { %v3595_v34 = vpop.eup %3594 }
 0x5c9   :  { %v1778_v29 = vadd.f32 0.5, %v1777_v58  ;;  %v1789_v26 = vmul.f32 %v3593_v36, %v1771_v35  ;;  %v1786_v21 = vmul.f32 0.5, %v3595_v34  ;;  %v5313_v35 = vld [vmem:[%s5985_s1 + $0x40] ss:$16 sps:$4 sm:$0xff]   ;;  %v5319_v58 = vld [vmem:[%s5985_s1 + $0x48] ss:$16 sps:$4 sm:$0xff]  }
 0x5ca   :  { %v6609_v36 = vld [vmem:[#allocation82_spill] sm:$0xff] }
 0x5cb   :  { %v1788_v25 = vmul.f32 %v1778_v29, %v5142_v27  ;;  %v1787_v22 = vadd.f32 0.5, %v1786_v21  ;;  %v5269_v27 = vld [vmem:[%s5985_s1 + $0x8] ss:$16 sps:$4 sm:$0xff]   ;;  %v5325_v29 = vld [vmem:[%s5985_s1 + $0x64] ss:$16 sps:$4 sm:$0xff]  }
 0x5cc   :  { %v5414_v34 = vld [vmem:[%s5985_s1 + $0x4] ss:$16 sps:$4 sm:$0xff]   ;;  %v5420_v21 = vld [vmem:[%s5985_s1 + $0xc] ss:$16 sps:$4 sm:$0xff]  }
 0x5cd   :  { %v5257_v24 = vadd.f32 %v1789_v26, %v1788_v25  ;;  %v6610_v25 = vld [vmem:[#allocation83_spill] sm:$0xff]  ;;  %v6611_v26 = vld [vmem:[#allocation84_spill] sm:$0xff] }
 0x5cf   :  { %3596 = vtanh.f32 %v5257_v24 }
 0x5d9   :  { %v3597_v37 = vpop.eup %3596 }
 0x5da   :  { %v1792_v12 = vmul.f32 %v3597_v37, %v1787_v22 }
 0x5dc   :  { %v1793_v20 = vpack.c.bf16 %v1792_v12, %v1792_v12  ;;  %v6612_v12 = vld [vmem:[#allocation26_spill] sm:$0xff] }
 0x5de   :  { %1827 = vmatmul.mubr.bf16.vlgmr.msra.gmra.mrb[36].mxu0 %v1793_v20  ;;  %1868 = vmatmul.mubr.bf16.vlgmr.msra.gmra.mrb[36].mxu1 %v1793_v20 }
 0x5df   :  { %1898 = vmatpush1.bf16.msra.mxu0 %v5263_v32  ;;  %1939 = vmatpush1.bf16.msra.mxu1 %v5269_v27 }
 0x5e0   :  { %1899 = vmatprep.subr.bf16.mxu0 %v5275_v33  ;;  %1940 = vmatprep.subr.bf16.mxu1 %v5281_v38 }
 0x5e1   :  { %1929 = vmatprep.mubr.bf16.mxu0 %v6345_v59  ;;  %1970 = vmatprep.mubr.bf16.mxu1 %v6345_v59 }
 0x5e3   :  { %1900 = vmatpush1.bf16.msra.mxu0 %v5289_v60  ;;  %1941 = vmatpush1.bf16.msra.mxu1 %v5295_v28 }
 0x5e4   :  { %1901 = vmatprep.subr.bf16.mxu0 %v5301_v23  ;;  %1942 = vmatprep.subr.bf16.mxu1 %v5307_v30 }
 0x5e7   :  { %1902 = vmatpush1.bf16.msra.mxu0 %v5313_v35  ;;  %1943 = vmatpush1.bf16.msra.mxu1 %v5319_v58 }
 0x5e8   :  { %1903 = vmatprep.subr.bf16.mxu0 %v5325_v29  ;;  %1944 = vmatprep.subr.bf16.mxu1 %v4823_v13  ;;  %v6569_v13 = vld [vmem:[#allocation41_spill] sm:$0xff] }
 0x5eb   :  { %1904 = vmatpush1.bf16.msra.mxu0 %v4829_v39  ;;  %1945 = vmatpush1.bf16.msra.mxu1 %v4835_v40  ;;  %v6570_v39 = vld [vmem:[#allocation42_spill] sm:$0xff]  ;;  %v6571_v40 = vld [vmem:[#allocation43_spill] sm:$0xff] }
 0x5ec   :  { %1905 = vmatprep.subr.bf16.mxu0 %v4841_v41  ;;  %1946 = vmatprep.subr.bf16.mxu1 %v4847_v42  ;;  %v6572_v41 = vld [vmem:[#allocation44_spill] sm:$0xff]  ;;  %v6573_v42 = vld [vmem:[#allocation45_spill] sm:$0xff] }
 0x5ef   :  { %1906 = vmatpush1.bf16.msra.mxu0 %v4853_v43  ;;  %1947 = vmatpush1.bf16.msra.mxu1 %v4859_v44  ;;  %v6574_v43 = vld [vmem:[#allocation46_spill] sm:$0xff]  ;;  %v6575_v44 = vld [vmem:[#allocation47_spill] sm:$0xff] }
 0x5f0   :  { %1907 = vmatprep.subr.bf16.mxu0 %v4865_v45  ;;  %1948 = vmatprep.subr.bf16.mxu1 %v4871_v46  ;;  %v6576_v45 = vld [vmem:[#allocation48_spill] sm:$0xff]  ;;  %v6577_v46 = vld [vmem:[#allocation49_spill] sm:$0xff] }
 0x5f3   :  { %1908 = vmatpush1.bf16.msra.mxu0 %v4877_v47  ;;  %1949 = vmatpush1.bf16.msra.mxu1 %v4883_v3  ;;  %v6578_v47 = vld [vmem:[#allocation50_spill] sm:$0xff]  ;;  %v6579_v3 = vld [vmem:[#allocation51_spill] sm:$0xff] }
 0x5f4   :  { %1909 = vmatprep.subr.bf16.mxu0 %v4889_v4  ;;  %1950 = vmatprep.subr.bf16.mxu1 %v4895_v5  ;;  %v6580_v4 = vld [vmem:[#allocation52_spill] sm:$0xff]  ;;  %v6581_v5 = vld [vmem:[#allocation53_spill] sm:$0xff] }
 0x5f7   :  { %1910 = vmatpush1.bf16.msra.mxu0 %v4901_v6  ;;  %1951 = vmatpush1.bf16.msra.mxu1 %v4907_v7  ;;  %v6582_v6 = vld [vmem:[#allocation54_spill] sm:$0xff]  ;;  %v6583_v7 = vld [vmem:[#allocation55_spill] sm:$0xff] }
 0x5f8   :  { %1911 = vmatprep.subr.bf16.mxu0 %v4913_v8  ;;  %1952 = vmatprep.subr.bf16.mxu1 %v4919_v55  ;;  %v6584_v8 = vld [vmem:[#allocation56_spill] sm:$0xff]  ;;  %v6585_v55 = vld [vmem:[#allocation57_spill] sm:$0xff] }
 0x5fb   :  { %1912 = vmatpush1.bf16.msra.mxu0 %v4925_v1  ;;  %1953 = vmatpush1.bf16.msra.mxu1 %v4931_v53  ;;  %v6586_v1 = vld [vmem:[#allocation58_spill] sm:$0xff]  ;;  %v6587_v53 = vld [vmem:[#allocation59_spill] sm:$0xff] }
 0x5fc   :  { %2028 = vmatprep.subr.bf16.mxu0 %v4934_v62  ;;  %2069 = vmatprep.subr.bf16.mxu1 %v4937_v51  ;;  %v6588_v62 = vld [vmem:[#allocation60_spill] sm:$0xff]  ;;  %v6589_v51 = vld [vmem:[#allocation61_spill] sm:$0xff] }
 0x5fe   :  { %1930 = vmatmul.mubr.bf16.vlgmr.msra.gmra.mrb[40].mxu0 %v1793_v20  ;;  %1971 = vmatmul.mubr.bf16.vlgmr.msra.gmra.mrb[40].mxu1 %v1793_v20 }
 0x5ff   :  { %2029 = vmatpush1.bf16.msra.mxu0 %v4940_v11  ;;  %2070 = vmatpush1.bf16.msra.mxu1 %v4943_v14  ;;  %v6590_v11 = vld [vmem:[#allocation62_spill] sm:$0xff]  ;;  %v6591_v14 = vld [vmem:[#allocation63_spill] sm:$0xff] }
 0x600   :  { %2030 = vmatprep.subr.bf16.mxu0 %v4946_v15  ;;  %2071 = vmatprep.subr.bf16.mxu1 %v4949_v16  ;;  %v6592_v15 = vld [vmem:[#allocation64_spill] sm:$0xff]  ;;  %v6593_v16 = vld [vmem:[#allocation65_spill] sm:$0xff] }
 0x603   :  { %2031 = vmatpush1.bf16.msra.mxu0 %v4952_v17  ;;  %2072 = vmatpush1.bf16.msra.mxu1 %v4955_v18  ;;  %v6594_v17 = vld [vmem:[#allocation66_spill] sm:$0xff]  ;;  %v6595_v18 = vld [vmem:[#allocation67_spill] sm:$0xff] }
 0x604   :  { %2032 = vmatprep.subr.bf16.mxu0 %v4958_v19  ;;  %2073 = vmatprep.subr.bf16.mxu1 %v6508_v2  ;;  %v6596_v19 = vld [vmem:[#allocation68_spill] sm:$0xff]  ;;  %v6597_v2 = vld [vmem:[#allocation69_spill] sm:$0xff] }
 0x607   :  { %2033 = vmatpush1.bf16.msra.mxu0 %v6509_v57  ;;  %2074 = vmatpush1.bf16.msra.mxu1 %v6510_v61  ;;  %v6598_v57 = vld [vmem:[#allocation70_spill] sm:$0xff]  ;;  %v6599_v61 = vld [vmem:[#allocation71_spill] sm:$0xff] }
 0x608   :  { %2034 = vmatprep.subr.bf16.mxu0 %v6511_v50  ;;  %2075 = vmatprep.subr.bf16.mxu1 %v6512_v0  ;;  %v6600_v50 = vld [vmem:[#allocation72_spill] sm:$0xff]  ;;  %v6601_v0 = vld [vmem:[#allocation73_spill] sm:$0xff] }
 0x60b   :  { %2035 = vmatpush1.bf16.msra.mxu0 %v6513_v56  ;;  %2076 = vmatpush1.bf16.msra.mxu1 %v6514_v49  ;;  %v6602_v56 = vld [vmem:[#allocation74_spill] sm:$0xff]  ;;  %v6603_v49 = vld [vmem:[#allocation29_spill] sm:$0xff] }
 0x60c   :  { %2036 = vmatprep.subr.bf16.mxu0 %v6515_v52  ;;  %2077 = vmatprep.subr.bf16.mxu1 %v6516_v10  ;;  %v6604_v52 = vld [vmem:[#allocation77_spill] sm:$0xff]  ;;  %v6605_v10 = vld [vmem:[#allocation78_spill] sm:$0xff] }
 0x60f   :  { %2037 = vmatpush1.bf16.msra.mxu0 %v6517_v48  ;;  %2078 = vmatpush1.bf16.msra.mxu1 %v6518_v9  ;;  %v6606_v48 = vld [vmem:[#allocation79_spill] sm:$0xff]  ;;  %v6607_v9 = vld [vmem:[#allocation80_spill] sm:$0xff] }
 0x610   :  { %2038 = vmatprep.subr.bf16.mxu0 %v6519_v31  ;;  %2079 = vmatprep.subr.bf16.mxu1 %v6569_v13  ;;  %v6608_v31 = vld [vmem:[#allocation81_spill] sm:$0xff] }
 0x613   :  { %2039 = vmatpush1.bf16.msra.mxu0 %v6570_v39  ;;  %2080 = vmatpush1.bf16.msra.mxu1 %v6571_v40 }
 0x614   :  { %2040 = vmatprep.subr.bf16.mxu0 %v6572_v41  ;;  %2081 = vmatprep.subr.bf16.mxu1 %v6573_v42 }
 0x617   :  { %2041 = vmatpush1.bf16.msra.mxu0 %v6574_v43  ;;  %2082 = vmatpush1.bf16.msra.mxu1 %v6575_v44 }
 0x618   :  { %2042 = vmatprep.subr.bf16.mxu0 %v6576_v45  ;;  %2083 = vmatprep.subr.bf16.mxu1 %v6577_v46 }
 0x61b   :  { %2043 = vmatpush1.bf16.msra.mxu0 %v6578_v47  ;;  %2084 = vmatpush1.bf16.msra.mxu1 %v6579_v3  ;;  %v6613_v47 = vld [vmem:[#allocation27_spill] sm:$0xff] }
 0x61c   :  { %2044 = vmatprep.subr.bf16.mxu0 %v6580_v4  ;;  %2085 = vmatprep.subr.bf16.mxu1 %v6581_v5  ;;  %v6614_v4 = vld [vmem:[#allocation28_spill] sm:$0xff] }
 0x61f   :  { %2045 = vmatpush1.bf16.msra.mxu0 %v6582_v6  ;;  %2086 = vmatpush1.bf16.msra.mxu1 %v6583_v7 }
 0x620   :  { %2046 = vmatprep.subr.bf16.mxu0 %v6584_v8  ;;  %2087 = vmatprep.subr.bf16.mxu1 %v6585_v55 }
 0x623   :  { %2047 = vmatpush1.bf16.msra.mxu0 %v6586_v1  ;;  %2088 = vmatpush1.bf16.msra.mxu1 %v6587_v53 }
 0x624   :  { %2048 = vmatprep.subr.bf16.mxu0 %v6588_v62  ;;  %2089 = vmatprep.subr.bf16.mxu1 %v6589_v51 }
 0x627   :  { %2049 = vmatpush1.bf16.msra.mxu0 %v6590_v11  ;;  %2090 = vmatpush1.bf16.msra.mxu1 %v6591_v14  ;;  %v6615_v14 = vld [vmem:[#allocation24_spill] sm:$0xff] }
 0x628   :  { %2050 = vmatprep.subr.bf16.mxu0 %v6592_v15  ;;  %2091 = vmatprep.subr.bf16.mxu1 %v6593_v16 }
 0x62b   :  { %2051 = vmatpush1.bf16.msra.mxu0 %v6594_v17  ;;  %2092 = vmatpush1.bf16.msra.mxu1 %v6595_v18 }
 0x62c   :  { %2052 = vmatprep.subr.bf16.mxu0 %v6596_v19  ;;  %2093 = vmatprep.subr.bf16.mxu1 %v6597_v2 }
 0x62f   :  { %2053 = vmatpush1.bf16.msra.mxu0 %v6598_v57  ;;  %2094 = vmatpush1.bf16.msra.mxu1 %v6599_v61 }
 0x630   :  { %2054 = vmatprep.subr.bf16.mxu0 %v6600_v50  ;;  %2095 = vmatprep.subr.bf16.mxu1 %v6601_v0 }
 0x633   :  { %2055 = vmatpush1.bf16.msra.mxu0 %v6602_v56  ;;  %2096 = vmatpush1.bf16.msra.mxu1 %v6603_v49 }
 0x634   :  { %2056 = vmatprep.subr.bf16.mxu0 %v6604_v52  ;;  %2097 = vmatprep.subr.bf16.mxu1 %v6605_v10 }
 0x637   :  { %2057 = vmatpush1.bf16.msra.mxu0 %v6606_v48  ;;  %2098 = vmatpush1.bf16.msra.mxu1 %v6607_v9 }
 0x638   :  { %2058 = vmatprep.subr.bf16.mxu0 %v6608_v31  ;;  %2099 = vmatprep.subr.bf16.mxu1 %v6609_v36 }
 0x63b   :  { %2059 = vmatpush1.bf16.msra.mxu0 %v6610_v25  ;;  %2100 = vmatpush1.bf16.msra.mxu1 %v6611_v26  ;;  %v3191_v26 = vld [vmem:[%s5984_s0 + $0x28] sm:$0xff] }
 0x63c   :  { %2131 = vmatprep.subr.bf16.mxu0 %v5414_v34  ;;  %2172 = vmatprep.subr.bf16.mxu1 %v5420_v21 }
 0x6b1   :  { %v1828_v22 = vpop.f32.mrb[36].mxu0  ;;  %v1869_v37 = vpop.f32.mrb[36].mxu1 }
 0x6b2   :  { %v1829_v20 = vadd.f32 %v1828_v22, %v6612_v12  ;;  %v1830_v13 = vpop.f32.mrb[37].mxu0  ;;  %v1871_v39 = vpop.f32.mrb[37].mxu1  ;;  %v1870_v3 = vadd.f32 %v1869_v37, %v6613_v47 }
 0x6b3   :  { %v1831_v40 = vadd.f32 %v1830_v13, %v4602_v63  ;;  %v1832_v41 = vpop.f32.mrb[38].mxu0  ;;  %v1873_v42 = vpop.f32.mrb[38].mxu1  ;;  %v1872_v5 = vadd.f32 %v1871_v39, %v6614_v4 }
 0x6b4   :  { %v1876_v43 = vmul.f32 0.5, %v1829_v20  ;;  %v1833_v44 = vpop.f32.mrb[39].mxu0  ;;  %v1874_v45 = vpop.f32.mrb[39].mxu1 }
 0x6b5   :  { %v1880_v46 = vmul.f32 0.5, %v1831_v40  ;;  %v1885_v6 = vmul.f32 0.5, %v1872_v5 }
 0x6b6   :  { %3598 = vtanh.f32 %v1876_v43 }
 0x6b7   :  { %3600 = vtanh.f32 %v1880_v46 }
 0x6b8   :  { %3602 = vtanh.f32 %v1870_v3 }
 0x6b9   :  { %3604 = vtanh.f32 %v1885_v6 }
 0x6c0   :  { %v3599_v7 = vpop.eup %3598 }
 0x6c1   :  { %v3601_v8 = vpop.eup %3600  ;;  %v1878_v55 = vmul.f32 0.5, %v3599_v7 }
 0x6c2   :  { %v1882_v1 = vmul.f32 0.5, %v3601_v8  ;;  %v3603_v62 = vpop.eup %3602 }
 0x6c3   :  { %v1879_v53 = vadd.f32 0.5, %v1878_v55  ;;  %v3605_v17 = vpop.eup %3604 }
 0x6c4   :  { %v1883_v51 = vadd.f32 0.5, %v1882_v1  ;;  %v1887_v18 = vmul.f32 0.5, %v3605_v17  ;;  %v5462_v17 = vld [vmem:[%s5985_s1 + $0x60] ss:$16 sps:$4 sm:$0xff]  }
 0x6c5   :  { %v1890_v11 = vmul.f32 %v3603_v62, %v1879_v53 }
 0x6c6   :  { %v1889_v15 = vmul.f32 %v1883_v51, %v6615_v14  ;;  %v1888_v50 = vadd.f32 0.5, %v1887_v18  ;;  %v5468_v18 = vld [vmem:[%s5985_s1 + $0x68] ss:$16 sps:$4 sm:$0xff]  }
 0x6c8   :  { %v5428_v16 = vadd.f32 %v1890_v11, %v1889_v15 }
 0x6ca   :  { %3606 = vtanh.f32 %v5428_v16 }
 0x6d1   :  { %v1931_v19 = vpop.f32.mrb[40].mxu0  ;;  %v1972_v2 = vpop.f32.mrb[40].mxu1 }
 0x6d2   :  { %v1933_v57 = vpop.f32.mrb[41].mxu0  ;;  %v1974_v61 = vpop.f32.mrb[41].mxu1 }
 0x6d3   :  { %v1983_v0 = vcombine.low %v1931_v19, %v1933_v57  ;;  %v1984_v56 = vcombine.low %v1972_v2, %v1974_v61  ;;  %v1935_v49 = vpop.f32.mrb[42].mxu0  ;;  %v1976_v52 = vpop.f32.mrb[42].mxu1  ;;  %v5474_v19 = vld [vmem:[%s5985_s1 + $0x84] ss:$16 sps:$4 sm:$0xff]   ;;  %v5480_v2 = vld [vmem:[%s5985_s1 + $0x8c] ss:$16 sps:$4 sm:$0xff]  }
 0x6d4   :  { %v3607_v10 = vpop.eup %3606  ;;  %v1936_v48 = vpop.f32.mrb[43].mxu0  ;;  %v5486_v57 = vld [vmem:[%s5985_s1 + $0x80] ss:$16 sps:$4 sm:$0xff]   ;;  %v5492_v61 = vld [vmem:[%s5985_s1 + $0x88] ss:$16 sps:$4 sm:$0xff]  }
 0x6d5   :  { %v1977_v9 = vpop.f32.mrb[43].mxu1  ;;  %v1991_v31 = vrot.slane %v1983_v0, %v6402_v54  ;;  %v1998_v36 = vrot.slane %v1984_v56, %v6402_v54  ;;  %v1893_v25 = vmul.f32 %v3607_v10, %v1888_v50  ;;  %v5498_v50 = vld [vmem:[%s5985_s1 + $0xa4] ss:$16 sps:$4 sm:$0xff]   ;;  %v5504_v0 = vld [vmem:[%s5985_s1 + $0xac] ss:$16 sps:$4 sm:$0xff]  }
 0x6d6   :  { %v5510_v56 = vld [vmem:[%s5985_s1 + $0xa0] ss:$16 sps:$4 sm:$0xff]   ;;  %v5516_v49 = vld [vmem:[%s5985_s1 + $0xa8] ss:$16 sps:$4 sm:$0xff]   ;;  %v5522_v52 = vld [vmem:[%s5985_s1 + $0xc4] ss:$16 sps:$4 sm:$0xff]  }
 0x6d7   :  { %v1999_v22 = vcombine.low %v1991_v31, %v1998_v36  ;;  %v1894_v37 = vpack.c.bf16 %v1893_v25, %v1893_v25  ;;  %v5528_v10 = vld [vmem:[%s5985_s1 + $0xcc] ss:$16 sps:$4 sm:$0xff]   ;;  %v5534_v48 = vld [vmem:[%s5985_s1 + $0xc0] ss:$16 sps:$4 sm:$0xff]   ;;  %v5540_v9 = vld [vmem:[%s5985_s1 + $0xc8] ss:$16 sps:$4 sm:$0xff]  }
 0x6d8   :  { %v5546_v31 = vld [vmem:[%s5985_s1 + $0xe4] ss:$16 sps:$4 sm:$0xff]   ;;  %v5552_v36 = vld [vmem:[%s5985_s1 + $0xec] ss:$16 sps:$4 sm:$0xff]   ;;  %v5558_v25 = vld [vmem:[%s5985_s1 + $0xe0] ss:$16 sps:$4 sm:$0xff]  }
 0x6d9   :  { %v2001_v20 = vadd.f32 %v3191_v26, %v1999_v22  ;;  %2060 = vmatprep.mubr.bf16.mxu0 %v1894_v37  ;;  %2101 = vmatprep.mubr.bf16.mxu1 %v1894_v37  ;;  %v5564_v26 = vld [vmem:[%s5985_s1 + $0xe8] ss:$16 sps:$4 sm:$0xff]   ;;  %v5567_v22 = vld [vmem:[#allocation7 + $0x4] ss:$16 sps:$4 sm:$0xff]   ;;  %v5570_v37 = vld [vmem:[#allocation7 + $0xc] ss:$16 sps:$4 sm:$0xff]  }
 0x6db   :  { %v2002_v13 = vmul.f32 0.5, %v2001_v20  ;;  %v2007_v39 = vrot.slane %v2001_v20, 2  ;;  %v2013_v41 = vrot.slane %v2001_v20, 4  ;;  %v2016_v42 = vrot.slane %v2001_v20, 6  ;;  %v5573_v20 = vld [vmem:[#allocation7] ss:$16 sps:$4 sm:$0xff]  }
 0x6dd   :  { %3608 = vtanh.f32 %v2002_v13  ;;  %v2009_v40 = vmul.f32 0.5, %v2007_v39  ;;  %v2018_v43 = vmul.f32 0.5, %v2016_v42  ;;  %v5576_v13 = vld [vmem:[#allocation7 + $0x8] ss:$16 sps:$4 sm:$0xff]   ;;  %v5579_v39 = vld [vmem:[#allocation7 + $0x24] ss:$16 sps:$4 sm:$0xff]  }
 0x6de   :  { %v5588_v42 = vld [vmem:[#allocation7 + $0x28] ss:$16 sps:$4 sm:$0xff]  }
 0x6df   :  { %3610 = vtanh.f32 %v2009_v40  ;;  %v5582_v40 = vld [vmem:[#allocation7 + $0x2c] ss:$16 sps:$4 sm:$0xff]  }
 0x6e0   :  { %3612 = vtanh.f32 %v2013_v41  ;;  %v5585_v41 = vld [vmem:[#allocation7 + $0x20] ss:$16 sps:$4 sm:$0xff]  }
 0x6e1   :  { %3614 = vtanh.f32 %v2018_v43  ;;  %v5591_v43 = vld [vmem:[#allocation7 + $0x44] ss:$16 sps:$4 sm:$0xff]  }
 0x6e7   :  { %v3609_v44 = vpop.eup %3608 }
 0x6e8   :  { %v2004_v45 = vmul.f32 0.5, %v3609_v44  ;;  %v5594_v44 = vld [vmem:[#allocation7 + $0x4c] ss:$16 sps:$4 sm:$0xff]  }
 0x6e9   :  { %v3611_v46 = vpop.eup %3610  ;;  %6616 = vst [vmem:[#allocation25_spill] sm:$0xff] %v5594_v44 }
 0x6ea   :  { %v2005_v3 = vadd.f32 0.5, %v2004_v45  ;;  %v2011_v5 = vmul.f32 0.5, %v3611_v46  ;;  %v3613_v7 = vpop.eup %3612  ;;  %v5597_v45 = vld [vmem:[#allocation7 + $0x40] ss:$16 sps:$4 sm:$0xff]   ;;  %v5600_v46 = vld [vmem:[#allocation7 + $0x48] ss:$16 sps:$4 sm:$0xff]  }
 0x6eb   :  { %v3615_v53 = vpop.eup %3614  ;;  %6617 = vst [vmem:[#allocation76_spill] sm:$0xff] %v5597_v45  ;;  %6618 = vst [vmem:[#allocation32_spill] sm:$0xff] %v5600_v46 }
 0x6ec   :  { %v2012_v6 = vadd.f32 0.5, %v2011_v5  ;;  %v2023_v55 = vmul.f32 %v3613_v7, %v2005_v3  ;;  %v2020_v62 = vmul.f32 0.5, %v3615_v53  ;;  %v5603_v3 = vld [vmem:[#allocation7 + $0x64] ss:$16 sps:$4 sm:$0xff]   ;;  %v5606_v5 = vld [vmem:[#allocation7 + $0x6c] ss:$16 sps:$4 sm:$0xff]  }
 0x6ed   :  { %6619 = vst [vmem:[#allocation33_spill] sm:$0xff] %v5603_v3  ;;  %6620 = vst [vmem:[#allocation34_spill] sm:$0xff] %v5606_v5  ;;  %v5612_v7 = vld [vmem:[#allocation7 + $0x68] ss:$16 sps:$4 sm:$0xff]   ;;  %v5621_v53 = vld [vmem:[#allocation7 + $0x80] ss:$16 sps:$4 sm:$0xff]  }
 0x6ee   :  { %v2022_v8 = vmul.f32 %v2012_v6, %v5257_v24  ;;  %v2021_v51 = vadd.f32 0.5, %v2020_v62  ;;  %v5456_v24 = vld [vmem:[%s5985_s1 + $0x6c] ss:$16 sps:$4 sm:$0xff]   ;;  %v5609_v6 = vld [vmem:[#allocation7 + $0x60] ss:$16 sps:$4 sm:$0xff]   ;;  %6622 = vst [vmem:[#allocation36_spill] sm:$0xff] %v5612_v7 }
 0x6ef   :  { %6621 = vst [vmem:[#allocation35_spill] sm:$0xff] %v5609_v6  ;;  %6625 = vst [vmem:[#allocation39_spill] sm:$0xff] %v5621_v53  ;;  %v5624_v62 = vld [vmem:[#allocation7 + $0x88] ss:$16 sps:$4 sm:$0xff]  }
 0x6f0   :  { %v5437_v1 = vadd.f32 %v2023_v55, %v2022_v8  ;;  %v5615_v8 = vld [vmem:[#allocation7 + $0x84] ss:$16 sps:$4 sm:$0xff]   ;;  %v5618_v55 = vld [vmem:[#allocation7 + $0x8c] ss:$16 sps:$4 sm:$0xff]   ;;  %6626 = vst [vmem:[#allocation40_spill] sm:$0xff] %v5624_v62 }
 0x6f1   :  { %6623 = vst [vmem:[#allocation37_spill] sm:$0xff] %v5615_v8  ;;  %6624 = vst [vmem:[#allocation38_spill] sm:$0xff] %v5618_v55 }
 0x6f2   :  { %3616 = vtanh.f32 %v5437_v1 }
 0x6fc   :  { %v3617_v11 = vpop.eup %3616 }
 0x6fd   :  { %v2026_v14 = vmul.f32 %v3617_v11, %v2021_v51  ;;  %v5627_v51 = vld [vmem:[#allocation7 + $0xa4] ss:$16 sps:$4 sm:$0xff]   ;;  %v5630_v11 = vld [vmem:[#allocation7 + $0xac] ss:$16 sps:$4 sm:$0xff]  }
 0x6fe   :  { %6627 = vst [vmem:[#allocation30_spill] sm:$0xff] %v5627_v51  ;;  %6628 = vst [vmem:[#allocation31_spill] sm:$0xff] %v5630_v11 }
 0x6ff   :  { %v2027_v15 = vpack.c.bf16 %v2026_v14, %v2026_v14  ;;  %v5633_v14 = vld [vmem:[#allocation7 + $0xa0] ss:$16 sps:$4 sm:$0xff]  }
 0x700   :  { %6629 = vst [vmem:[#allocation85_spill] sm:$0xff] %v5633_v14 }
 0x701   :  { %2061 = vmatmul.mubr.bf16.vlgmr.msra.gmra.mrb[44].mxu0 %v2027_v15  ;;  %2102 = vmatmul.mubr.bf16.vlgmr.msra.gmra.mrb[44].mxu1 %v2027_v15 }
 0x702   :  { %2132 = vmatpush1.bf16.msra.mxu0 %v5263_v32  ;;  %2173 = vmatpush1.bf16.msra.mxu1 %v5269_v27 }
 0x703   :  { %2133 = vmatprep.subr.bf16.mxu0 %v5275_v33  ;;  %2174 = vmatprep.subr.bf16.mxu1 %v5281_v38 }
 0x704   :  { %2163 = vmatprep.mubr.bf16.mxu0 %v6345_v59  ;;  %2204 = vmatprep.mubr.bf16.mxu1 %v6345_v59 }
 0x706   :  { %2134 = vmatpush1.bf16.msra.mxu0 %v5289_v60  ;;  %2175 = vmatpush1.bf16.msra.mxu1 %v5295_v28 }
 0x707   :  { %2135 = vmatprep.subr.bf16.mxu0 %v5301_v23  ;;  %2176 = vmatprep.subr.bf16.mxu1 %v5307_v30 }
 0x70a   :  { %2136 = vmatpush1.bf16.msra.mxu0 %v5313_v35  ;;  %2177 = vmatpush1.bf16.msra.mxu1 %v5319_v58 }
 0x70b   :  { %2137 = vmatprep.subr.bf16.mxu0 %v5325_v29  ;;  %2178 = vmatprep.subr.bf16.mxu1 %v5456_v24 }
 0x70e   :  { %2138 = vmatpush1.bf16.msra.mxu0 %v5462_v17  ;;  %2179 = vmatpush1.bf16.msra.mxu1 %v5468_v18 }
 0x70f   :  { %2139 = vmatprep.subr.bf16.mxu0 %v5474_v19  ;;  %2180 = vmatprep.subr.bf16.mxu1 %v5480_v2 }
 0x712   :  { %2140 = vmatpush1.bf16.msra.mxu0 %v5486_v57  ;;  %2181 = vmatpush1.bf16.msra.mxu1 %v5492_v61 }
 0x713   :  { %2141 = vmatprep.subr.bf16.mxu0 %v5498_v50  ;;  %2182 = vmatprep.subr.bf16.mxu1 %v5504_v0 }
 0x716   :  { %2142 = vmatpush1.bf16.msra.mxu0 %v5510_v56  ;;  %2183 = vmatpush1.bf16.msra.mxu1 %v5516_v49 }
 0x717   :  { %2143 = vmatprep.subr.bf16.mxu0 %v5522_v52  ;;  %2184 = vmatprep.subr.bf16.mxu1 %v5528_v10 }
 0x71a   :  { %2144 = vmatpush1.bf16.msra.mxu0 %v5534_v48  ;;  %2185 = vmatpush1.bf16.msra.mxu1 %v5540_v9 }
 0x71b   :  { %2145 = vmatprep.subr.bf16.mxu0 %v5546_v31  ;;  %2186 = vmatprep.subr.bf16.mxu1 %v5552_v36 }
 0x71e   :  { %2146 = vmatpush1.bf16.msra.mxu0 %v5558_v25  ;;  %2187 = vmatpush1.bf16.msra.mxu1 %v5564_v26 }
 0x71f   :  { %2262 = vmatprep.subr.bf16.mxu0 %v5567_v22  ;;  %2303 = vmatprep.subr.bf16.mxu1 %v5570_v37 }
 0x721   :  { %2164 = vmatmul.mubr.bf16.vlgmr.msra.gmra.mrb[48].mxu0 %v2027_v15  ;;  %2205 = vmatmul.mubr.bf16.vlgmr.msra.gmra.mrb[48].mxu1 %v2027_v15  ;;  %v5636_v15 = vld [vmem:[#allocation7 + $0xa8] ss:$16 sps:$4 sm:$0xff]  }
 0x722   :  { %2263 = vmatpush1.bf16.msra.mxu0 %v5573_v20  ;;  %2304 = vmatpush1.bf16.msra.mxu1 %v5576_v13  ;;  %6630 = vst [vmem:[#allocation41_spill] sm:$0xff] %v5636_v15 }
 0x723   :  { %2264 = vmatprep.subr.bf16.mxu0 %v5579_v39  ;;  %2305 = vmatprep.subr.bf16.mxu1 %v5582_v40 }
 0x726   :  { %2265 = vmatpush1.bf16.msra.mxu0 %v5585_v41  ;;  %2306 = vmatpush1.bf16.msra.mxu1 %v5588_v42 }
 0x727   :  { %2266 = vmatprep.subr.bf16.mxu0 %v5591_v43  ;;  %2307 = vmatprep.subr.bf16.mxu1 %v5594_v44 }
 0x72a   :  { %2267 = vmatpush1.bf16.msra.mxu0 %v5597_v45  ;;  %2308 = vmatpush1.bf16.msra.mxu1 %v5600_v46 }
 0x72b   :  { %2268 = vmatprep.subr.bf16.mxu0 %v5603_v3  ;;  %2309 = vmatprep.subr.bf16.mxu1 %v5606_v5 }
 0x72e   :  { %2269 = vmatpush1.bf16.msra.mxu0 %v5609_v6  ;;  %2310 = vmatpush1.bf16.msra.mxu1 %v5612_v7 }
 0x72f   :  { %2270 = vmatprep.subr.bf16.mxu0 %v5615_v8  ;;  %2311 = vmatprep.subr.bf16.mxu1 %v5618_v55 }
 0x732   :  { %2271 = vmatpush1.bf16.msra.mxu0 %v5621_v53  ;;  %2312 = vmatpush1.bf16.msra.mxu1 %v5624_v62  ;;  %v5639_v53 = vld [vmem:[#allocation7 + $0xc4] ss:$16 sps:$4 sm:$0xff]   ;;  %v5642_v62 = vld [vmem:[#allocation7 + $0xcc] ss:$16 sps:$4 sm:$0xff]  }
 0x733   :  { %2272 = vmatprep.subr.bf16.mxu0 %v5627_v51  ;;  %2313 = vmatprep.subr.bf16.mxu1 %v5630_v11  ;;  %6631 = vst [vmem:[#allocation42_spill] sm:$0xff] %v5639_v53  ;;  %6632 = vst [vmem:[#allocation43_spill] sm:$0xff] %v5642_v62  ;;  %v5645_v51 = vld [vmem:[#allocation7 + $0xc0] ss:$16 sps:$4 sm:$0xff]   ;;  %v5648_v11 = vld [vmem:[#allocation7 + $0xc8] ss:$16 sps:$4 sm:$0xff]  }
 0x734   :  { %6633 = vst [vmem:[#allocation44_spill] sm:$0xff] %v5645_v51  ;;  %6634 = vst [vmem:[#allocation45_spill] sm:$0xff] %v5648_v11 }
 0x736   :  { %2273 = vmatpush1.bf16.msra.mxu0 %v5633_v14  ;;  %2314 = vmatpush1.bf16.msra.mxu1 %v5636_v15  ;;  %v5651_v14 = vld [vmem:[#allocation7 + $0xe4] ss:$16 sps:$4 sm:$0xff]   ;;  %v5654_v15 = vld [vmem:[#allocation7 + $0xec] ss:$16 sps:$4 sm:$0xff]  }
 0x737   :  { %2274 = vmatprep.subr.bf16.mxu0 %v5639_v53  ;;  %2315 = vmatprep.subr.bf16.mxu1 %v5642_v62  ;;  %6635 = vst [vmem:[#allocation46_spill] sm:$0xff] %v5651_v14  ;;  %6636 = vst [vmem:[#allocation47_spill] sm:$0xff] %v5654_v15  ;;  %v5657_v53 = vld [vmem:[#allocation7 + $0xe0] ss:$16 sps:$4 sm:$0xff]   ;;  %v5660_v62 = vld [vmem:[#allocation7 + $0xe8] ss:$16 sps:$4 sm:$0xff]  }
 0x738   :  { %6637 = vst [vmem:[#allocation48_spill] sm:$0xff] %v5657_v53  ;;  %6638 = vst [vmem:[#allocation49_spill] sm:$0xff] %v5660_v62 }
 0x73a   :  { %2275 = vmatpush1.bf16.msra.mxu0 %v5645_v51  ;;  %2316 = vmatpush1.bf16.msra.mxu1 %v5648_v11  ;;  %v5663_v51 = vld [vmem:[#allocation7 + $0x104] ss:$16 sps:$4 sm:$0xff]   ;;  %v5666_v11 = vld [vmem:[#allocation7 + $0x10c] ss:$16 sps:$4 sm:$0xff]  }
 0x73b   :  { %2276 = vmatprep.subr.bf16.mxu0 %v5651_v14  ;;  %2317 = vmatprep.subr.bf16.mxu1 %v5654_v15  ;;  %6639 = vst [vmem:[#allocation50_spill] sm:$0xff] %v5663_v51  ;;  %6640 = vst [vmem:[#allocation51_spill] sm:$0xff] %v5666_v11  ;;  %v5669_v14 = vld [vmem:[#allocation7 + $0x100] ss:$16 sps:$4 sm:$0xff]   ;;  %v5672_v15 = vld [vmem:[#allocation7 + $0x108] ss:$16 sps:$4 sm:$0xff]  }
 0x73c   :  { %6641 = vst [vmem:[#allocation52_spill] sm:$0xff] %v5669_v14  ;;  %6642 = vst [vmem:[#allocation53_spill] sm:$0xff] %v5672_v15 }
 0x73e   :  { %2277 = vmatpush1.bf16.msra.mxu0 %v5657_v53  ;;  %2318 = vmatpush1.bf16.msra.mxu1 %v5660_v62  ;;  %v5675_v53 = vld [vmem:[#allocation7 + $0x124] ss:$16 sps:$4 sm:$0xff]   ;;  %v5678_v62 = vld [vmem:[#allocation7 + $0x12c] ss:$16 sps:$4 sm:$0xff]  }
 0x73f   :  { %2278 = vmatprep.subr.bf16.mxu0 %v5663_v51  ;;  %2319 = vmatprep.subr.bf16.mxu1 %v5666_v11  ;;  %6643 = vst [vmem:[#allocation54_spill] sm:$0xff] %v5675_v53  ;;  %6644 = vst [vmem:[#allocation55_spill] sm:$0xff] %v5678_v62  ;;  %v5681_v51 = vld [vmem:[#allocation7 + $0x120] ss:$16 sps:$4 sm:$0xff]   ;;  %v5684_v11 = vld [vmem:[#allocation7 + $0x128] ss:$16 sps:$4 sm:$0xff]  }
 0x740   :  { %6645 = vst [vmem:[#allocation56_spill] sm:$0xff] %v5681_v51  ;;  %6646 = vst [vmem:[#allocation57_spill] sm:$0xff] %v5684_v11 }
 0x742   :  { %2279 = vmatpush1.bf16.msra.mxu0 %v5669_v14  ;;  %2320 = vmatpush1.bf16.msra.mxu1 %v5672_v15  ;;  %v5687_v14 = vld [vmem:[#allocation7 + $0x144] ss:$16 sps:$4 sm:$0xff]   ;;  %v5690_v15 = vld [vmem:[#allocation7 + $0x14c] ss:$16 sps:$4 sm:$0xff]  }
 0x743   :  { %2280 = vmatprep.subr.bf16.mxu0 %v5675_v53  ;;  %2321 = vmatprep.subr.bf16.mxu1 %v5678_v62  ;;  %6647 = vst [vmem:[#allocation58_spill] sm:$0xff] %v5687_v14  ;;  %6648 = vst [vmem:[#allocation59_spill] sm:$0xff] %v5690_v15  ;;  %v5693_v53 = vld [vmem:[#allocation7 + $0x140] ss:$16 sps:$4 sm:$0xff]   ;;  %v5696_v62 = vld [vmem:[#allocation7 + $0x148] ss:$16 sps:$4 sm:$0xff]  }
 0x744   :  { %6649 = vst [vmem:[#allocation60_spill] sm:$0xff] %v5693_v53  ;;  %6650 = vst [vmem:[#allocation61_spill] sm:$0xff] %v5696_v62 }
 0x746   :  { %2281 = vmatpush1.bf16.msra.mxu0 %v5681_v51  ;;  %2322 = vmatpush1.bf16.msra.mxu1 %v5684_v11  ;;  %v5699_v51 = vld [vmem:[#allocation7 + $0x164] ss:$16 sps:$4 sm:$0xff]   ;;  %v5702_v11 = vld [vmem:[#allocation7 + $0x16c] ss:$16 sps:$4 sm:$0xff]  }
 0x747   :  { %2282 = vmatprep.subr.bf16.mxu0 %v5687_v14  ;;  %2323 = vmatprep.subr.bf16.mxu1 %v5690_v15  ;;  %6651 = vst [vmem:[#allocation62_spill] sm:$0xff] %v5699_v51  ;;  %6652 = vst [vmem:[#allocation63_spill] sm:$0xff] %v5702_v11  ;;  %v5705_v14 = vld [vmem:[#allocation7 + $0x160] ss:$16 sps:$4 sm:$0xff]   ;;  %v5708_v15 = vld [vmem:[#allocation7 + $0x168] ss:$16 sps:$4 sm:$0xff]  }
 0x748   :  { %6653 = vst [vmem:[#allocation64_spill] sm:$0xff] %v5705_v14  ;;  %6654 = vst [vmem:[#allocation65_spill] sm:$0xff] %v5708_v15 }
 0x74a   :  { %2283 = vmatpush1.bf16.msra.mxu0 %v5693_v53  ;;  %2324 = vmatpush1.bf16.msra.mxu1 %v5696_v62  ;;  %v5711_v53 = vld [vmem:[#allocation7 + $0x184] ss:$16 sps:$4 sm:$0xff]   ;;  %v5714_v62 = vld [vmem:[#allocation7 + $0x18c] ss:$16 sps:$4 sm:$0xff]  }
 0x74b   :  { %2284 = vmatprep.subr.bf16.mxu0 %v5699_v51  ;;  %2325 = vmatprep.subr.bf16.mxu1 %v5702_v11  ;;  %6655 = vst [vmem:[#allocation66_spill] sm:$0xff] %v5711_v53  ;;  %6656 = vst [vmem:[#allocation67_spill] sm:$0xff] %v5714_v62  ;;  %v5717_v51 = vld [vmem:[#allocation7 + $0x180] ss:$16 sps:$4 sm:$0xff]   ;;  %v5720_v11 = vld [vmem:[#allocation7 + $0x188] ss:$16 sps:$4 sm:$0xff]  }
 0x74c   :  { %6657 = vst [vmem:[#allocation68_spill] sm:$0xff] %v5717_v51  ;;  %6658 = vst [vmem:[#allocation69_spill] sm:$0xff] %v5720_v11 }
 0x74e   :  { %2285 = vmatpush1.bf16.msra.mxu0 %v5705_v14  ;;  %2326 = vmatpush1.bf16.msra.mxu1 %v5708_v15  ;;  %v5723_v14 = vld [vmem:[#allocation7 + $0x1a4] ss:$16 sps:$4 sm:$0xff]   ;;  %v5726_v15 = vld [vmem:[#allocation7 + $0x1ac] ss:$16 sps:$4 sm:$0xff]  }
 0x74f   :  { %2286 = vmatprep.subr.bf16.mxu0 %v5711_v53  ;;  %2327 = vmatprep.subr.bf16.mxu1 %v5714_v62  ;;  %6659 = vst [vmem:[#allocation70_spill] sm:$0xff] %v5723_v14  ;;  %6660 = vst [vmem:[#allocation71_spill] sm:$0xff] %v5726_v15  ;;  %v5729_v53 = vld [vmem:[#allocation7 + $0x1a0] ss:$16 sps:$4 sm:$0xff]   ;;  %v5732_v62 = vld [vmem:[#allocation7 + $0x1a8] ss:$16 sps:$4 sm:$0xff]  }
 0x750   :  { %6661 = vst [vmem:[#allocation72_spill] sm:$0xff] %v5729_v53  ;;  %6662 = vst [vmem:[#allocation73_spill] sm:$0xff] %v5732_v62 }
 0x752   :  { %2287 = vmatpush1.bf16.msra.mxu0 %v5717_v51  ;;  %2328 = vmatpush1.bf16.msra.mxu1 %v5720_v11  ;;  %v5735_v51 = vld [vmem:[#allocation7 + $0x1c4] ss:$16 sps:$4 sm:$0xff]   ;;  %v5738_v11 = vld [vmem:[#allocation7 + $0x1cc] ss:$16 sps:$4 sm:$0xff]  }
 0x753   :  { %2288 = vmatprep.subr.bf16.mxu0 %v5723_v14  ;;  %2329 = vmatprep.subr.bf16.mxu1 %v5726_v15  ;;  %6663 = vst [vmem:[#allocation74_spill] sm:$0xff] %v5735_v51  ;;  %6664 = vst [vmem:[#allocation29_spill] sm:$0xff] %v5738_v11  ;;  %v5741_v14 = vld [vmem:[#allocation7 + $0x1c0] ss:$16 sps:$4 sm:$0xff]   ;;  %v5744_v15 = vld [vmem:[#allocation7 + $0x1c8] ss:$16 sps:$4 sm:$0xff]  }
 0x754   :  { %6665 = vst [vmem:[#allocation77_spill] sm:$0xff] %v5741_v14  ;;  %6666 = vst [vmem:[#allocation78_spill] sm:$0xff] %v5744_v15 }
 0x756   :  { %2289 = vmatpush1.bf16.msra.mxu0 %v5729_v53  ;;  %2330 = vmatpush1.bf16.msra.mxu1 %v5732_v62  ;;  %v5747_v53 = vld [vmem:[#allocation7 + $0x1e4] ss:$16 sps:$4 sm:$0xff]   ;;  %v5750_v62 = vld [vmem:[#allocation7 + $0x1ec] ss:$16 sps:$4 sm:$0xff]  }
 0x757   :  { %2290 = vmatprep.subr.bf16.mxu0 %v5735_v51  ;;  %2331 = vmatprep.subr.bf16.mxu1 %v5738_v11  ;;  %6667 = vst [vmem:[#allocation79_spill] sm:$0xff] %v5747_v53  ;;  %6668 = vst [vmem:[#allocation80_spill] sm:$0xff] %v5750_v62  ;;  %v5753_v51 = vld [vmem:[#allocation7 + $0x1e0] ss:$16 sps:$4 sm:$0xff]   ;;  %v5756_v11 = vld [vmem:[#allocation7 + $0x1e8] ss:$16 sps:$4 sm:$0xff]  }
 0x758   :  { %6669 = vst [vmem:[#allocation81_spill] sm:$0xff] %v5753_v51  ;;  %6670 = vst [vmem:[#allocation82_spill] sm:$0xff] %v5756_v11 }
 0x75a   :  { %2291 = vmatpush1.bf16.msra.mxu0 %v5741_v14  ;;  %2332 = vmatpush1.bf16.msra.mxu1 %v5744_v15 }
 0x75b   :  { %2292 = vmatprep.subr.bf16.mxu0 %v5747_v53  ;;  %2333 = vmatprep.subr.bf16.mxu1 %v5750_v62 }
 0x75e   :  { %2293 = vmatpush1.bf16.msra.mxu0 %v5753_v51  ;;  %2334 = vmatpush1.bf16.msra.mxu1 %v5756_v11 }
 0x75f   :  { %2365 = vmatprep.subr.bf16.mxu0 %v5414_v34  ;;  %2406 = vmatprep.subr.bf16.mxu1 %v5420_v21 }
 0x7d4   :  { %v2062_v15 = vpop.f32.mrb[44].mxu0  ;;  %v2103_v14 = vpop.f32.mrb[44].mxu1 }
 0x7d5   :  { %v2063_v53 = vadd.f32 %v2062_v15, %v6612_v12  ;;  %v2064_v55 = vpop.f32.mrb[45].mxu0  ;;  %v2105_v8 = vpop.f32.mrb[45].mxu1  ;;  %v2104_v11 = vadd.f32 %v2103_v14, %v6613_v47 }
 0x7d6   :  { %v2065_v62 = vadd.f32 %v2064_v55, %v4602_v63  ;;  %v2066_v7 = vpop.f32.mrb[46].mxu0  ;;  %v2107_v6 = vpop.f32.mrb[46].mxu1  ;;  %v2106_v34 = vadd.f32 %v2105_v8, %v6614_v4 }
 0x7d7   :  { %v2110_v5 = vmul.f32 0.5, %v2063_v53  ;;  %v2067_v51 = vpop.f32.mrb[47].mxu0  ;;  %v2108_v3 = vpop.f32.mrb[47].mxu1 }
 0x7d8   :  { %v2114_v46 = vmul.f32 0.5, %v2065_v62  ;;  %v2119_v21 = vmul.f32 0.5, %v2106_v34 }
 0x7d9   :  { %3618 = vtanh.f32 %v2110_v5 }
 0x7da   :  { %3620 = vtanh.f32 %v2114_v46 }
 0x7db   :  { %3622 = vtanh.f32 %v2104_v11 }
 0x7dc   :  { %3624 = vtanh.f32 %v2119_v21 }
 0x7e3   :  { %v3619_v45 = vpop.eup %3618 }
 0x7e4   :  { %v3621_v15 = vpop.eup %3620  ;;  %v2112_v12 = vmul.f32 0.5, %v3619_v45 }
 0x7e5   :  { %v2116_v44 = vmul.f32 0.5, %v3621_v15  ;;  %v3623_v7 = vpop.eup %3622 }
 0x7e6   :  { %v2113_v55 = vadd.f32 0.5, %v2112_v12  ;;  %v3625_v46 = vpop.eup %3624 }
 0x7e7   :  { %v2117_v6 = vadd.f32 0.5, %v2116_v44  ;;  %v2121_v5 = vmul.f32 0.5, %v3625_v46 }
 0x7e8   :  { %v2124_v53 = vmul.f32 %v3623_v7, %v2113_v55 }
 0x7e9   :  { %v2123_v3 = vmul.f32 %v2117_v6, %v5428_v16  ;;  %v2122_v34 = vadd.f32 0.5, %v2121_v5 }
 0x7eb   :  { %v5766_v62 = vadd.f32 %v2124_v53, %v2123_v3  ;;  %v3192_v53 = vld [vmem:[%s5984_s0 + $0x30] sm:$0xff] }
 0x7ed   :  { %6671 = vst [vmem:[#allocation83_spill] sm:$0xff] %v5766_v62  ;;  %3626 = vtanh.f32 %v5766_v62 }
 0x7f4   :  { %v2165_v51 = vpop.f32.mrb[48].mxu0  ;;  %v2206_v8 = vpop.f32.mrb[48].mxu1 }
 0x7f5   :  { %v2167_v11 = vpop.f32.mrb[49].mxu0  ;;  %v2208_v14 = vpop.f32.mrb[49].mxu1 }
 0x7f6   :  { %v2217_v45 = vcombine.low %v2165_v51, %v2167_v11  ;;  %v2218_v15 = vcombine.low %v2206_v8, %v2208_v14  ;;  %v2169_v21 = vpop.f32.mrb[50].mxu0  ;;  %v2210_v12 = vpop.f32.mrb[50].mxu1 }
 0x7f7   :  { %v3627_v4 = vpop.eup %3626  ;;  %v2170_v44 = vpop.f32.mrb[51].mxu0 }
 0x7f8   :  { %v2211_v55 = vpop.f32.mrb[51].mxu1  ;;  %v2225_v16 = vrot.slane %v2217_v45, %v6402_v54  ;;  %v2232_v7 = vrot.slane %v2218_v15, %v6402_v54  ;;  %v2127_v6 = vmul.f32 %v3627_v4, %v2122_v34 }
 0x7fa   :  { %v2233_v3 = vcombine.low %v2225_v16, %v2232_v7  ;;  %v2128_v46 = vpack.c.bf16 %v2127_v6, %v2127_v6 }
 0x7fc   :  { %v2235_v62 = vadd.f32 %v3192_v53, %v2233_v3  ;;  %2294 = vmatprep.mubr.bf16.mxu0 %v2128_v46  ;;  %2335 = vmatprep.mubr.bf16.mxu1 %v2128_v46 }
 0x7fe   :  { %v2236_v5 = vmul.f32 0.5, %v2235_v62  ;;  %v2241_v51 = vrot.slane %v2235_v62, 2  ;;  %v2247_v11 = vrot.slane %v2235_v62, 4  ;;  %v2250_v14 = vrot.slane %v2235_v62, 6 }
 0x800   :  { %3628 = vtanh.f32 %v2236_v5  ;;  %v2243_v8 = vmul.f32 0.5, %v2241_v51  ;;  %v2252_v45 = vmul.f32 0.5, %v2250_v14  ;;  %v6715_v14 = vld [vmem:[#allocation70_spill] sm:$0xff] }
 0x802   :  { %3630 = vtanh.f32 %v2243_v8  ;;  %v6713_v8 = vld [vmem:[#allocation68_spill] sm:$0xff] }
 0x803   :  { %3632 = vtanh.f32 %v2247_v11  ;;  %v6714_v11 = vld [vmem:[#allocation69_spill] sm:$0xff] }
 0x804   :  { %3634 = vtanh.f32 %v2252_v45  ;;  %v6716_v45 = vld [vmem:[#allocation71_spill] sm:$0xff] }
 0x80a   :  { %v3629_v15 = vpop.eup %3628 }
 0x80b   :  { %v2238_v4 = vmul.f32 0.5, %v3629_v15  ;;  %v6717_v15 = vld [vmem:[#allocation72_spill] sm:$0xff] }
 0x80c   :  { %v3631_v34 = vpop.eup %3630 }
 0x80d   :  { %v2239_v21 = vadd.f32 0.5, %v2238_v4  ;;  %v2245_v12 = vmul.f32 0.5, %v3631_v34  ;;  %v3633_v55 = vpop.eup %3632  ;;  %v6718_v4 = vld [vmem:[#allocation73_spill] sm:$0xff]  ;;  %v6719_v34 = vld [vmem:[#allocation74_spill] sm:$0xff] }
 0x80e   :  { %v3635_v53 = vpop.eup %3634 }
 0x80f   :  { %v2246_v44 = vadd.f32 0.5, %v2245_v12  ;;  %v2257_v7 = vmul.f32 %v3633_v55, %v2239_v21  ;;  %v2254_v3 = vmul.f32 0.5, %v3635_v53  ;;  %v6720_v21 = vld [vmem:[#allocation29_spill] sm:$0xff]  ;;  %v6723_v55 = vld [vmem:[#allocation79_spill] sm:$0xff]  ;;  %v6726_v53 = vld [vmem:[#allocation82_spill] sm:$0xff] }
 0x810   :  { %v6721_v12 = vld [vmem:[#allocation77_spill] sm:$0xff] }
 0x811   :  { %v2256_v16 = vmul.f32 %v2246_v44, %v5437_v1  ;;  %v2255_v62 = vadd.f32 0.5, %v2254_v3  ;;  %v6684_v1 = vld [vmem:[#allocation31_spill] sm:$0xff]  ;;  %v6722_v44 = vld [vmem:[#allocation78_spill] sm:$0xff] }
 0x813   :  { %v5775_v6 = vadd.f32 %v2257_v7, %v2256_v16  ;;  %v6724_v16 = vld [vmem:[#allocation80_spill] sm:$0xff]  ;;  %v6725_v7 = vld [vmem:[#allocation81_spill] sm:$0xff] }
 0x815   :  { %3636 = vtanh.f32 %v5775_v6 }
 0x81f   :  { %v3637_v46 = vpop.eup %3636 }
 0x820   :  { %v2260_v5 = vmul.f32 %v3637_v46, %v2255_v62  ;;  %v6727_v46 = vld [vmem:[#allocation26_spill] sm:$0xff] }
 0x822   :  { %v2261_v51 = vpack.c.bf16 %v2260_v5, %v2260_v5 }
 0x824   :  { %2295 = vmatmul.mubr.bf16.vlgmr.msra.gmra.mrb[52].mxu0 %v2261_v51  ;;  %2336 = vmatmul.mubr.bf16.vlgmr.msra.gmra.mrb[52].mxu1 %v2261_v51 }
 0x825   :  { %2366 = vmatpush1.bf16.msra.mxu0 %v5263_v32  ;;  %2407 = vmatpush1.bf16.msra.mxu1 %v5269_v27  ;;  %v6673_v32 = vld [vmem:[#allocation76_spill] sm:$0xff] }
 0x826   :  { %2367 = vmatprep.subr.bf16.mxu0 %v5275_v33  ;;  %2408 = vmatprep.subr.bf16.mxu1 %v5281_v38  ;;  %v6674_v27 = vld [vmem:[#allocation32_spill] sm:$0xff]  ;;  %v6675_v33 = vld [vmem:[#allocation33_spill] sm:$0xff]  ;;  %v6676_v38 = vld [vmem:[#allocation34_spill] sm:$0xff] }
 0x827   :  { %2397 = vmatprep.mubr.bf16.mxu0 %v6345_v59  ;;  %2438 = vmatprep.mubr.bf16.mxu1 %v6345_v59  ;;  %v6672_v59 = vld [vmem:[#allocation25_spill] sm:$0xff] }
 0x829   :  { %2368 = vmatpush1.bf16.msra.mxu0 %v5289_v60  ;;  %2409 = vmatpush1.bf16.msra.mxu1 %v5295_v28  ;;  %v6677_v60 = vld [vmem:[#allocation35_spill] sm:$0xff]  ;;  %v6678_v28 = vld [vmem:[#allocation36_spill] sm:$0xff] }
 0x82a   :  { %2369 = vmatprep.subr.bf16.mxu0 %v5301_v23  ;;  %2410 = vmatprep.subr.bf16.mxu1 %v5307_v30  ;;  %v6679_v23 = vld [vmem:[#allocation37_spill] sm:$0xff]  ;;  %v6680_v30 = vld [vmem:[#allocation38_spill] sm:$0xff] }
 0x82d   :  { %2370 = vmatpush1.bf16.msra.mxu0 %v5313_v35  ;;  %2411 = vmatpush1.bf16.msra.mxu1 %v5319_v58  ;;  %v6681_v35 = vld [vmem:[#allocation39_spill] sm:$0xff]  ;;  %v6682_v58 = vld [vmem:[#allocation40_spill] sm:$0xff] }
 0x82e   :  { %2371 = vmatprep.subr.bf16.mxu0 %v5325_v29  ;;  %2412 = vmatprep.subr.bf16.mxu1 %v5456_v24  ;;  %v6683_v29 = vld [vmem:[#allocation30_spill] sm:$0xff]  ;;  %v6685_v24 = vld [vmem:[#allocation85_spill] sm:$0xff] }
 0x831   :  { %2372 = vmatpush1.bf16.msra.mxu0 %v5462_v17  ;;  %2413 = vmatpush1.bf16.msra.mxu1 %v5468_v18  ;;  %v6686_v17 = vld [vmem:[#allocation41_spill] sm:$0xff]  ;;  %v6687_v18 = vld [vmem:[#allocation42_spill] sm:$0xff] }
 0x832   :  { %2373 = vmatprep.subr.bf16.mxu0 %v5474_v19  ;;  %2414 = vmatprep.subr.bf16.mxu1 %v5480_v2  ;;  %v6688_v19 = vld [vmem:[#allocation43_spill] sm:$0xff]  ;;  %v6689_v2 = vld [vmem:[#allocation44_spill] sm:$0xff] }
 0x835   :  { %2374 = vmatpush1.bf16.msra.mxu0 %v5486_v57  ;;  %2415 = vmatpush1.bf16.msra.mxu1 %v5492_v61  ;;  %v6690_v57 = vld [vmem:[#allocation45_spill] sm:$0xff]  ;;  %v6691_v61 = vld [vmem:[#allocation46_spill] sm:$0xff] }
 0x836   :  { %2375 = vmatprep.subr.bf16.mxu0 %v5498_v50  ;;  %2416 = vmatprep.subr.bf16.mxu1 %v5504_v0  ;;  %v6692_v50 = vld [vmem:[#allocation47_spill] sm:$0xff]  ;;  %v6693_v0 = vld [vmem:[#allocation48_spill] sm:$0xff] }
 0x839   :  { %2376 = vmatpush1.bf16.msra.mxu0 %v5510_v56  ;;  %2417 = vmatpush1.bf16.msra.mxu1 %v5516_v49  ;;  %v6694_v56 = vld [vmem:[#allocation49_spill] sm:$0xff]  ;;  %v6695_v49 = vld [vmem:[#allocation50_spill] sm:$0xff] }
 0x83a   :  { %2377 = vmatprep.subr.bf16.mxu0 %v5522_v52  ;;  %2418 = vmatprep.subr.bf16.mxu1 %v5528_v10  ;;  %v6696_v52 = vld [vmem:[#allocation51_spill] sm:$0xff]  ;;  %v6697_v10 = vld [vmem:[#allocation52_spill] sm:$0xff] }
 0x83d   :  { %2378 = vmatpush1.bf16.msra.mxu0 %v5534_v48  ;;  %2419 = vmatpush1.bf16.msra.mxu1 %v5540_v9  ;;  %v6698_v48 = vld [vmem:[#allocation53_spill] sm:$0xff]  ;;  %v6699_v9 = vld [vmem:[#allocation54_spill] sm:$0xff] }
 0x83e   :  { %2379 = vmatprep.subr.bf16.mxu0 %v5546_v31  ;;  %2420 = vmatprep.subr.bf16.mxu1 %v5552_v36  ;;  %v6700_v31 = vld [vmem:[#allocation55_spill] sm:$0xff]  ;;  %v6701_v36 = vld [vmem:[#allocation56_spill] sm:$0xff] }
 0x841   :  { %2380 = vmatpush1.bf16.msra.mxu0 %v5558_v25  ;;  %2421 = vmatpush1.bf16.msra.mxu1 %v5564_v26  ;;  %v6702_v25 = vld [vmem:[#allocation57_spill] sm:$0xff]  ;;  %v6703_v26 = vld [vmem:[#allocation58_spill] sm:$0xff] }
 0x842   :  { %2496 = vmatprep.subr.bf16.mxu0 %v5567_v22  ;;  %2537 = vmatprep.subr.bf16.mxu1 %v5570_v37  ;;  %v6704_v22 = vld [vmem:[#allocation59_spill] sm:$0xff]  ;;  %v6705_v37 = vld [vmem:[#allocation60_spill] sm:$0xff] }
 0x844   :  { %2398 = vmatmul.mubr.bf16.vlgmr.msra.gmra.mrb[56].mxu0 %v2261_v51  ;;  %2439 = vmatmul.mubr.bf16.vlgmr.msra.gmra.mrb[56].mxu1 %v2261_v51 }
 0x845   :  { %2497 = vmatpush1.bf16.msra.mxu0 %v5573_v20  ;;  %2538 = vmatpush1.bf16.msra.mxu1 %v5576_v13  ;;  %v6706_v20 = vld [vmem:[#allocation61_spill] sm:$0xff]  ;;  %v6707_v13 = vld [vmem:[#allocation62_spill] sm:$0xff] }
 0x846   :  { %2498 = vmatprep.subr.bf16.mxu0 %v5579_v39  ;;  %2539 = vmatprep.subr.bf16.mxu1 %v5582_v40  ;;  %v6708_v39 = vld [vmem:[#allocation63_spill] sm:$0xff]  ;;  %v6709_v40 = vld [vmem:[#allocation64_spill] sm:$0xff] }
 0x849   :  { %2499 = vmatpush1.bf16.msra.mxu0 %v5585_v41  ;;  %2540 = vmatpush1.bf16.msra.mxu1 %v5588_v42  ;;  %v6710_v41 = vld [vmem:[#allocation65_spill] sm:$0xff]  ;;  %v6711_v42 = vld [vmem:[#allocation66_spill] sm:$0xff] }
 0x84a   :  { %2500 = vmatprep.subr.bf16.mxu0 %v5591_v43  ;;  %2541 = vmatprep.subr.bf16.mxu1 %v6672_v59  ;;  %v6712_v43 = vld [vmem:[#allocation67_spill] sm:$0xff] }
 0x84d   :  { %2501 = vmatpush1.bf16.msra.mxu0 %v6673_v32  ;;  %2542 = vmatpush1.bf16.msra.mxu1 %v6674_v27 }
 0x84e   :  { %2502 = vmatprep.subr.bf16.mxu0 %v6675_v33  ;;  %2543 = vmatprep.subr.bf16.mxu1 %v6676_v38 }
 0x851   :  { %2503 = vmatpush1.bf16.msra.mxu0 %v6677_v60  ;;  %2544 = vmatpush1.bf16.msra.mxu1 %v6678_v28 }
 0x852   :  { %2504 = vmatprep.subr.bf16.mxu0 %v6679_v23  ;;  %2545 = vmatprep.subr.bf16.mxu1 %v6680_v30 }
 0x855   :  { %2505 = vmatpush1.bf16.msra.mxu0 %v6681_v35  ;;  %2546 = vmatpush1.bf16.msra.mxu1 %v6682_v58  ;;  %v6728_v35 = vld [vmem:[#allocation28_spill] sm:$0xff] }
 0x856   :  { %2506 = vmatprep.subr.bf16.mxu0 %v6683_v29  ;;  %2547 = vmatprep.subr.bf16.mxu1 %v6684_v1 }
 0x859   :  { %2507 = vmatpush1.bf16.msra.mxu0 %v6685_v24  ;;  %2548 = vmatpush1.bf16.msra.mxu1 %v6686_v17 }
 0x85a   :  { %2508 = vmatprep.subr.bf16.mxu0 %v6687_v18  ;;  %2549 = vmatprep.subr.bf16.mxu1 %v6688_v19 }
 0x85d   :  { %2509 = vmatpush1.bf16.msra.mxu0 %v6689_v2  ;;  %2550 = vmatpush1.bf16.msra.mxu1 %v6690_v57 }
 0x85e   :  { %2510 = vmatprep.subr.bf16.mxu0 %v6691_v61  ;;  %2551 = vmatprep.subr.bf16.mxu1 %v6692_v50  ;;  %v6729_v50 = vld [vmem:[#allocation83_spill] sm:$0xff] }
 0x861   :  { %2511 = vmatpush1.bf16.msra.mxu0 %v6693_v0  ;;  %2552 = vmatpush1.bf16.msra.mxu1 %v6694_v56 }
 0x862   :  { %2512 = vmatprep.subr.bf16.mxu0 %v6695_v49  ;;  %2553 = vmatprep.subr.bf16.mxu1 %v6696_v52 }
 0x865   :  { %2513 = vmatpush1.bf16.msra.mxu0 %v6697_v10  ;;  %2554 = vmatpush1.bf16.msra.mxu1 %v6698_v48 }
 0x866   :  { %2514 = vmatprep.subr.bf16.mxu0 %v6699_v9  ;;  %2555 = vmatprep.subr.bf16.mxu1 %v6700_v31 }
 0x869   :  { %2515 = vmatpush1.bf16.msra.mxu0 %v6701_v36  ;;  %2556 = vmatpush1.bf16.msra.mxu1 %v6702_v25 }
 0x86a   :  { %2516 = vmatprep.subr.bf16.mxu0 %v6703_v26  ;;  %2557 = vmatprep.subr.bf16.mxu1 %v6704_v22 }
 0x86d   :  { %2517 = vmatpush1.bf16.msra.mxu0 %v6705_v37  ;;  %2558 = vmatpush1.bf16.msra.mxu1 %v6706_v20 }
 0x86e   :  { %2518 = vmatprep.subr.bf16.mxu0 %v6707_v13  ;;  %2559 = vmatprep.subr.bf16.mxu1 %v6708_v39 }
 0x871   :  { %2519 = vmatpush1.bf16.msra.mxu0 %v6709_v40  ;;  %2560 = vmatpush1.bf16.msra.mxu1 %v6710_v41 }
 0x872   :  { %2520 = vmatprep.subr.bf16.mxu0 %v6711_v42  ;;  %2561 = vmatprep.subr.bf16.mxu1 %v6712_v43  ;;  %v3193_v43 = vld [vmem:[%s5984_s0 + $0x38] sm:$0xff]  ;;  %s3975_s0 = smov [#allocation4]  }
 0x873   :  { %s112_s22 = sshll.u32 %s3975_s0, 4  ;;  %s113_s22 = int_to_ptr.vmem [resolvable:$true] %s112_s22 }
 0x875   :  { %2521 = vmatpush1.bf16.msra.mxu0 %v6713_v8  ;;  %2562 = vmatpush1.bf16.msra.mxu1 %v6714_v11 }
 0x876   :  { %2522 = vmatprep.subr.bf16.mxu0 %v6715_v14  ;;  %2563 = vmatprep.subr.bf16.mxu1 %v6716_v45 }
 0x879   :  { %2523 = vmatpush1.bf16.msra.mxu0 %v6717_v15  ;;  %2564 = vmatpush1.bf16.msra.mxu1 %v6718_v4 }
 0x87a   :  { %2524 = vmatprep.subr.bf16.mxu0 %v6719_v34  ;;  %2565 = vmatprep.subr.bf16.mxu1 %v6720_v21 }
 0x87d   :  { %2525 = vmatpush1.bf16.msra.mxu0 %v6721_v12  ;;  %2566 = vmatpush1.bf16.msra.mxu1 %v6722_v44 }
 0x87e   :  { %2526 = vmatprep.subr.bf16.mxu0 %v6723_v55  ;;  %2567 = vmatprep.subr.bf16.mxu1 %v6724_v16 }
 0x881   :  { %2527 = vmatpush1.bf16.msra.mxu0 %v6725_v7  ;;  %2568 = vmatpush1.bf16.msra.mxu1 %v6726_v53 }
 0x8f7   :  { %v2296_v3 = vpop.f32.mrb[52].mxu0  ;;  %v2337_v62 = vpop.f32.mrb[52].mxu1 }
 0x8f8   :  { %v2297_v5 = vadd.f32 %v2296_v3, %v6727_v46  ;;  %v2298_v51 = vpop.f32.mrb[53].mxu0  ;;  %v2339_v59 = vpop.f32.mrb[53].mxu1  ;;  %v2338_v30 = vadd.f32 %v2337_v62, %v6613_v47 }
 0x8f9   :  { %v2299_v32 = vadd.f32 %v2298_v51, %v4602_v63  ;;  %v2300_v27 = vpop.f32.mrb[54].mxu0  ;;  %v2341_v33 = vpop.f32.mrb[54].mxu1  ;;  %v2340_v58 = vadd.f32 %v2339_v59, %v6728_v35 }
 0x8fa   :  { %v2344_v38 = vmul.f32 0.5, %v2297_v5  ;;  %v2301_v60 = vpop.f32.mrb[55].mxu0  ;;  %v2342_v28 = vpop.f32.mrb[55].mxu1 }
 0x8fb   :  { %v2348_v23 = vmul.f32 0.5, %v2299_v32  ;;  %v2353_v29 = vmul.f32 0.5, %v2340_v58 }
 0x8fc   :  { %3638 = vtanh.f32 %v2344_v38 }
 0x8fd   :  { %3640 = vtanh.f32 %v2348_v23 }
 0x8fe   :  { %3642 = vtanh.f32 %v2338_v30 }
 0x8ff   :  { %3644 = vtanh.f32 %v2353_v29 }
 0x906   :  { %v3639_v1 = vpop.eup %3638 }
 0x907   :  { %v3641_v24 = vpop.eup %3640  ;;  %v2346_v17 = vmul.f32 0.5, %v3639_v1 }
 0x908   :  { %v2350_v18 = vmul.f32 0.5, %v3641_v24  ;;  %v3643_v2 = vpop.eup %3642 }
 0x909   :  { %v2347_v19 = vadd.f32 0.5, %v2346_v17  ;;  %v3645_v49 = vpop.eup %3644 }
 0x90a   :  { %v2351_v57 = vadd.f32 0.5, %v2350_v18  ;;  %v2355_v52 = vmul.f32 0.5, %v3645_v49 }
 0x90b   :  { %v2358_v61 = vmul.f32 %v3643_v2, %v2347_v19 }
 0x90c   :  { %v2357_v0 = vmul.f32 %v2351_v57, %v6729_v50  ;;  %v2356_v36 = vadd.f32 0.5, %v2355_v52 }
 0x90e   :  { %v5879_v56 = vadd.f32 %v2358_v61, %v2357_v0 }
 0x910   :  { %3646 = vtanh.f32 %v5879_v56 }
 0x917   :  { %v2399_v10 = vpop.f32.mrb[56].mxu0  ;;  %v2440_v48 = vpop.f32.mrb[56].mxu1 }
 0x918   :  { %v2401_v9 = vpop.f32.mrb[57].mxu0  ;;  %v2442_v31 = vpop.f32.mrb[57].mxu1 }
 0x919   :  { %v2451_v25 = vcombine.low %v2399_v10, %v2401_v9  ;;  %v2452_v26 = vcombine.low %v2440_v48, %v2442_v31  ;;  %v2403_v22 = vpop.f32.mrb[58].mxu0  ;;  %v2444_v37 = vpop.f32.mrb[58].mxu1 }
 0x91a   :  { %v3647_v20 = vpop.eup %3646  ;;  %v2404_v13 = vpop.f32.mrb[59].mxu0 }
 0x91b   :  { %v2445_v39 = vpop.f32.mrb[59].mxu1  ;;  %v2459_v40 = vrot.slane %v2451_v25, %v6402_v54  ;;  %v2466_v41 = vrot.slane %v2452_v26, %v6402_v54  ;;  %v2361_v42 = vmul.f32 %v3647_v20, %v2356_v36 }
 0x91d   :  { %v2467_v8 = vcombine.low %v2459_v40, %v2466_v41  ;;  %v2362_v11 = vpack.c.bf16 %v2361_v42, %v2361_v42 }
 0x91f   :  { %v2469_v14 = vadd.f32 %v3193_v43, %v2467_v8  ;;  %2528 = vmatprep.mubr.bf16.mxu0 %v2362_v11  ;;  %2569 = vmatprep.mubr.bf16.mxu1 %v2362_v11 }
 0x921   :  { %v2470_v45 = vmul.f32 0.5, %v2469_v14  ;;  %v2475_v15 = vrot.slane %v2469_v14, 2  ;;  %v2481_v34 = vrot.slane %v2469_v14, 4  ;;  %v2484_v21 = vrot.slane %v2469_v14, 6 }
 0x923   :  { %3648 = vtanh.f32 %v2470_v45  ;;  %v2477_v4 = vmul.f32 0.5, %v2475_v15  ;;  %v2486_v12 = vmul.f32 0.5, %v2484_v21 }
 0x925   :  { %3650 = vtanh.f32 %v2477_v4 }
 0x926   :  { %3652 = vtanh.f32 %v2481_v34 }
 0x927   :  { %3654 = vtanh.f32 %v2486_v12 }
 0x92d   :  { %v3649_v54 = vpop.eup %3648 }
 0x92e   :  { %v2472_v44 = vmul.f32 0.5, %v3649_v54 }
 0x92f   :  { %v3651_v55 = vpop.eup %3650 }
 0x930   :  { %v2473_v16 = vadd.f32 0.5, %v2472_v44  ;;  %v2479_v7 = vmul.f32 0.5, %v3651_v55  ;;  %v3653_v3 = vpop.eup %3652 }
 0x931   :  { %v3655_v59 = vpop.eup %3654 }
 0x932   :  { %v2480_v53 = vadd.f32 0.5, %v2479_v7  ;;  %v2491_v5 = vmul.f32 %v3653_v3, %v2473_v16  ;;  %v2488_v32 = vmul.f32 0.5, %v3655_v59 }
 0x934   :  { %v2490_v62 = vmul.f32 %v2480_v53, %v5775_v6  ;;  %v2489_v27 = vadd.f32 0.5, %v2488_v32 }
 0x936   :  { %v2492_v51 = vadd.f32 %v2491_v5, %v2490_v62 }
 0x938   :  { %3656 = vtanh.f32 %v2492_v51 }
 0x942   :  { %v3657_v33 = vpop.eup %3656 }
 0x943   :  { %v2494_v38 = vmul.f32 %v3657_v33, %v2489_v27 }
 0x945   :  { %v2495_v60 = vpack.c.bf16 %v2494_v38, %v2494_v38 }
 0x947   :  { %2529 = vmatmul.mubr.bf16.vlgmr.msra.gmra.mrb[60].mxu0 %v2495_v60  ;;  %2570 = vmatmul.mubr.bf16.vlgmr.msra.gmra.mrb[60].mxu1 %v2495_v60 }
 0x948   :  { %3914 = shalt.err (!%p3911_p4)  }
 0x949   :  { %s3915_s19 = scalar_lea.vmem %s113_s22, 1024  ;;  %p3920_p6 = scmp.lt.s32.totalorder %s113_s22, %s113_s22 }
 0x94a   :  { %p3916_p5 = scmp.ne.s32.totalorder %s113_s22, %s3915_s19  ;;  %p3921_p7 = scmp.lt.s32.totalorder %s3915_s19, %s3915_s19 }
 0x94c   :  { %p3922_p8 = por %p3921_p7, %p3920_p6 }
 0x94e   :  { %p3923_p9 = pnand %p3922_p8, %p3916_p5 }
 0x950   :  { %3926 = shalt.err (!%p3923_p9)  }
 0x951   :  { %115 = dma.hbm_to_vmem [thread:$0]  %s5997_s13, 1024, %s113_s22, [#allocation6 + $0x2] }
 0x952   :  { %s3927_s30 = scalar_lea.hbm %s5998_s14, 3072 }
 0x953   :  { %p3928_p10 = scmp.ne.s32.totalorder %s5998_s14, %s3927_s30  ;;  %p3931_p11 = scmp.lt.u32.totalorder %s3927_s30, %s5998_s14 }
 0x955   :  { %p3933_p12 = pnand %p3931_p11, %p3928_p10 }
 0x957   :  { %3936 = shalt.err (!%p3933_p12)  }
 0x958   :  { %s3937_s0 = scalar_lea.vmem %s125_s27, 3072  ;;  %p3942_p0 = scmp.lt.s32.totalorder %s125_s27, %s125_s27 }
 0x959   :  { %p3938_p13 = scmp.ne.s32.totalorder %s125_s27, %s3937_s0  ;;  %p3943_p1 = scmp.lt.s32.totalorder %s3937_s0, %s3937_s0 }
 0x95b   :  { %p3944_p2 = por %p3943_p1, %p3942_p0 }
 0x95d   :  { %p3945_p3 = pnand %p3944_p2, %p3938_p13 }
 0x95f   :  { %3948 = shalt.err (!%p3945_p3)  }
 0x960   :  { %127 = dma.hbm_to_vmem [thread:$0]  %s5998_s14, 3072, %s125_s27, [#allocation6 + $0x3] }
 0xa1a   :  { %v2530_v6 = vpop.f32.mrb[60].mxu0  ;;  %v2571_v28 = vpop.f32.mrb[60].mxu1 }
 0xa1b   :  { %v2531_v23 = vadd.f32 %v2530_v6, %v6727_v46  ;;  %v2532_v30 = vpop.f32.mrb[61].mxu0  ;;  %v2573_v58 = vpop.f32.mrb[61].mxu1  ;;  %v2572_v57 = vadd.f32 %v2571_v28, %v6613_v47 }
 0xa1c   :  { %v2533_v29 = vadd.f32 %v2532_v30, %v4602_v63  ;;  %v2534_v1 = vpop.f32.mrb[62].mxu0  ;;  %v2575_v24 = vpop.f32.mrb[62].mxu1  ;;  %v2574_v61 = vadd.f32 %v2573_v58, %v6728_v35 }
 0xa1d   :  { %v2578_v17 = vmul.f32 0.5, %v2531_v23  ;;  %v2535_v18 = vpop.f32.mrb[63].mxu0  ;;  %v2576_v19 = vpop.f32.mrb[63].mxu1 }
 0xa1e   :  { %v2582_v2 = vmul.f32 0.5, %v2533_v29  ;;  %v2587_v50 = vmul.f32 0.5, %v2574_v61 }
 0xa1f   :  { %3658 = vtanh.f32 %v2578_v17 }
 0xa20   :  { %3660 = vtanh.f32 %v2582_v2 }
 0xa21   :  { %3662 = vtanh.f32 %v2572_v57 }
 0xa22   :  { %3664 = vtanh.f32 %v2587_v50 }
 0xa29   :  { %v3659_v0 = vpop.eup %3658 }
 0xa2a   :  { %v3661_v46 = vpop.eup %3660  ;;  %v2580_v49 = vmul.f32 0.5, %v3659_v0 }
 0xa2b   :  { %v2584_v52 = vmul.f32 0.5, %v3661_v46  ;;  %v3663_v10 = vpop.eup %3662 }
 0xa2c   :  { %v2581_v63 = vadd.f32 0.5, %v2580_v49  ;;  %v3665_v25 = vpop.eup %3664 }
 0xa2d   :  { %v2585_v48 = vadd.f32 0.5, %v2584_v52  ;;  %v2589_v47 = vmul.f32 0.5, %v3665_v25 }
 0xa2e   :  { %v2592_v9 = vmul.f32 %v3663_v10, %v2581_v63 }
 0xa2f   :  { %v2591_v31 = vmul.f32 %v2585_v48, %v5879_v56  ;;  %v2590_v26 = vadd.f32 0.5, %v2589_v47 }
 0xa31   :  { %v2593_v36 = vadd.f32 %v2592_v9, %v2591_v31 }
 0xa33   :  { %3666 = vtanh.f32 %v2593_v36 }
 0xa3d   :  { %v3667_v22 = vpop.eup %3666 }
 0xa3e   :  { %v2595_v37 = vmul.f32 %v3667_v22, %v2590_v26 }
 0xa40   :  { %v5917_v35 = vpack.c.bf16 %v2595_v37, %v2595_v37 }
 0xa41   :  { %3951 = dma.done.wait [#allocation6], 1024 }
 0xa42   :  { %3952 = vsyncadd [#allocation6], 4294966272 }
 0xa43   :  { %3953 = dma.done.wait [#allocation6 + $0x1], 6144 }
 0xa44   :  { %3954 = vsyncadd [#allocation6 + $0x1], 4294961152 }
 0xa45   :  { %3955 = dma.done.wait [#allocation6 + $0x2], 1024 }
 0xa46   :  { %3956 = vsyncadd [#allocation6 + $0x2], 4294966272 }
 0xa47   :  { %3957 = dma.done.wait [#allocation6 + $0x3], 3072 }
 0xa48   :  { %3958 = vsyncadd [#allocation6 + $0x3], 4294964224  ;;  %vm2631_vm0 = vcmask 1044480   ;;  %v3977_v20 = vmov 0.0   ;;  %vm3978_vm1 = vmmov 0   ;;  %vm2632_vm2 = vcmask 1045504  }
 0xa49   :  { %3277 = vmatprep.subr.bf16.mxu0 %v3977_v20  ;;  %3283 = vmatprep.subr.bf16.mxu1 %v3977_v20  ;;  %v3979_v56 = vmov 65535   ;;  %v3860_v40 = vld [vmem:[%s5989_s5] sm:$0x3f]   ;;  %v2681_v11 = vld [vmem:[#allocation2 + $0x8] sm:$0xff]  ;;  %vm2627_vm3 = vcmask 89088   ;;  %v2682_v14 = vld [vmem:[#allocation2 + $0x10] sm:$0xff] }
 0xa4a   :  { %3279 = vmatprep.mubr.msk.bf16.mxu0 %vm3978_vm1, %v3977_v20  ;;  %3299 = vmatprep.mubr.msk.bf16.mxu1 %vm3978_vm1, %v3977_v20  ;;  %v2633_v13 = vsel %vm2631_vm0, 4294967295, %v3979_v56  ;;  %v2611_v41 = vld [vmem:[%s5988_s4] sm:$0x3]  ;;  %v2683_v45 = vld [vmem:[#allocation2 + $0x18] sm:$0xff]  ;;  %v2685_v4 = vld [vmem:[#allocation2 + $0x28] sm:$0xff] }
 0xa4b   :  { %v2634_v39 = vsel %vm2632_vm2, %v2633_v13, 0  ;;  %v2680_v42 = vld [vmem:[#allocation2] sm:$0xff]  ;;  %v2612_v8 = vpack.c.bf16 %v2611_v41, %v2611_v41  ;;  %v2686_v34 = vld [vmem:[#allocation2 + $0x30] sm:$0xff]  ;;  %v2687_v21 = vld [vmem:[#allocation2 + $0x38] sm:$0xff] }
 0xa4c   :  { %v2636_v43 = vand.u32 %v3860_v40, %v2634_v39  ;;  %3284 = vmatpush3.bf16.msra.mxu1 %v2680_v42  ;;  %v2684_v15 = vld [vmem:[#allocation2 + $0x20] sm:$0xff]  ;;  %v2737_v12 = vld [vmem:[#allocation3 + $0x8] sm:$0xff]  ;;  %v2739_v55 = vld [vmem:[#allocation3 + $0x18] sm:$0xff] }
 0xa4d   :  { %3285 = vmatprep.subr.bf16.mxu1 %v3977_v20  ;;  %v2736_v54 = vld [vmem:[#allocation3] sm:$0xff]  ;;  %v2743_v16 = vld [vmem:[#allocation3 + $0x38] sm:$0xff]  ;;  %v2742_v7 = vld [vmem:[#allocation3 + $0x30] sm:$0xff] }
 0xa4e   :  { %3278 = vmatpush3.bf16.msra.mxu0 %v2636_v43  ;;  %v2740_v44 = vld [vmem:[#allocation3 + $0x20] sm:$0xff]  ;;  %v2746_v53 = vld [vmem:[#allocation3 + $0x50] sm:$0xff]  ;;  %v2745_v3 = vld [vmem:[#allocation3 + $0x48] sm:$0xff] }
 0xa4f   :  { %2801 = vmatprep.subr.bf16.mxu0 %v2737_v12  ;;  %v2749_v62 = vld [vmem:[#allocation3 + $0x68] sm:$0xff]  ;;  %v2748_v5 = vld [vmem:[#allocation3 + $0x60] sm:$0xff]  ;;  %v2751_v59 = vld [vmem:[#allocation3 + $0x78] sm:$0xff] }
 0xa50   :  { %3286 = vmatpush3.bf16.msra.mxu1 %v2681_v11  ;;  %v2752_v51 = vld [vmem:[#allocation3 + $0x80] sm:$0xff]  ;;  %v2755_v32 = vld [vmem:[#allocation3 + $0x98] sm:$0xff]  ;;  %v2754_v27 = vld [vmem:[#allocation3 + $0x90] sm:$0xff] }
 0xa51   :  { %3280 = vmatmul.mubr.msk.bf16.vlgmr.msra.gmra.mrb[64].mxu0 %vm2627_vm3, %v2612_v8  ;;  %3287 = vmatprep.subr.bf16.mxu1 %v3977_v20  ;;  %v2758_v33 = vld [vmem:[#allocation3 + $0xb0] sm:$0xff]  ;;  %v2757_v38 = vld [vmem:[#allocation3 + $0xa8] sm:$0xff]  ;;  %v2760_v6 = vld [vmem:[#allocation3 + $0xc0] sm:$0xff] }
 0xa52   :  { %2802 = vmatpush1.bf16.msra.mxu0 %v2736_v54  ;;  %v2761_v60 = vld [vmem:[#allocation3 + $0xc8] sm:$0xff]  ;;  %v2764_v28 = vld [vmem:[#allocation3 + $0xe0] sm:$0xff]  ;;  %v2763_v23 = vld [vmem:[#allocation3 + $0xd8] sm:$0xff] }
 0xa53   :  { %2803 = vmatprep.subr.bf16.mxu0 %v2740_v44  ;;  %v2767_v30 = vld [vmem:[#allocation3 + $0xf8] sm:$0xff]  ;;  %v2766_v58 = vld [vmem:[#allocation3 + $0xf0] sm:$0xff]  ;;  %v2769_v1 = vld [vmem:[#allocation3 + $0x108] sm:$0xff] }
 0xa54   :  { %3288 = vmatpush3.bf16.msra.mxu1 %v2682_v14  ;;  %v2770_v29 = vld [vmem:[#allocation3 + $0x110] sm:$0xff]  ;;  %v2773_v24 = vld [vmem:[#allocation3 + $0x128] sm:$0xff]  ;;  %v2772_v17 = vld [vmem:[#allocation3 + $0x120] sm:$0xff] }
 0xa55   :  { %3289 = vmatprep.subr.bf16.mxu1 %v3977_v20  ;;  %v2776_v18 = vld [vmem:[#allocation3 + $0x140] sm:$0xff]  ;;  %v2775_v19 = vld [vmem:[#allocation3 + $0x138] sm:$0xff]  ;;  %v2778_v57 = vld [vmem:[#allocation3 + $0x150] sm:$0xff] }
 0xa56   :  { %2804 = vmatpush1.bf16.msra.mxu0 %v2739_v55  ;;  %v2779_v2 = vld [vmem:[#allocation3 + $0x158] sm:$0xff]  ;;  %v3194_v61 = vld [vmem:[%s5990_s6] ss:$0 sm:$0xff]  ;;  %v2782_v48 = vld [vmem:[#allocation3 + $0x170] sm:$0xff] }
 0xa57   :  { %2805 = vmatprep.subr.bf16.mxu0 %v2743_v16  ;;  %v2781_v9 = vld [vmem:[#allocation3 + $0x168] sm:$0xff]  ;;  %v2762_v31 = vld [vmem:[#allocation3 + $0xd0] sm:$0xff]  ;;  %v2768_v26 = vld [vmem:[#allocation3 + $0x100] sm:$0xff] }
 0xa58   :  { %3290 = vmatpush3.bf16.msra.mxu1 %v2683_v45  ;;  %v2738_v36 = vld [vmem:[#allocation3 + $0x10] sm:$0xff]  ;;  %v2765_v25 = vld [vmem:[#allocation3 + $0xe8] sm:$0xff]  ;;  %v2744_v22 = vld [vmem:[#allocation3 + $0x40] sm:$0xff] }
 0xa59   :  { %3291 = vmatprep.subr.bf16.mxu1 %v3977_v20  ;;  %v2741_v47 = vld [vmem:[#allocation3 + $0x28] sm:$0xff]  ;;  %v2771_v37 = vld [vmem:[#allocation3 + $0x118] sm:$0xff]  ;;  %v2774_v13 = vld [vmem:[#allocation3 + $0x130] sm:$0xff] }
 0xa5a   :  { %2806 = vmatpush1.bf16.msra.mxu0 %v2742_v7  ;;  %v2747_v56 = vld [vmem:[#allocation3 + $0x58] sm:$0xff]  ;;  %v2750_v39 = vld [vmem:[#allocation3 + $0x70] sm:$0xff]  ;;  %v2777_v40 = vld [vmem:[#allocation3 + $0x148] sm:$0xff] }
 0xa5b   :  { %2807 = vmatprep.subr.bf16.mxu0 %v2746_v53  ;;  %v2753_v41 = vld [vmem:[#allocation3 + $0x88] sm:$0xff]  ;;  %v2780_v42 = vld [vmem:[#allocation3 + $0x160] sm:$0xff]  ;;  %v2783_v8 = vld [vmem:[#allocation3 + $0x178] sm:$0xff] }
 0xa5c   :  { %3292 = vmatpush3.bf16.msra.mxu1 %v2684_v15  ;;  %v2756_v43 = vld [vmem:[#allocation3 + $0xa0] sm:$0xff]  ;;  %v2759_v11 = vld [vmem:[#allocation3 + $0xb8] sm:$0xff]  ;;  %v2887_v44 = vld [vmem:[#allocation4 + $0x8] sm:$0xff] }
 0xa5d   :  { %3293 = vmatprep.subr.bf16.mxu1 %v3977_v20  ;;  %v3197_v14 = vld [vmem:[%s5991_s7] ss:$0 sm:$0xff]  ;;  %v2888_v55 = vld [vmem:[#allocation4 + $0x10] sm:$0xff]  ;;  %v2889_v16 = vld [vmem:[#allocation4 + $0x18] sm:$0xff] }
 0xa5e   :  { %2808 = vmatpush1.bf16.msra.mxu0 %v2745_v3  ;;  %v2886_v54 = vld [vmem:[#allocation4] sm:$0xff]  ;;  %v2892_v53 = vld [vmem:[#allocation4 + $0x30] sm:$0xff]  ;;  %v2893_v3 = vld [vmem:[#allocation4 + $0x38] sm:$0xff] }
 0xa5f   :  { %2809 = vmatprep.subr.bf16.mxu0 %v2749_v62  ;;  %v2890_v7 = vld [vmem:[#allocation4 + $0x20] sm:$0xff] }
 0xa60   :  { %3294 = vmatpush3.bf16.msra.mxu1 %v2685_v4  ;;  %v2953_v62 = vld [vmem:[#allocation5 + $0x40] sm:$0xff] }
 0xa61   :  { %3295 = vmatprep.subr.bf16.mxu1 %v3977_v20 }
 0xa62   :  { %2810 = vmatpush1.bf16.msra.mxu0 %v2748_v5  ;;  %v2945_v5 = vld [vmem:[#allocation5] sm:$0xff] }
 0xa63   :  { %2811 = vmatprep.subr.bf16.mxu0 %v2752_v51  ;;  %v2954_v51 = vld [vmem:[#allocation5 + $0x48] sm:$0xff] }
 0xa64   :  { %3296 = vmatpush3.bf16.msra.mxu1 %v2686_v34 }
 0xa65   :  { %3297 = vmatprep.subr.bf16.mxu1 %v3977_v20 }
 0xa66   :  { %2812 = vmatpush1.bf16.msra.mxu0 %v2751_v59  ;;  %v2946_v59 = vld [vmem:[#allocation5 + $0x8] sm:$0xff] }
 0xa67   :  { %2813 = vmatprep.subr.bf16.mxu0 %v2755_v32  ;;  %v2955_v32 = vld [vmem:[#allocation5 + $0x50] sm:$0xff] }
 0xa68   :  { %3298 = vmatpush3.bf16.msra.mxu1 %v2687_v21 }
 0xa69   :  { %3215 = vmatprep.subr.bf16.mxu1 %v2762_v31 }
 0xa6a   :  { %2814 = vmatpush1.bf16.msra.mxu0 %v2754_v27  ;;  %v2947_v27 = vld [vmem:[#allocation5 + $0x10] sm:$0xff] }
 0xa6b   :  { %2815 = vmatprep.subr.bf16.mxu0 %v2758_v33  ;;  %v2956_v33 = vld [vmem:[#allocation5 + $0x58] sm:$0xff] }
 0xa6e   :  { %2816 = vmatpush1.bf16.msra.mxu0 %v2757_v38  ;;  %v2948_v38 = vld [vmem:[#allocation5 + $0x18] sm:$0xff] }
 0xa6f   :  { %2817 = vmatprep.subr.bf16.mxu0 %v2761_v60  ;;  %v2957_v60 = vld [vmem:[#allocation5 + $0x60] sm:$0xff] }
 0xa72   :  { %2818 = vmatpush1.bf16.msra.mxu0 %v2760_v6  ;;  %v2949_v6 = vld [vmem:[#allocation5 + $0x20] sm:$0xff] }
 0xa73   :  { %2819 = vmatprep.subr.bf16.mxu0 %v2764_v28  ;;  %v2958_v28 = vld [vmem:[#allocation5 + $0x68] sm:$0xff] }
 0xa76   :  { %2820 = vmatpush1.bf16.msra.mxu0 %v2763_v23  ;;  %v2950_v23 = vld [vmem:[#allocation5 + $0x28] sm:$0xff] }
 0xa77   :  { %2821 = vmatprep.subr.bf16.mxu0 %v2767_v30  ;;  %v2959_v30 = vld [vmem:[#allocation5 + $0x70] sm:$0xff] }
 0xa7a   :  { %2822 = vmatpush1.bf16.msra.mxu0 %v2766_v58  ;;  %v2784_v58 = vld [vmem:[%s5992_s8] sm:$0x7] }
 0xa7b   :  { %2823 = vmatprep.subr.bf16.mxu0 %v2770_v29  ;;  %v6730_v29 = vld [vmem:[#allocation75_spill] sm:$0xff] }
 0xa7e   :  { %2824 = vmatpush1.bf16.msra.mxu0 %v2769_v1  ;;  %v6731_v1 = vsub.s32 0, %v6730_v29 }
 0xa7f   :  { %2825 = vmatprep.subr.bf16.mxu0 %v2773_v24 }
 0xa80   :  { %v2789_v24 = vrot.slane %v2784_v58, %v6731_v1 }
 0xa82   :  { %2826 = vmatpush1.bf16.msra.mxu0 %v2772_v17  ;;  %v6732_v17 = vsub.s32 1, %v6730_v29 }
 0xa83   :  { %2827 = vmatprep.subr.bf16.mxu0 %v2776_v18 }
 0xa84   :  { %v2793_v18 = vrot.slane %v2784_v58, %v6732_v17 }
 0xa86   :  { %2828 = vmatpush1.bf16.msra.mxu0 %v2775_v19 }
 0xa87   :  { %2829 = vmatprep.subr.bf16.mxu0 %v2779_v2 }
 0xa8a   :  { %2830 = vmatpush1.bf16.msra.mxu0 %v2778_v57 }
 0xa8b   :  { %2831 = vmatprep.subr.bf16.mxu0 %v2782_v48 }
 0xa8e   :  { %2832 = vmatpush1.bf16.msra.mxu0 %v2781_v9 }
 0xa8f   :  { %3246 = vmatprep.subr.bf16.mxu0 %v2953_v62 }
 0xb24   :  { %v2672_v50 = vpop.f32.mrb[64].mxu0 }
 0xb25   :  { %v2673_v0 = vadd.f32 %v3194_v61, %v2672_v50  ;;  %v3281_v46 = vpop.f32.mrb[65].mxu0 }
 0xb26   :  { %v2675_v49 = vpop.f32.mrb[66].mxu0 }
 0xb27   :  { %v2678_v52 = vmax.f32 %v2673_v0, 0.0  ;;  %v3282_v63 = vpop.f32.mrb[67].mxu0 }
 0xb29   :  { %v2679_v10 = vpack.c.bf16 %v2678_v52, %v2678_v52 }
 0xb2b   :  { %3300 = vmatmul.mubr.bf16.vlgmr.msra.gmra.mrb[64].mxu1 %v2679_v10 }
 0xb2c   :  { %3216 = vmatpush3.bf16.msra.mxu1 %v2738_v36  ;;  %v2961_v36 = vld [vmem:[#allocation5 + $0x80] sm:$0xff] }
 0xb2d   :  { %3217 = vmatprep.subr.bf16.mxu1 %v2765_v25 }
 0xb30   :  { %3218 = vmatpush3.bf16.msra.mxu1 %v2741_v47  ;;  %v2962_v47 = vld [vmem:[#allocation5 + $0x88] sm:$0xff] }
 0xb31   :  { %3219 = vmatprep.subr.bf16.mxu1 %v2768_v26  ;;  %v2963_v26 = vld [vmem:[#allocation5 + $0x90] sm:$0xff] }
 0xb34   :  { %3220 = vmatpush3.bf16.msra.mxu1 %v2744_v22  ;;  %v2964_v22 = vld [vmem:[#allocation5 + $0x98] sm:$0xff] }
 0xb35   :  { %3221 = vmatprep.subr.bf16.mxu1 %v2771_v37  ;;  %v2965_v37 = vld [vmem:[#allocation5 + $0xa0] sm:$0xff] }
 0xb38   :  { %3222 = vmatpush3.bf16.msra.mxu1 %v2747_v56  ;;  %v6733_v56 = vsub.s32 2, %v6730_v29 }
 0xb39   :  { %3223 = vmatprep.subr.bf16.mxu1 %v2774_v13 }
 0xb3a   :  { %v2797_v13 = vrot.slane %v2784_v58, %v6733_v56 }
 0xb3c   :  { %3224 = vmatpush3.bf16.msra.mxu1 %v2750_v39  ;;  %v2966_v39 = vld [vmem:[#allocation5 + $0xa8] sm:$0xff] }
 0xb3d   :  { %3225 = vmatprep.subr.bf16.mxu1 %v2777_v40 }
 0xb40   :  { %3226 = vmatpush3.bf16.msra.mxu1 %v2753_v41  ;;  %v2967_v41 = vld [vmem:[#allocation5 + $0xb0] sm:$0xff] }
 0xb41   :  { %3227 = vmatprep.subr.bf16.mxu1 %v2780_v42 }
 0xb44   :  { %3228 = vmatpush3.bf16.msra.mxu1 %v2756_v43  ;;  %v2968_v43 = vld [vmem:[#allocation5 + $0xb8] sm:$0xff] }
 0xb45   :  { %3229 = vmatprep.subr.bf16.mxu1 %v2783_v8 }
 0xb48   :  { %3230 = vmatpush3.bf16.msra.mxu1 %v2759_v11  ;;  %v2951_v11 = vld [vmem:[#allocation5 + $0x30] sm:$0xff] }
 0xb49   :  { %3303 = vmatprep.subr.bf16.mxu1 %v3977_v20 }
 0xbfe   :  { %v2729_v45 = vpop.f32.mrb[64].mxu1 }
 0xbff   :  { %v2730_v15 = vadd.f32 %v3197_v14, %v2729_v45  ;;  %v3301_v4 = vpop.f32.mrb[65].mxu1  ;;  %v2960_v14 = vld [vmem:[#allocation5 + $0x78] sm:$0xff] }
 0xc00   :  { %v2732_v34 = vpop.f32.mrb[66].mxu1  ;;  %v2952_v45 = vld [vmem:[#allocation5 + $0x38] sm:$0xff] }
 0xc01   :  { %v2735_v21 = vpack.c.bf16 %v2730_v15, %v2730_v15  ;;  %v3302_v12 = vpop.f32.mrb[67].mxu1  ;;  %v3198_v15 = vld [vmem:[%s5993_s9] ss:$0 sm:$0xff] }
 0xc03   :  { %2833 = vmatprep.mubr.bf16.mxu0 %v2735_v21  ;;  %2874 = vmatprep.mubr.bf16.mxu1 %v2735_v21 }
 0xc04   :  { %2834 = vmatmul.mubr.bf16.vlgmr.msra.gmra.mrb[68].mxu0 %v5917_v35  ;;  %2875 = vmatmul.mubr.bf16.vlgmr.msra.gmra.mrb[68].mxu1 %v5917_v35  ;;  %v2891_v35 = vld [vmem:[#allocation4 + $0x28] sm:$0xff] }
 0xc05   :  { %3304 = vmatpush3.bf16.msra.mxu1 %v2886_v54  ;;  %3319 = vmatprep.mubr.msk.bf16.mxu1 %vm3978_vm1, %v3977_v20 }
 0xc06   :  { %3305 = vmatprep.subr.bf16.mxu1 %v3977_v20  ;;  %3247 = vmatpush3.bf16.msra.mxu0 %v2945_v5 }
 0xc07   :  { %3248 = vmatprep.subr.bf16.mxu0 %v2954_v51 }
 0xc09   :  { %3306 = vmatpush3.bf16.msra.mxu1 %v2887_v44 }
 0xc0a   :  { %3307 = vmatprep.subr.bf16.mxu1 %v3977_v20  ;;  %3249 = vmatpush3.bf16.msra.mxu0 %v2946_v59 }
 0xc0b   :  { %3250 = vmatprep.subr.bf16.mxu0 %v2955_v32 }
 0xc0d   :  { %3308 = vmatpush3.bf16.msra.mxu1 %v2888_v55 }
 0xc0e   :  { %3309 = vmatprep.subr.bf16.mxu1 %v3977_v20  ;;  %3251 = vmatpush3.bf16.msra.mxu0 %v2947_v27 }
 0xc0f   :  { %3252 = vmatprep.subr.bf16.mxu0 %v2956_v33 }
 0xc11   :  { %3310 = vmatpush3.bf16.msra.mxu1 %v2889_v16 }
 0xc12   :  { %3311 = vmatprep.subr.bf16.mxu1 %v3977_v20  ;;  %3253 = vmatpush3.bf16.msra.mxu0 %v2948_v38 }
 0xc13   :  { %3254 = vmatprep.subr.bf16.mxu0 %v2957_v60 }
 0xc15   :  { %3312 = vmatpush3.bf16.msra.mxu1 %v2890_v7 }
 0xc16   :  { %3313 = vmatprep.subr.bf16.mxu1 %v3977_v20  ;;  %3255 = vmatpush3.bf16.msra.mxu0 %v2949_v6 }
 0xc17   :  { %3256 = vmatprep.subr.bf16.mxu0 %v2958_v28 }
 0xc19   :  { %3314 = vmatpush3.bf16.msra.mxu1 %v2891_v35 }
 0xc1a   :  { %3315 = vmatprep.subr.bf16.mxu1 %v3977_v20  ;;  %3257 = vmatpush3.bf16.msra.mxu0 %v2950_v23 }
 0xc1b   :  { %3258 = vmatprep.subr.bf16.mxu0 %v2959_v30 }
 0xc1d   :  { %3316 = vmatpush3.bf16.msra.mxu1 %v2892_v53 }
 0xc1e   :  { %3317 = vmatprep.subr.bf16.mxu1 %v3977_v20  ;;  %3259 = vmatpush3.bf16.msra.mxu0 %v2951_v11 }
 0xc1f   :  { %3260 = vmatprep.subr.bf16.mxu0 %v2960_v14 }
 0xc21   :  { %3318 = vmatpush3.bf16.msra.mxu1 %v2893_v3  ;;  %v3199_v3 = vld [vmem:[%s5994_s10] ss:$0 sm:$0xff] }
 0xc22   :  { %3323 = vmatprep.subr.bf16.mxu1 %v3977_v20  ;;  %3261 = vmatpush3.bf16.msra.mxu0 %v2952_v45 }
 0xcd7   :  { %v2835_v19 = vpop.f32.mrb[68].mxu0  ;;  %v3231_v2 = vpop.f32.mrb[68].mxu1 }
 0xcd8   :  { %v2836_v57 = vadd.f32 %v2835_v19, %v2789_v24  ;;  %v2837_v61 = vpop.f32.mrb[69].mxu0  ;;  %v3232_v50 = vpop.f32.mrb[69].mxu1 }
 0xcd9   :  { %v2838_v0 = vadd.f32 %v2837_v61, %v2793_v18  ;;  %v2839_v46 = vpop.f32.mrb[70].mxu0  ;;  %v3233_v49 = vadd.f32 %v3232_v50, %v3231_v2  ;;  %v3234_v52 = vpop.f32.mrb[70].mxu1 }
 0xcda   :  { %v2882_v63 = vmax.f32 %v2836_v57, 0.0  ;;  %v2840_v10 = vpop.f32.mrb[71].mxu0  ;;  %v3235_v48 = vpop.f32.mrb[71].mxu1 }
 0xcdb   :  { %v2883_v9 = vmax.f32 %v2838_v0, 0.0  ;;  %v2877_v40 = vadd.f32 %v3233_v49, %v2797_v13 }
 0xcdc   :  { %v2885_v31 = vpack.c.bf16 %v2882_v63, %v2882_v63 }
 0xcdd   :  { %v2943_v25 = vpack.c.bf16 %v2883_v9, %v2883_v9  ;;  %v2884_v42 = vmax.f32 %v2877_v40, 0.0 }
 0xcde   :  { %3320 = vmatmul.mubr.bf16.vlgmr.msra.gmra.mrb[72].mxu1 %v2885_v31 }
 0xcdf   :  { %3008 = vmatprep.mubr.bf16.mxu0 %v2943_v25  ;;  %3324 = vmatpush3.bf16.msra.mxu1 %v2961_v36  ;;  %v2944_v8 = vpack.c.bf16 %v2884_v42, %v2884_v42 }
 0xce0   :  { %3325 = vmatprep.subr.bf16.mxu1 %v3977_v20  ;;  %3339 = vmatprep.mubr.msk.bf16.mxu1 %vm3978_vm1, %v3977_v20 }
 0xce3   :  { %3326 = vmatpush3.bf16.msra.mxu1 %v2962_v47 }
 0xce4   :  { %3327 = vmatprep.subr.bf16.mxu1 %v3977_v20 }
 0xce7   :  { %3328 = vmatpush3.bf16.msra.mxu1 %v2963_v26 }
 0xce8   :  { %3329 = vmatprep.subr.bf16.mxu1 %v3977_v20 }
 0xceb   :  { %3330 = vmatpush3.bf16.msra.mxu1 %v2964_v22 }
 0xcec   :  { %3331 = vmatprep.subr.bf16.mxu1 %v3977_v20 }
 0xcef   :  { %3332 = vmatpush3.bf16.msra.mxu1 %v2965_v37 }
 0xcf0   :  { %3333 = vmatprep.subr.bf16.mxu1 %v3977_v20 }
 0xcf3   :  { %3334 = vmatpush3.bf16.msra.mxu1 %v2966_v39 }
 0xcf4   :  { %3335 = vmatprep.subr.bf16.mxu1 %v3977_v20 }
 0xcf7   :  { %3336 = vmatpush3.bf16.msra.mxu1 %v2967_v41 }
 0xcf8   :  { %3337 = vmatprep.subr.bf16.mxu1 %v3977_v20 }
 0xcfb   :  { %3338 = vmatpush3.bf16.msra.mxu1 %v2968_v43 }
 0xcfe   :  { %3340 = vmatmul.mubr.bf16.vlgmr.msra.gmra.mrb[76].mxu1 %v2944_v8 }
 0xdb1   :  { %v2935_v4 = vpop.f32.mrb[72].mxu1 }
 0xdb2   :  { %v2936_v34 = vadd.f32 %v3198_v15, %v2935_v4  ;;  %v3321_v21 = vpop.f32.mrb[73].mxu1 }
 0xdb3   :  { %v2938_v12 = vpop.f32.mrb[74].mxu1 }
 0xdb4   :  { %v2941_v54 = vmax.f32 %v2936_v34, 0.0  ;;  %v3322_v20 = vpop.f32.mrb[75].mxu1 }
 0xdb6   :  { %v2942_v44 = vpack.c.bf16 %v2941_v54, %v2941_v54 }
 0xdb8   :  { %3009 = vmatmul.mubr.bf16.vlgmr.msra.gmra.mrb[72].mxu0 %v2942_v44 }
 0xdd1   :  { %v3050_v55 = vpop.f32.mrb[76].mxu1 }
 0xdd2   :  { %v3341_v16 = vpop.f32.mrb[77].mxu1 }
 0xdd3   :  { %v3053_v7 = vpop.f32.mrb[78].mxu1 }
 0xdd4   :  { %v3342_v35 = vpop.f32.mrb[79].mxu1 }
 0xe8b   :  { %v3262_v53 = vpop.f32.mrb[72].mxu0 }
 0xe8c   :  { %v3263_v62 = vpop.f32.mrb[73].mxu0 }
 0xe8d   :  { %v3264_v5 = vadd.f32 %v3263_v62, %v3262_v53  ;;  %v3265_v51 = vpop.f32.mrb[74].mxu0 }
 0xe8e   :  { %v3266_v59 = vpop.f32.mrb[75].mxu0 }
 0xe8f   :  { %v3011_v32 = vadd.f32 %v3264_v5, %v3199_v3 }
 0xe91   :  { %v3051_v27 = vadd.f32 %v3050_v55, %v3011_v32 }
 0xe93   :  { %3056 = vst [vmem:[%s5999_s15] sm:$0x3] %v3051_v27 }
 0xe94   :  { %3061 = vsyncpa [#allocation8], 1 }
 0xe95   :  { %3062 = vsyncmov [#allocation6] }
 0xe98   :  { %s3063_s19 = vpop.sfrf %3062 }
 0xe99   :  { %p3200_p4 = scmp.ne.s32.totalorder %s3063_s19, 0 }
 0xe9b   :  { %3067 = shalt.err (%p3200_p4)  }
 0xe9c   :  { %3069 = vsyncmov [#allocation6 + $0x1] }
 0xe9f   :  { %s3070_s3 = vpop.sfrf %3069 }
 0xea0   :  { %p3201_p5 = scmp.ne.s32.totalorder %s3070_s3, 0 }
 0xea2   :  { %3074 = shalt.err (%p3201_p5)  }
 0xea3   :  { %3076 = vsyncmov [#allocation6 + $0x2] }
 0xea6   :  { %s3077_s10 = vpop.sfrf %3076 }
 0xea7   :  { %p3202_p6 = scmp.ne.s32.totalorder %s3077_s10, 0 }
 0xea9   :  { %3081 = shalt.err (%p3202_p6)  }
 0xeaa   :  { %3083 = vsyncmov [#allocation6 + $0x3] }
 0xead   :  { %s3084_s25 = vpop.sfrf %3083 }
 0xeae   :  { %p3203_p7 = scmp.ne.s32.totalorder %s3084_s25, 0 }
 0xeb0   :  { %3088 = shalt.err (%p3203_p7)  }

</bundles_post_ra>
